<compile_context>
chip_gen: v7x
topology: tpu7x:2x2x1
jax: 0.10.0
libtpu: 0.0.40
codegen_flags: <defaults>
</compile_context>

<pallas_src>
import jax
import jax.numpy as jnp
from jax.experimental import pallas as pl
from jax.experimental.pallas import tpu as pltpu

LN_EPS = 1e-5   # torch.nn.LayerNorm default eps
BN_EPS = 1e-5   # torch.nn.BatchNorm1d default eps


def _fused_visual_kernel(em_ref, ln_g_ref, ln_b_ref, w_ref, cb_ref,
                         bn_g_ref, bn_b_ref, out_ref, h_acc):
    """CLS-drop mean pool -> LayerNorm -> grouped 1x1 conv -> ReLU -> BatchNorm."""
    step = pl.program_id(0)
    _, P, _ = em_ref.shape
    in_pg, G, out_pg = w_ref.shape

    # ---- per frame-tile: drop CLS token, mean-pool patches, LayerNorm (f32 stats) ----
    em = em_ref[...].astype(jnp.float32)                             # (tile_t, P, W)
    pooled = (jnp.sum(em, axis=1) - em[:, 0, :]) * (1.0 / (P - 1))   # sum-minus-CLS mean
    mu = jnp.mean(pooled, axis=-1, keepdims=True)
    var = jnp.mean((pooled - mu) ** 2, axis=-1, keepdims=True)
    xn = (pooled - mu) * jax.lax.rsqrt(var + LN_EPS)
    xn = xn * ln_g_ref[...].astype(jnp.float32) + ln_b_ref[...].astype(jnp.float32)

    # ---- per frame-tile: grouped 1x1 Conv1d (compact weight) + bias + ReLU ----
    #   h[n, g*out_pg + o] = sum_i xn[n, g*in_pg + i] * w[i, g, o]
    tile_t = xn.shape[0]
    xg = xn.reshape(tile_t, G, in_pg)                                # regroup channels
    acc = xg[:, :, 0:1] * w_ref[0].astype(jnp.float32)               # (tile_t, G, out_pg)
    for i in range(1, in_pg):                                        # static unroll; in_pg small
        acc = acc + xg[:, :, i:i + 1] * w_ref[i].astype(jnp.float32)
    h = acc.reshape(tile_t, G * out_pg) + cb_ref[...].astype(jnp.float32)
    h_acc[step] = jnp.maximum(h, 0.0)                                # stage ReLU'd rows in VMEM

    # ---- last tile: full-batch training-mode BatchNorm (couples every row) ----
    @pl.when(step == pl.num_programs(0) - 1)
    def _finalize():
        num_tiles, tt, C = h_acc.shape
        hall = h_acc[...].reshape(num_tiles * tt, C)                 # merge leading dims
        bmu = jnp.mean(hall, axis=0, keepdims=True)
        bvar = jnp.mean((hall - bmu) ** 2, axis=0, keepdims=True)    # biased batch stats
        y = (hall - bmu) * jax.lax.rsqrt(bvar + BN_EPS)
        out_ref[...] = (y * bn_g_ref[...].astype(jnp.float32)
                        + bn_b_ref[...].astype(jnp.float32)).astype(out_ref.dtype)


def basenet_visual_project(em_raw, ln_gamma, ln_beta, conv_weight, conv_bias,
                           bn_gamma, bn_beta, *, groups, tile_t=8):
    """em_raw: (T, P, W) visual-encoder tokens (CLS first).  Returns (T, C_out).

    Implements  fc_norm(em[:, 1:, :].mean(1))  followed by
    visual_proj = Conv1d(W, C_out, k=1, groups) + ReLU + BatchNorm1d (train mode),
    i.e. the tensor LLM_Train adds onto the first token_image_len embeddings.
    """
    T, P, W = em_raw.shape
    C_out, in_pg = conv_weight.shape                 # torch Conv1d weight, k dim squeezed
    assert W == groups * in_pg and C_out % groups == 0
    out_pg = C_out // groups

    # Compact grouped weight laid out (in_pg, G, out_pg); plain-JAX reshape/transpose,
    # done once outside the kernel.  w_k[i, g, o] = conv_weight[g*out_pg + o, i].
    w_k = jnp.transpose(conv_weight.reshape(groups, out_pg, in_pg), (2, 0, 1))

    tile_t = max(1, min(tile_t, T))
    while T % tile_t:                                # keep the frame grid exact
        tile_t -= 1
    num_tiles = T // tile_t

    return pl.pallas_call(
        _fused_visual_kernel,
        out_shape=jax.ShapeDtypeStruct((T, C_out), em_raw.dtype),
        grid=(num_tiles,),
        in_specs=[
            pl.BlockSpec((tile_t, P, W), lambda i: (i, 0, 0)),           # streamed frames
            pl.BlockSpec((1, W), lambda i: (0, 0)),                      # LN gamma
            pl.BlockSpec((1, W), lambda i: (0, 0)),                      # LN beta
            pl.BlockSpec((in_pg, groups, out_pg), lambda i: (0, 0, 0)),  # grouped weight
            pl.BlockSpec((1, C_out), lambda i: (0, 0)),                  # conv bias
            pl.BlockSpec((1, C_out), lambda i: (0, 0)),                  # BN gamma
            pl.BlockSpec((1, C_out), lambda i: (0, 0)),                  # BN beta
        ],
        out_specs=pl.BlockSpec((T, C_out), lambda i: (0, 0)),            # lane-dense out
        scratch_shapes=[pltpu.VMEM((num_tiles, tile_t, C_out), jnp.float32)],
        compiler_params=pltpu.CompilerParams(
            # Frame axis carries the scratch accumulation + final BN -> not parallel.
            dimension_semantics=("arbitrary",),
            vmem_limit_bytes=32 * 1024 * 1024,
        ),
    )(em_raw, ln_gamma, ln_beta, w_k, conv_bias, bn_gamma, bn_beta)


# --------------------------------------------------------------------------
# Pure-JAX reference (exact f32) for the correctness check
# --------------------------------------------------------------------------
def ref_visual_path(em_raw, ln_g, ln_b, conv_w, conv_b, bn_g, bn_b, *, groups):
    pooled = em_raw[:, 1:, :].mean(axis=1)
    mu = pooled.mean(-1, keepdims=True)
    var = ((pooled - mu) ** 2).mean(-1, keepdims=True)
    x = (pooled - mu) / jnp.sqrt(var + LN_EPS) * ln_g + ln_b
    N, W = x.shape
    C_out, in_pg = conv_w.shape
    out_pg = C_out // groups
    xg = x.reshape(N, groups, in_pg)
    w_k = jnp.transpose(conv_w.reshape(groups, out_pg, in_pg), (2, 0, 1))  # (i, g, o)
    h = jnp.einsum("ngi,igo->ngo", xg, w_k,
                   precision=jax.lax.Precision.HIGHEST).reshape(N, C_out) + conv_b
    h = jnp.maximum(h, 0.0)
    bmu = h.mean(0, keepdims=True)
    bvar = ((h - bmu) ** 2).mean(0, keepdims=True)
    return (h - bmu) / jnp.sqrt(bvar + BN_EPS) * bn_g + bn_b


if __name__ == "__main__":
    # Small synthetic config (stand-ins: vision_width 1024 -> 256, proj 4096 -> 512)
    B = 1        # self.batch_size = 1 in the module
    T = 8        # token_image_len (frames fed through the visual encoder)
    P = 17       # 1 CLS token + 16 patch tokens
    W = 256      # vision_width stand-in (real swin_b: 1024)
    GROUPS = 64  # Conv1d groups=64, from the module
    C_OUT = 512  # projection width stand-in (real: 4096)

    key = jax.random.PRNGKey(0)
    k_em, k_w, k_cb = jax.random.split(key, 3)

    # TODO(synk): the Swin/CLIP visual encoder, SentencePiece tokenizer, LLaMA-7B
    # transformer + cross-entropy loss, and the backward-only AdjustGradHook are
    # external pretrained / non-forward components and are not translated; the
    # encoder output is stood in for by a synthetic (T, P, W) feature tensor.
    em_raw = jax.random.normal(k_em, (T, P, W), dtype=jnp.float32)

    # fc_norm params (torch LayerNorm init: weight=1, bias=0)
    ln_gamma = jnp.ones((1, W), jnp.float32)
    ln_beta = jnp.zeros((1, W), jnp.float32)

    # visual_proj params (deterministic synthetic init)
    conv_weight = 0.05 * jax.random.normal(k_w, (C_OUT, W // GROUPS), jnp.float32)
    conv_bias = 0.01 * jax.random.normal(k_cb, (1, C_OUT), jnp.float32)
    bn_gamma = jnp.ones((1, C_OUT), jnp.float32)
    bn_beta = jnp.zeros((1, C_OUT), jnp.float32)

    # --- run the fused kernel (2 frame-tiles of 4 frames each) ---
    proj = basenet_visual_project(em_raw, ln_gamma, ln_beta, conv_weight,
                                  conv_bias, bn_gamma, bn_beta,
                                  groups=GROUPS, tile_t=4)
    em_project_input = proj.reshape(B, T, C_OUT)   # .view(B, token_image_len, 4096)
    jax.block_until_ready(em_project_input)

    # --- verify against plain JAX ---
    ref = ref_visual_path(em_raw, ln_gamma, ln_beta, conv_weight, conv_bias,
                          bn_gamma, bn_beta, groups=GROUPS)
    assert jnp.allclose(proj, ref, atol=2e-4, rtol=2e-4), \
        float(jnp.max(jnp.abs(proj - ref)))

    print("KERNEL_OK")
</pallas_src>

<mosaic_0001>
module attributes {stable_mosaic.version = 11 : i64} {
  func.func @_fused_visual_kernel(%arg0: i32, %arg1: memref<4x17x256xf32, #tpu.memory_space<vmem>>, %arg2: memref<1x256xf32, #tpu.memory_space<vmem>>, %arg3: memref<1x256xf32, #tpu.memory_space<vmem>>, %arg4: memref<4x64x8xf32, #tpu.memory_space<vmem>>, %arg5: memref<1x512xf32, #tpu.memory_space<vmem>>, %arg6: memref<1x512xf32, #tpu.memory_space<vmem>>, %arg7: memref<1x512xf32, #tpu.memory_space<vmem>>, %arg8: memref<8x512xf32, #tpu.memory_space<vmem>>, %arg9: memref<2x4x512xf32, #tpu.memory_space<vmem>>) attributes {dimension_semantics = [#tpu.dimension_semantics<arbitrary>], iteration_bounds = array<i64: 2>, scalar_prefetch = 0 : i64, scratch_operands = 1 : i64, tpu.core_type = #tpu.core_type<tc>, window_params = [{transform_indices = @transform_0, window_bounds = array<i64: 4, 17, 256>}, {pipeline_mode = #tpu.pipeline_mode<synchronous>, transform_indices = @transform_1, window_bounds = array<i64: 1, 256>}, {pipeline_mode = #tpu.pipeline_mode<synchronous>, transform_indices = @transform_2, window_bounds = array<i64: 1, 256>}, {pipeline_mode = #tpu.pipeline_mode<synchronous>, transform_indices = @transform_3, window_bounds = array<i64: 4, 64, 8>}, {pipeline_mode = #tpu.pipeline_mode<synchronous>, transform_indices = @transform_4, window_bounds = array<i64: 1, 512>}, {pipeline_mode = #tpu.pipeline_mode<synchronous>, transform_indices = @transform_5, window_bounds = array<i64: 1, 512>}, {pipeline_mode = #tpu.pipeline_mode<synchronous>, transform_indices = @transform_6, window_bounds = array<i64: 1, 512>}, {pipeline_mode = #tpu.pipeline_mode<synchronous>, transform_indices = @transform_7, window_bounds = array<i64: 8, 512>}]} {
    %c0 = arith.constant 0 : index
    %c0_0 = arith.constant 0 : index
    %c0_1 = arith.constant 0 : index
    %0 = vector.load %arg1[%c0, %c0_0, %c0_1] : memref<4x17x256xf32, #tpu.memory_space<vmem>>, vector<4x17x256xf32>
    %cst = arith.constant dense<0.000000e+00> : vector<4x256xf32>
    %1 = vector.multi_reduction <add>, %0, %cst [1] : vector<4x17x256xf32> to vector<4x256xf32>
    %2 = vector.extract_strided_slice %0 {offsets = [0, 0, 0], sizes = [4, 1, 256], strides = [1, 1, 1]} : vector<4x17x256xf32> to vector<4x1x256xf32>
    %3 = vector.shape_cast %2 : vector<4x1x256xf32> to vector<4x256xf32>
    %4 = arith.subf %1, %3 : vector<4x256xf32>
    %cst_2 = arith.constant 6.250000e-02 : f32
    %5 = vector.broadcast %cst_2 : f32 to vector<4x256xf32>
    %6 = arith.mulf %4, %5 : vector<4x256xf32>
    %cst_3 = arith.constant dense<0.000000e+00> : vector<4xf32>
    %7 = vector.multi_reduction <add>, %6, %cst_3 [1] : vector<4x256xf32> to vector<4xf32>
    %8 = vector.shape_cast %7 : vector<4xf32> to vector<4x1xf32>
    %cst_4 = arith.constant 2.560000e+02 : f32
    %9 = vector.broadcast %cst_4 : f32 to vector<4x1xf32>
    %10 = arith.divf %8, %9 : vector<4x1xf32>
    %11 = vector.broadcast %10 : vector<4x1xf32> to vector<4x256xf32>
    %12 = arith.subf %6, %11 : vector<4x256xf32>
    %13 = arith.mulf %12, %12 : vector<4x256xf32>
    %cst_5 = arith.constant dense<0.000000e+00> : vector<4xf32>
    %14 = vector.multi_reduction <add>, %13, %cst_5 [1] : vector<4x256xf32> to vector<4xf32>
    %15 = vector.shape_cast %14 : vector<4xf32> to vector<4x1xf32>
    %cst_6 = arith.constant 2.560000e+02 : f32
    %16 = vector.broadcast %cst_6 : f32 to vector<4x1xf32>
    %17 = arith.divf %15, %16 : vector<4x1xf32>
    %18 = vector.broadcast %10 : vector<4x1xf32> to vector<4x256xf32>
    %19 = arith.subf %6, %18 : vector<4x256xf32>
    %cst_7 = arith.constant 9.99999974E-6 : f32
    %20 = vector.broadcast %cst_7 : f32 to vector<4x1xf32>
    %21 = arith.addf %17, %20 : vector<4x1xf32>
    %22 = math.rsqrt %21 : vector<4x1xf32>
    %23 = vector.broadcast %22 : vector<4x1xf32> to vector<4x256xf32>
    %24 = arith.mulf %19, %23 : vector<4x256xf32>
    %c0_8 = arith.constant 0 : index
    %c0_9 = arith.constant 0 : index
    %25 = vector.load %arg2[%c0_8, %c0_9] : memref<1x256xf32, #tpu.memory_space<vmem>>, vector<1x256xf32>
    %26 = vector.broadcast %25 : vector<1x256xf32> to vector<4x256xf32>
    %27 = arith.mulf %24, %26 : vector<4x256xf32>
    %c0_10 = arith.constant 0 : index
    %c0_11 = arith.constant 0 : index
    %28 = vector.load %arg3[%c0_10, %c0_11] : memref<1x256xf32, #tpu.memory_space<vmem>>, vector<1x256xf32>
    %29 = vector.broadcast %28 : vector<1x256xf32> to vector<4x256xf32>
    %30 = arith.addf %27, %29 : vector<4x256xf32>
    %31 = vector.shape_cast %30 : vector<4x256xf32> to vector<4x64x4xf32>
    %32 = vector.extract_strided_slice %31 {offsets = [0, 0, 0], sizes = [4, 64, 1], strides = [1, 1, 1]} : vector<4x64x4xf32> to vector<4x64x1xf32>
    %c0_12 = arith.constant 0 : index
    %c0_13 = arith.constant 0 : index
    %c0_14 = arith.constant 0 : index
    %33 = vector.load %arg4[%c0_12, %c0_13, %c0_14] : memref<4x64x8xf32, #tpu.memory_space<vmem>>, vector<1x64x8xf32>
    %34 = vector.shape_cast %33 : vector<1x64x8xf32> to vector<64x8xf32>
    %35 = vector.shape_cast %34 : vector<64x8xf32> to vector<1x64x8xf32>
    %36 = vector.broadcast %32 : vector<4x64x1xf32> to vector<4x64x8xf32>
    %37 = vector.broadcast %35 : vector<1x64x8xf32> to vector<4x64x8xf32>
    %38 = arith.mulf %36, %37 : vector<4x64x8xf32>
    %39 = vector.extract_strided_slice %31 {offsets = [0, 0, 1], sizes = [4, 64, 1], strides = [1, 1, 1]} : vector<4x64x4xf32> to vector<4x64x1xf32>
    %c1 = arith.constant 1 : index
    %c0_15 = arith.constant 0 : index
    %c0_16 = arith.constant 0 : index
    %40 = vector.load %arg4[%c1, %c0_15, %c0_16] : memref<4x64x8xf32, #tpu.memory_space<vmem>>, vector<1x64x8xf32>
    %41 = vector.shape_cast %40 : vector<1x64x8xf32> to vector<64x8xf32>
    %42 = vector.shape_cast %41 : vector<64x8xf32> to vector<1x64x8xf32>
    %43 = vector.broadcast %39 : vector<4x64x1xf32> to vector<4x64x8xf32>
    %44 = vector.broadcast %42 : vector<1x64x8xf32> to vector<4x64x8xf32>
    %45 = arith.mulf %43, %44 : vector<4x64x8xf32>
    %46 = arith.addf %38, %45 : vector<4x64x8xf32>
    %47 = vector.extract_strided_slice %31 {offsets = [0, 0, 2], sizes = [4, 64, 1], strides = [1, 1, 1]} : vector<4x64x4xf32> to vector<4x64x1xf32>
    %c2 = arith.constant 2 : index
    %c0_17 = arith.constant 0 : index
    %c0_18 = arith.constant 0 : index
    %48 = vector.load %arg4[%c2, %c0_17, %c0_18] : memref<4x64x8xf32, #tpu.memory_space<vmem>>, vector<1x64x8xf32>
    %49 = vector.shape_cast %48 : vector<1x64x8xf32> to vector<64x8xf32>
    %50 = vector.shape_cast %49 : vector<64x8xf32> to vector<1x64x8xf32>
    %51 = vector.broadcast %47 : vector<4x64x1xf32> to vector<4x64x8xf32>
    %52 = vector.broadcast %50 : vector<1x64x8xf32> to vector<4x64x8xf32>
    %53 = arith.mulf %51, %52 : vector<4x64x8xf32>
    %54 = arith.addf %46, %53 : vector<4x64x8xf32>
    %55 = vector.extract_strided_slice %31 {offsets = [0, 0, 3], sizes = [4, 64, 1], strides = [1, 1, 1]} : vector<4x64x4xf32> to vector<4x64x1xf32>
    %c3 = arith.constant 3 : index
    %c0_19 = arith.constant 0 : index
    %c0_20 = arith.constant 0 : index
    %56 = vector.load %arg4[%c3, %c0_19, %c0_20] : memref<4x64x8xf32, #tpu.memory_space<vmem>>, vector<1x64x8xf32>
    %57 = vector.shape_cast %56 : vector<1x64x8xf32> to vector<64x8xf32>
    %58 = vector.shape_cast %57 : vector<64x8xf32> to vector<1x64x8xf32>
    %59 = vector.broadcast %55 : vector<4x64x1xf32> to vector<4x64x8xf32>
    %60 = vector.broadcast %58 : vector<1x64x8xf32> to vector<4x64x8xf32>
    %61 = arith.mulf %59, %60 : vector<4x64x8xf32>
    %62 = arith.addf %54, %61 : vector<4x64x8xf32>
    %63 = vector.shape_cast %62 : vector<4x64x8xf32> to vector<4x512xf32>
    %c0_21 = arith.constant 0 : index
    %c0_22 = arith.constant 0 : index
    %64 = vector.load %arg5[%c0_21, %c0_22] : memref<1x512xf32, #tpu.memory_space<vmem>>, vector<1x512xf32>
    %65 = vector.broadcast %64 : vector<1x512xf32> to vector<4x512xf32>
    %66 = arith.addf %63, %65 : vector<4x512xf32>
    %cst_23 = arith.constant 0.000000e+00 : f32
    %67 = vector.broadcast %cst_23 : f32 to vector<4x512xf32>
    %68 = arith.maximumf %66, %67 : vector<4x512xf32>
    %69 = arith.index_cast %arg0 : i32 to index
    %c0_24 = arith.constant 0 : index
    %c0_25 = arith.constant 0 : index
    %70 = vector.load %arg9[%69, %c0_24, %c0_25] : memref<2x4x512xf32, #tpu.memory_space<vmem>>, vector<1x4x512xf32>
    %71 = vector.shape_cast %70 : vector<1x4x512xf32> to vector<4x512xf32>
    %72 = vector.shape_cast %68 : vector<4x512xf32> to vector<1x4x512xf32>
    tpu.vector_store %arg9[%69, %c0_24, %c0_25], %72 {strides = array<i32>} : memref<2x4x512xf32, #tpu.memory_space<vmem>>, vector<1x4x512xf32>,
    %c1_i32 = arith.constant 1 : i32
    %73 = arith.cmpi eq, %arg0, %c1_i32 : i32
    %74 = arith.extui %73 : i1 to i32
    %c0_i32 = arith.constant 0 : i32
    %75 = arith.cmpi ne, %74, %c0_i32 : i32
    scf.if %75 {
      %c0_26 = arith.constant 0 : index
      %c0_27 = arith.constant 0 : index
      %c0_28 = arith.constant 0 : index
      %76 = vector.load %arg9[%c0_26, %c0_27, %c0_28] : memref<2x4x512xf32, #tpu.memory_space<vmem>>, vector<2x4x512xf32>
      %77 = vector.shape_cast %76 : vector<2x4x512xf32> to vector<8x512xf32>
      %cst_29 = arith.constant dense<0.000000e+00> : vector<512xf32>
      %78 = vector.multi_reduction <add>, %77, %cst_29 [0] : vector<8x512xf32> to vector<512xf32>
      %79 = vector.shape_cast %78 : vector<512xf32> to vector<1x512xf32>
      %cst_30 = arith.constant 8.000000e+00 : f32
      %80 = vector.broadcast %cst_30 : f32 to vector<1x512xf32>
      %81 = arith.divf %79, %80 : vector<1x512xf32>
      %82 = vector.broadcast %81 : vector<1x512xf32> to vector<8x512xf32>
      %83 = arith.subf %77, %82 : vector<8x512xf32>
      %84 = arith.mulf %83, %83 : vector<8x512xf32>
      %cst_31 = arith.constant dense<0.000000e+00> : vector<512xf32>
      %85 = vector.multi_reduction <add>, %84, %cst_31 [0] : vector<8x512xf32> to vector<512xf32>
      %86 = vector.shape_cast %85 : vector<512xf32> to vector<1x512xf32>
      %cst_32 = arith.constant 8.000000e+00 : f32
      %87 = vector.broadcast %cst_32 : f32 to vector<1x512xf32>
      %88 = arith.divf %86, %87 : vector<1x512xf32>
      %89 = vector.broadcast %81 : vector<1x512xf32> to vector<8x512xf32>
      %90 = arith.subf %77, %89 : vector<8x512xf32>
      %cst_33 = arith.constant 9.99999974E-6 : f32
      %91 = vector.broadcast %cst_33 : f32 to vector<1x512xf32>
      %92 = arith.addf %88, %91 : vector<1x512xf32>
      %93 = math.rsqrt %92 : vector<1x512xf32>
      %94 = vector.broadcast %93 : vector<1x512xf32> to vector<8x512xf32>
      %95 = arith.mulf %90, %94 : vector<8x512xf32>
      %c0_34 = arith.constant 0 : index
      %c0_35 = arith.constant 0 : index
      %96 = vector.load %arg6[%c0_34, %c0_35] : memref<1x512xf32, #tpu.memory_space<vmem>>, vector<1x512xf32>
      %97 = vector.broadcast %96 : vector<1x512xf32> to vector<8x512xf32>
      %98 = arith.mulf %95, %97 : vector<8x512xf32>
      %c0_36 = arith.constant 0 : index
      %c0_37 = arith.constant 0 : index
      %99 = vector.load %arg7[%c0_36, %c0_37] : memref<1x512xf32, #tpu.memory_space<vmem>>, vector<1x512xf32>
      %100 = vector.broadcast %99 : vector<1x512xf32> to vector<8x512xf32>
      %101 = arith.addf %98, %100 : vector<8x512xf32>
      %c0_38 = arith.constant 0 : index
      %c0_39 = arith.constant 0 : index
      %102 = vector.load %arg8[%c0_38, %c0_39] : memref<8x512xf32, #tpu.memory_space<vmem>>, vector<8x512xf32>
      tpu.vector_store %arg8[%c0_38, %c0_39], %101 {strides = array<i32>} : memref<8x512xf32, #tpu.memory_space<vmem>>, vector<8x512xf32>,
    } else {
    }
    return
  }
  func.func @transform_0(%arg0: i32) -> (i32, i32, i32) {
    %c0_i32 = arith.constant 0 : i32
    %c0_i32_0 = arith.constant 0 : i32
    %c0_i32_1 = arith.constant 0 : i32
    return %arg0, %c0_i32, %c0_i32_0 : i32, i32, i32
  }
  func.func @transform_1(%arg0: i32) -> (i32, i32) {
    %c0_i32 = arith.constant 0 : i32
    %c0_i32_0 = arith.constant 0 : i32
    %c0_i32_1 = arith.constant 0 : i32
    return %c0_i32, %c0_i32_0 : i32, i32
  }
  func.func @transform_2(%arg0: i32) -> (i32, i32) {
    %c0_i32 = arith.constant 0 : i32
    %c0_i32_0 = arith.constant 0 : i32
    %c0_i32_1 = arith.constant 0 : i32
    return %c0_i32, %c0_i32_0 : i32, i32
  }
  func.func @transform_3(%arg0: i32) -> (i32, i32, i32) {
    %c0_i32 = arith.constant 0 : i32
    %c0_i32_0 = arith.constant 0 : i32
    %c0_i32_1 = arith.constant 0 : i32
    %c0_i32_2 = arith.constant 0 : i32
    return %c0_i32, %c0_i32_0, %c0_i32_1 : i32, i32, i32
  }
  func.func @transform_4(%arg0: i32) -> (i32, i32) {
    %c0_i32 = arith.constant 0 : i32
    %c0_i32_0 = arith.constant 0 : i32
    %c0_i32_1 = arith.constant 0 : i32
    return %c0_i32, %c0_i32_0 : i32, i32
  }
  func.func @transform_5(%arg0: i32) -> (i32, i32) {
    %c0_i32 = arith.constant 0 : i32
    %c0_i32_0 = arith.constant 0 : i32
    %c0_i32_1 = arith.constant 0 : i32
    return %c0_i32, %c0_i32_0 : i32, i32
  }
  func.func @transform_6(%arg0: i32) -> (i32, i32) {
    %c0_i32 = arith.constant 0 : i32
    %c0_i32_0 = arith.constant 0 : i32
    %c0_i32_1 = arith.constant 0 : i32
    return %c0_i32, %c0_i32_0 : i32, i32
  }
  func.func @transform_7(%arg0: i32) -> (i32, i32) {
    %c0_i32 = arith.constant 0 : i32
    %c0_i32_0 = arith.constant 0 : i32
    %c0_i32_1 = arith.constant 0 : i32
    return %c0_i32, %c0_i32_0 : i32, i32
  }
}

</mosaic_0001>

<bundles_post_ra>
// kernel: tpu_custom_call.1
= control target key start
LH: loop header
LB: loop body
LE: loop exit
PB: predicated region body
PF: predicated region fallthrough
CT: control target
= control target key end

     0   :  { %s6917_s0 = inlined_call_operand.vmem [shape: f32[8,17,256], index: 0, kind: input, shape index: {}]   ;;  %s6918_s1 = inlined_call_operand.vmem [shape: f32[1,256], index: 1, kind: input, shape index: {}]   ;;  %s6919_s2 = inlined_call_operand.vmem [shape: f32[1,256], index: 2, kind: input, shape index: {}]   ;;  %s6920_s3 = inlined_call_operand.vmem [shape: f32[4,64,8], index: 3, kind: input, shape index: {}]   ;;  %s6921_s4 = inlined_call_operand.vmem [shape: f32[1,512], index: 4, kind: input, shape index: {}]   ;;  %s6922_s5 = inlined_call_operand.vmem [shape: f32[1,512], index: 5, kind: input, shape index: {}]   ;;  %s6923_s6 = inlined_call_operand.vmem [shape: f32[1,512], index: 6, kind: input, shape index: {}]   ;;  %s6924_s7 = inlined_call_operand.hbm [shape: f32[8,512], index: 7, kind: output, shape index: {}]  }
   0x1   :  { %7032 = sst [smem:[#allocation79_spill]] %s6917_s0 }
   0x2   :  { %7033 = sst [smem:[#allocation80_spill]] %s6918_s1 }
   0x3   :  { %7034 = sst [smem:[#allocation81_spill]] %s6919_s2 }
   0x4   :  { %7035 = sst [smem:[#allocation82_spill]] %s6922_s5 }
   0x5   :  { %7036 = sst [smem:[#allocation83_spill]] %s6923_s6 }
   0x6   :  { %7037 = sst [smem:[#allocation84_spill]] %s6924_s7 }
   0x7   :  { %12 = vsyncpa [#allocation4], 0  ;;  %s4215_s24 = smov 0  }
   0x8 LB: > { %7038 = sst [smem:[#allocation6_spill]] %s4134_s24  ;;  %s4221_s25 = sadd.s32 4294967295, %s4134_s24   ;;  %s4134_s24 = sphi %s4215_s24, %s18_s24  }
   0x9   : > { %p3987_p0 = scmp.ge.s32.totalorder %s4134_s24, 1  ;;  %p235_p1 = scmp.lt.s32.totalorder %s4134_s24, 3 }
   0xb   : > { %p236_p2 = pnand %p3987_p0, %p235_p1 }
   0xd   : > { %239 = sbr.rel (%p236_p2) target bundleno = 1735 (0x6c7), region = 48 }
  0x14   : > { %s3988_s26 = sshll.u32 %s4221_s25, 2  ;;  %s7039_s0 = sld [smem:[#allocation79_spill]]  ;;  %vm295_vm0 = vcmask 1040384   ;;  %vm392_vm1 = vcmask 1041409   ;;  %vm395_vm2 = vcmask 1042434   ;;  %vm398_vm3 = vcmask 1043459  }
  0x15   : > { %p264_p3 = scmp.lt.s32.totalorder %s3988_s26, 7  ;;  %vm408_vm4 = vcmask 1043456   ;;  %s7043_s1 = sld [smem:[#allocation80_spill]]  ;;  %vm3609_vm5 = vcmask 64512   ;;  %vm3611_vm6 = vcmask 130048   ;;  %vm3613_vm7 = vcmask 195584  }
  0x16   : > { %s7044_s2 = sld [smem:[#allocation81_spill]]  ;;  %s6973_s12 = smov 124   ;;  %vm3615_vm8 = vcmask 261120   ;;  %vm3617_vm9 = vcmask 326656   ;;  %vm3619_vm10 = vcmask 392192   ;;  %vm3621_vm11 = vcmask 457728  }
  0x17   : > { %s7357_s26 = smov (!%p264_p3, %s3988_s26), 7  ;;  %s6976_s13 = smov 120   ;;  %vm3623_vm12 = vcmask 523264   ;;  %vm3625_vm13 = vcmask 588800   ;;  %vm3627_vm14 = vcmask 654336   ;;  %vm3629_vm15 = vcmask 719872  }
  0x18   : > { %s4022_s27 = smul.u32 48, %s7357_s26  ;;  %s6980_s14 = smov 116  }
  0x19   : > { %s6984_s15 = smov 112   ;;  %s6981_s16 = smov 108  }
  0x1a   : > { %s4229_s30 = scalar_lea.vmem %s7039_s0, %s4022_s27  ;;  %s6986_s17 = smov 104  }
  0x1b   : > { %v4232_v0 = vld [vmem:[%s4229_s30] sm:$0xff]  ;;  %v4235_v1 = vld [vmem:[%s4229_s30 + $0x8] sm:$0xff]  ;;  %v272_v2 = vld [vmem:[%s4229_s30 + $0x10] sm:$0xff]  ;;  %s6978_s18 = smov 100   ;;  %s6971_s19 = smov 96  }
  0x1c   : > { %v273_v3 = vld [vmem:[%s4229_s30 + $0x18] sm:$0xff]  ;;  %v274_v4 = vld [vmem:[%s4229_s30 + $0x20] sm:$0x1]  ;;  %v275_v5 = vld [vmem:[%s4229_s30 + $0x28] sm:$0x1]  ;;  %v294_v6 = vadd.f32 %v272_v2, %v4232_v0  ;;  %s6929_s20 = smov 92  }
  0x1d   : > { %v4243_v7 = vld [vmem:[%s4229_s30 + $0x30] sm:$0xff]  ;;  %v4246_v8 = vld [vmem:[%s4229_s30 + $0x38] sm:$0xff]  ;;  %v278_v9 = vld [vmem:[%s4229_s30 + $0x40] sm:$0xff]  ;;  %v296_v10 = vsel %vm295_vm0, %v274_v4, 0.0  ;;  %v304_v11 = vadd.f32 %v273_v3, %v4235_v1  ;;  %v305_v12 = vsel %vm295_vm0, %v275_v5, 0.0  ;;  %s6925_s21 = smov 88  }
  0x1e   : > { %v279_v13 = vld [vmem:[%s4229_s30 + $0x48] sm:$0xff]  ;;  %v280_v14 = vld [vmem:[%s4229_s30 + $0x50] sm:$0x1]  ;;  %v281_v15 = vld [vmem:[%s4229_s30 + $0x58] sm:$0x1]  ;;  %v297_v16 = vadd.f32 %v296_v10, %v294_v6  ;;  %v313_v17 = vadd.f32 %v278_v9, %v4243_v7  ;;  %s6927_s22 = smov 84  }
  0x1f   : > { %v4257_v18 = vld [vmem:[%s4229_s30 + $0x60] sm:$0xff]  ;;  %v4260_v19 = vld [vmem:[%s4229_s30 + $0x68] sm:$0xff]  ;;  %v284_v20 = vld [vmem:[%s4229_s30 + $0x70] sm:$0xff]  ;;  %v306_v21 = vadd.f32 %v305_v12, %v304_v11  ;;  %v314_v22 = vsel %vm295_vm0, %v280_v14, 0.0  ;;  %v322_v23 = vadd.f32 %v279_v13, %v4246_v8  ;;  %v323_v24 = vsel %vm295_vm0, %v281_v15, 0.0  ;;  %s6931_s23 = smov 80  }
  0x20   : > { %v285_v25 = vld [vmem:[%s4229_s30 + $0x78] sm:$0xff]  ;;  %v286_v26 = vld [vmem:[%s4229_s30 + $0x80] sm:$0x1]  ;;  %v287_v27 = vld [vmem:[%s4229_s30 + $0x88] sm:$0x1]  ;;  %v298_v28 = vrot.slane %v297_v16, 4  ;;  %v315_v29 = vadd.f32 %v314_v22, %v313_v17  ;;  %v331_v30 = vadd.f32 %v284_v20, %v4257_v18 }
  0x21   : > { %v4271_v31 = vld [vmem:[%s4229_s30 + $0x90] sm:$0xff]  ;;  %v290_v32 = vld [vmem:[%s4229_s30 + $0xa0] sm:$0xff]  ;;  %v307_v33 = vrot.slane %v306_v21, 4  ;;  %v324_v34 = vadd.f32 %v323_v24, %v322_v23  ;;  %v332_v35 = vsel %vm295_vm0, %v286_v26, 0.0  ;;  %v340_v36 = vadd.f32 %v285_v25, %v4260_v19  ;;  %v4277_v37 = vld [vmem:[%s4229_s30 + $0x98] sm:$0xff]  ;;  %s6935_s26 = smov 76  }
  0x22   : > { %v291_v38 = vld [vmem:[%s4229_s30 + $0xa8] sm:$0xff]  ;;  %v292_v39 = vld [vmem:[%s4229_s30 + $0xb0] sm:$0x1]  ;;  %v299_v40 = vadd.f32 %v298_v28, %v297_v16  ;;  %v316_v41 = vrot.slane %v315_v29, 4  ;;  %v333_v42 = vadd.f32 %v332_v35, %v331_v30  ;;  %v349_v43 = vadd.f32 %v290_v32, %v4271_v31  ;;  %v293_v48 = vld [vmem:[%s4229_s30 + $0xb8] sm:$0x1] }
  0x23   : > { %v308_v44 = vadd.f32 %v307_v33, %v306_v21  ;;  %v325_v45 = vrot.slane %v324_v34, 4  ;;  %v341_v46 = vsel %vm295_vm0, %v287_v27, 0.0  ;;  %v350_v47 = vsel %vm295_vm0, %v292_v39, 0.0  ;;  %s6939_s27 = smov 72   ;;  %s6943_s28 = smov 68  }
  0x24   : > { %v300_v49 = vrot.slane %v299_v40, 2  ;;  %v317_v50 = vadd.f32 %v316_v41, %v315_v29  ;;  %v334_v51 = vrot.slane %v333_v42, 4  ;;  %v342_v52 = vadd.f32 %v341_v46, %v340_v36  ;;  %s6955_s29 = smov 64   ;;  %s6953_s30 = smov 60  }
  0x25   : > { %v309_v53 = vrot.slane %v308_v44, 2  ;;  %v326_v54 = vadd.f32 %v325_v45, %v324_v34  ;;  %v351_v55 = vadd.f32 %v350_v47, %v349_v43  ;;  %v358_v56 = vadd.f32 %v291_v38, %v4277_v37  ;;  %s6949_s8 = smov 56   ;;  %s6947_s9 = smov 52  }
  0x26   : > { %v301_v57 = vadd.f32 %v300_v49, %v299_v40  ;;  %v318_v58 = vrot.slane %v317_v50, 2  ;;  %v335_v59 = vadd.f32 %v334_v51, %v333_v42  ;;  %v343_v60 = vrot.slane %v342_v52, 4  ;;  %s6945_s10 = smov 48   ;;  %s6951_s11 = smov 44  }
  0x27   : > { %v310_v61 = vadd.f32 %v309_v53, %v308_v44  ;;  %v327_v62 = vrot.slane %v326_v54, 2  ;;  %v352_v63 = vrot.slane %v351_v55, 4  ;;  %v359_v2 = vsel %vm295_vm0, %v293_v48, 0.0  ;;  %s7116_s0 = smov 16   ;;  %s7121_s24 = smov 124  }
  0x28   : > { %v302_v3 = vrot.slane %v301_v57, 1  ;;  %v319_v4 = vadd.f32 %v318_v58, %v317_v50  ;;  %v336_v5 = vrot.slane %v335_v59, 2  ;;  %v344_v6 = vadd.f32 %v343_v60, %v342_v52  ;;  %s7123_s7 = smov 116   ;;  %s7125_s6 = smov 108  }
  0x29   : > { %v311_v9 = vrot.slane %v310_v61, 1  ;;  %v328_v10 = vadd.f32 %v327_v62, %v326_v54  ;;  %v353_v11 = vadd.f32 %v352_v63, %v351_v55  ;;  %v360_v12 = vadd.f32 %v359_v2, %v358_v56  ;;  %s7127_s5 = smov 104   ;;  %p4016_p4 = scmp.ne.s32.totalorder %s4221_s25, 1 }
  0x2a   : > { %v303_v13 = vadd.f32 %v302_v3, %v301_v57  ;;  %v320_v14 = vrot.slane %v319_v4, 1  ;;  %v337_v15 = vadd.f32 %v336_v5, %v335_v59  ;;  %v345_v16 = vrot.slane %v344_v6, 2 }
  0x2b   : > { %v312_v17 = vadd.f32 %v311_v9, %v310_v61  ;;  %v329_v20 = vrot.slane %v328_v10, 1  ;;  %v354_v21 = vrot.slane %v353_v11, 2  ;;  %v361_v22 = vrot.slane %v360_v12, 4 }
  0x2c   : > { %v321_v23 = vadd.f32 %v320_v14, %v319_v4  ;;  %v338_v24 = vrot.slane %v337_v15, 1  ;;  %v346_v25 = vadd.f32 %v345_v16, %v344_v6  ;;  %v367_v26 = vsub.f32 %v303_v13, %v4232_v0 }
  0x2d   : > { %v330_v27 = vadd.f32 %v329_v20, %v328_v10  ;;  %v355_v28 = vadd.f32 %v354_v21, %v353_v11  ;;  %v362_v29 = vadd.f32 %v361_v22, %v360_v12  ;;  %v368_v36 = vsub.f32 %v312_v17, %v4235_v1 }
  0x2e   : > { %v339_v30 = vadd.f32 %v338_v24, %v337_v15  ;;  %v347_v32 = vrot.slane %v346_v25, 1  ;;  %v369_v33 = vsub.f32 %v321_v23, %v4243_v7  ;;  %v375_v41 = vmul.f32 0.0625, %v367_v26 }
  0x2f   : > { %v356_v34 = vrot.slane %v355_v28, 1  ;;  %v363_v35 = vrot.slane %v362_v29, 2  ;;  %v370_v38 = vsub.f32 %v330_v27, %v4246_v8  ;;  %v376_v1 = vmul.f32 0.0625, %v368_v36 }
  0x30   : > { %v348_v39 = vadd.f32 %v347_v32, %v346_v25  ;;  %v371_v40 = vsub.f32 %v339_v30, %v4257_v18  ;;  %v377_v42 = vmul.f32 0.0625, %v369_v33  ;;  %vm3631_vm0 = vcmask 785408  }
  0x31   : > { %v357_v43 = vadd.f32 %v356_v34, %v355_v28  ;;  %v364_v0 = vadd.f32 %v363_v35, %v362_v29  ;;  %v378_v44 = vmul.f32 0.0625, %v370_v38 }
  0x32   : > { %v372_v45 = vsub.f32 %v348_v39, %v4260_v19  ;;  %v379_v46 = vmul.f32 0.0625, %v371_v40  ;;  %v391_v47 = vrot.slane %v377_v42, 7 }
  0x33   : > { %v365_v7 = vrot.slane %v364_v0, 1  ;;  %v373_v48 = vsub.f32 %v357_v43, %v4271_v31  ;;  %v400_v49 = vrot.slane %v378_v44, 7 }
  0x34   : > { %v380_v8 = vmul.f32 0.0625, %v372_v45  ;;  %v393_v50 = vsel %vm392_vm1, %v391_v47, %v375_v41  ;;  %v394_v18 = vrot.slane %v379_v46, 6 }
  0x35   : > { %v366_v51 = vadd.f32 %v365_v7, %v364_v0  ;;  %v381_v52 = vmul.f32 0.0625, %v373_v48  ;;  %v401_v56 = vsel %vm392_vm1, %v400_v49, %v376_v1  ;;  %v486_v48 = vld [vmem:[%s7043_s1] sm:$0x3]  ;;  %s7118_s1 = smov 12  }
  0x36   : > { %v396_v53 = vsel %vm395_vm2, %v394_v18, %v393_v50  ;;  %v402_v54 = vrot.slane %v380_v8, 6 }
  0x37   : > { %v374_v19 = vsub.f32 %v366_v51, %v4277_v37  ;;  %v397_v55 = vrot.slane %v381_v52, 5 }
  0x38   : > { %v403_v58 = vsel %vm395_vm2, %v402_v54, %v401_v56 }
  0x39   : > { %v382_v57 = vmul.f32 0.0625, %v374_v19  ;;  %v399_v31 = vsel %vm398_vm3, %v397_v55, %v396_v53 }
  0x3a   : > { %v409_v60 = vsel %vm408_vm4, %v399_v31, 0.0 }
  0x3b   : > { %v404_v59 = vrot.slane %v382_v57, 5 }
  0x3d   : > { %v405_v61 = vsel %vm398_vm3, %v404_v59, %v403_v58 }
  0x3e   : > { %v410_v62 = vsel %vm408_vm4, %v405_v61, 0.0 }
  0x3f   : > { %v411_v63 = vadd.f32 %v410_v62, %v409_v60 }
  0x41   : > { %412 = vadd.xlane.f32.xlu0 %v411_v63 }
  0xce   : > { %v413_v2 = vpop.xlane.xlu0 %412 }
  0xcf   : > { %v415_v37 = vmul.f32 0.00390625, %v413_v2 }
  0xd1   : > { %v417_v3 = vrot.slane %v415_v37, 1  ;;  %v418_v4 = vrot.slane %v415_v37, 2  ;;  %v424_v5 = vsub.f32 %v375_v41, %v415_v37  ;;  %v425_v6 = vsub.f32 %v376_v1, %v415_v37  ;;  %v506_v1 = vld [vmem:[%s7044_s2] sm:$0x3]  ;;  %s7120_s2 = smov 8  }
  0xd2   : > { %v419_v9 = vrot.slane %v415_v37, 3 }
  0xd3   : > { %v426_v10 = vsub.f32 %v377_v42, %v417_v3  ;;  %v427_v11 = vsub.f32 %v378_v44, %v417_v3  ;;  %v428_v12 = vsub.f32 %v379_v46, %v418_v4  ;;  %v429_v13 = vsub.f32 %v380_v8, %v418_v4 }
  0xd4   : > { %v430_v14 = vsub.f32 %v381_v52, %v419_v9  ;;  %v431_v15 = vsub.f32 %v382_v57, %v419_v9  ;;  %v432_v22 = vmul.f32 %v424_v5, %v424_v5  ;;  %v433_v23 = vmul.f32 %v425_v6, %v425_v6 }
  0xd5   : > { %v434_v16 = vmul.f32 %v426_v10, %v426_v10  ;;  %v435_v17 = vmul.f32 %v427_v11, %v427_v11  ;;  %v436_v20 = vmul.f32 %v428_v12, %v428_v12  ;;  %v437_v21 = vmul.f32 %v429_v13, %v429_v13 }
  0xd6   : > { %v438_v24 = vmul.f32 %v430_v14, %v430_v14  ;;  %v439_v25 = vmul.f32 %v431_v15, %v431_v15  ;;  %v488_v44 = vlaneseq }
  0xd7   : > { %v448_v26 = vrot.slane %v434_v16, 7  ;;  %v450_v27 = vrot.slane %v436_v20, 6  ;;  %v454_v28 = vrot.slane %v435_v17, 7  ;;  %v456_v29 = vrot.slane %v437_v21, 6 }
  0xd8   : > { %v452_v32 = vrot.slane %v438_v24, 5  ;;  %v458_v34 = vrot.slane %v439_v25, 5  ;;  %v4311_v46 = vshrl.u32 %v488_v44, 7 }
  0xd9   : > { %v449_v30 = vsel %vm392_vm1, %v448_v26, %v432_v22  ;;  %v455_v33 = vsel %vm392_vm1, %v454_v28, %v433_v23 }
  0xda   : > { %v451_v35 = vsel %vm395_vm2, %v450_v27, %v449_v30  ;;  %v457_v36 = vsel %vm395_vm2, %v456_v29, %v455_v33  ;;  %7040 = vst [vmem:[#allocation7_spill] sm:$0xff] %v4311_v46  ;;  %v4314_v47 = vsub.s32 0, %v4311_v46  ;;  %v4317_v7 = vsub.s32 1, %v4311_v46 }
  0xdb   : > { %v453_v38 = vsel %vm398_vm3, %v452_v32, %v451_v35  ;;  %v459_v39 = vsel %vm398_vm3, %v458_v34, %v457_v36 }
  0xdc   : > { %v462_v40 = vsel %vm408_vm4, %v453_v38, 0.0  ;;  %v463_v41 = vsel %vm408_vm4, %v459_v39, 0.0  ;;  %7041 = vst [vmem:[#allocation8_spill] sm:$0xff] %v4314_v47  ;;  %7042 = vst [vmem:[#allocation9_spill] sm:$0xff] %v4317_v7  ;;  %v491_v8 = vrot.slane %v486_v48, %v4314_v47  ;;  %v495_v50 = vrot.slane %v486_v48, %v4317_v7 }
  0xdd   : > { %v464_v42 = vadd.f32 %v463_v41, %v462_v40  ;;  %v511_v54 = vrot.slane %v506_v1, %v4314_v47  ;;  %v515_v19 = vrot.slane %v506_v1, %v4317_v7 }
  0xdf   : > { %465 = vadd.xlane.f32.xlu0 %v464_v42 }
 0x16c   : > { %v466_v43 = vpop.xlane.xlu0 %465 }
 0x16d   : > { %v467_v0 = vmul.f32 0.00390625, %v466_v43 }
 0x16f   : > { %v468_v45 = vadd.f32 1e-05, %v467_v0 }
 0x171   : > { %4084 = vrsqrt.f32 %v468_v45 }
 0x17b   : > { %v4085_v49 = vpop.eup %4084 }
 0x17c   : > { %v471_v18 = vrot.slane %v4085_v49, 1  ;;  %v472_v51 = vrot.slane %v4085_v49, 2  ;;  %v473_v52 = vrot.slane %v4085_v49, 3  ;;  %v478_v53 = vmul.f32 %v4085_v49, %v424_v5 }
 0x17d   : > { %v479_v55 = vmul.f32 %v4085_v49, %v425_v6 }
 0x17e   : > { %v480_v56 = vmul.f32 %v471_v18, %v426_v10  ;;  %v481_v57 = vmul.f32 %v471_v18, %v427_v11  ;;  %v482_v31 = vmul.f32 %v472_v51, %v428_v12  ;;  %v483_v58 = vmul.f32 %v472_v51, %v429_v13 }
 0x17f   : > { %v485_v59 = vmul.f32 %v473_v52, %v431_v15  ;;  %v498_v60 = vmul.f32 %v491_v8, %v478_v53  ;;  %v499_v61 = vmul.f32 %v495_v50, %v479_v55  ;;  %v484_v37 = vmul.f32 %v473_v52, %v430_v14 }
 0x180   : > { %v501_v62 = vmul.f32 %v495_v50, %v481_v57  ;;  %v502_v63 = vmul.f32 %v491_v8, %v482_v31  ;;  %v503_v2 = vmul.f32 %v495_v50, %v483_v58  ;;  %v500_v9 = vmul.f32 %v491_v8, %v480_v56 }
 0x181   : > { %v505_v3 = vmul.f32 %v495_v50, %v485_v59  ;;  %v4329_v4 = vadd.f32 %v511_v54, %v498_v60  ;;  %v4331_v5 = vadd.f32 %v515_v19, %v499_v61  ;;  %v504_v12 = vmul.f32 %v491_v8, %v484_v37 }
 0x182   : > { %v4333_v16 = vadd.f32 %v515_v19, %v501_v62  ;;  %v4335_v6 = vadd.f32 %v511_v54, %v502_v63  ;;  %v4337_v10 = vadd.f32 %v515_v19, %v503_v2  ;;  %v4345_v13 = vadd.f32 %v511_v54, %v500_v9 }
 0x183   : > { %7045 = vst [vmem:[#allocation10_spill] sm:$0xff] %v4331_v5  ;;  %v4339_v11 = vadd.f32 %v515_v19, %v505_v3  ;;  %530 = vrot.lane.b32.xlu1 %v4329_v4, %s6973_s12  ;;  %v4351_v14 = vadd.f32 %v511_v54, %v504_v12 }
 0x184   : > { %534 = vrot.lane.b32.xlu0 %v4335_v6, %s6973_s12 }
 0x187   : > { %538 = vrot.lane.b32.xlu1 %v4329_v4, %s6976_s13 }
 0x188   : > { %548 = vrot.lane.b32.xlu0 %v4345_v13, %s6980_s14 }
 0x18b   : > { %546 = vrot.lane.b32.xlu1 %v4329_v4, %s6980_s14 }
 0x18c   : > { %552 = vrot.lane.b32.xlu0 %v4351_v14, %s6980_s14 }
 0x18f   : > { %554 = vrot.lane.b32.xlu1 %v4329_v4, %s6984_s15 }
 0x190   : > { %556 = vrot.lane.b32.xlu0 %v4345_v13, %s6984_s15 }
 0x193   : > { %562 = vrot.lane.b32.xlu1 %v4329_v4, %s6981_s16 }
 0x194   : > { %560 = vrot.lane.b32.xlu0 %v4351_v14, %s6984_s15 }
 0x197   : > { %570 = vrot.lane.b32.xlu1 %v4329_v4, %s6986_s17 }
 0x198   : > { %564 = vrot.lane.b32.xlu0 %v4345_v13, %s6981_s16 }
 0x19b   : > { %578 = vrot.lane.b32.xlu1 %v4329_v4, %s6978_s18 }
 0x19c   : > { %568 = vrot.lane.b32.xlu0 %v4351_v14, %s6981_s16 }
 0x19f   : > { %586 = vrot.lane.b32.xlu1 %v4329_v4, %s6971_s19 }
 0x1a0   : > { %572 = vrot.lane.b32.xlu0 %v4345_v13, %s6986_s17 }
 0x1a3   : > { %594 = vrot.lane.b32.xlu1 %v4329_v4, %s6929_s20 }
 0x1a4   : > { %576 = vrot.lane.b32.xlu0 %v4351_v14, %s6986_s17 }
 0x1a7   : > { %602 = vrot.lane.b32.xlu1 %v4329_v4, %s6925_s21 }
 0x1a8   : > { %580 = vrot.lane.b32.xlu0 %v4345_v13, %s6978_s18 }
 0x1ab   : > { %610 = vrot.lane.b32.xlu1 %v4329_v4, %s6927_s22 }
 0x1ac   : > { %584 = vrot.lane.b32.xlu0 %v4351_v14, %s6978_s18 }
 0x1af   : > { %618 = vrot.lane.b32.xlu1 %v4329_v4, %s6931_s23 }
 0x1b0   : > { %588 = vrot.lane.b32.xlu0 %v4345_v13, %s6971_s19 }
 0x1b3   : > { %626 = vrot.lane.b32.xlu1 %v4329_v4, %s6935_s26 }
 0x1b4   : > { %592 = vrot.lane.b32.xlu0 %v4351_v14, %s6971_s19 }
 0x1b7   : > { %634 = vrot.lane.b32.xlu1 %v4329_v4, %s6939_s27 }
 0x1b8   : > { %596 = vrot.lane.b32.xlu0 %v4345_v13, %s6929_s20 }
 0x1bb   : > { %642 = vrot.lane.b32.xlu1 %v4329_v4, %s6943_s28 }
 0x1bc   : > { %600 = vrot.lane.b32.xlu0 %v4351_v14, %s6929_s20  ;;  %s6937_s20 = smov 32  }
 0x1bf   : > { %650 = vrot.lane.b32.xlu1 %v4329_v4, %s6955_s29 }
 0x1c0   : > { %604 = vrot.lane.b32.xlu0 %v4345_v13, %s6925_s21 }
 0x1c3   : > { %658 = vrot.lane.b32.xlu1 %v4329_v4, %s6953_s30 }
 0x1c4   : > { %608 = vrot.lane.b32.xlu0 %v4351_v14, %s6925_s21  ;;  %s6933_s21 = smov 40  }
 0x1c7   : > { %666 = vrot.lane.b32.xlu1 %v4329_v4, %s6949_s8 }
 0x1c8   : > { %612 = vrot.lane.b32.xlu0 %v4345_v13, %s6927_s22 }
 0x1cb   : > { %674 = vrot.lane.b32.xlu1 %v4329_v4, %s6947_s9 }
 0x1cc   : > { %616 = vrot.lane.b32.xlu0 %v4351_v14, %s6927_s22  ;;  %s6982_s22 = smov 36  }
 0x1cf   : > { %682 = vrot.lane.b32.xlu1 %v4329_v4, %s6945_s10 }
 0x1d0   : > { %620 = vrot.lane.b32.xlu0 %v4345_v13, %s6931_s23 }
 0x1d3   : > { %690 = vrot.lane.b32.xlu1 %v4329_v4, %s6951_s11 }
 0x1d4   : > { %624 = vrot.lane.b32.xlu0 %v4351_v14, %s6931_s23  ;;  %s6959_s23 = smov 28  }
 0x1d7   : > { %698 = vrot.lane.b32.xlu1 %v4329_v4, %s6933_s21  ;;  %s6974_s21 = smov 24  }
 0x1d8   : > { %628 = vrot.lane.b32.xlu0 %v4345_v13, %s6935_s26 }
 0x1db   : > { %706 = vrot.lane.b32.xlu1 %v4329_v4, %s6982_s22 }
 0x1dc   : > { %632 = vrot.lane.b32.xlu0 %v4351_v14, %s6935_s26  ;;  %s6941_s26 = smov 20  }
 0x1df   : > { %714 = vrot.lane.b32.xlu1 %v4329_v4, %s6937_s20  ;;  %s6969_s20 = smov 16  }
 0x1e0   : > { %636 = vrot.lane.b32.xlu0 %v4345_v13, %s6939_s27 }
 0x1e3   : > { %722 = vrot.lane.b32.xlu1 %v4329_v4, %s6959_s23 }
 0x1e4   : > { %640 = vrot.lane.b32.xlu0 %v4351_v14, %s6939_s27  ;;  %s6965_s27 = smov 12  }
 0x1e7   : > { %730 = vrot.lane.b32.xlu1 %v4329_v4, %s6974_s21 }
 0x1e8   : > { %644 = vrot.lane.b32.xlu0 %v4345_v13, %s6943_s28 }
 0x1eb   : > { %738 = vrot.lane.b32.xlu1 %v4329_v4, %s6941_s26  ;;  %s6967_s26 = smov 8  }
 0x1ec   : > { %648 = vrot.lane.b32.xlu0 %v4351_v14, %s6943_s28  ;;  %s6957_s28 = smov 4  }
 0x1ef   : > { %746 = vrot.lane.b32.xlu1 %v4329_v4, %s6969_s20 }
 0x1f0   : > { %652 = vrot.lane.b32.xlu0 %v4345_v13, %s6955_s29 }
 0x1f3   : > { %754 = vrot.lane.b32.xlu1 %v4329_v4, %s6965_s27 }
 0x1f4   : > { %656 = vrot.lane.b32.xlu0 %v4351_v14, %s6955_s29  ;;  %s7051_s29 = smov 76  }
 0x1f5   : > { %v4461_v15 = vpop.permute.xlu1 %530 }
 0x1f6   : > { %v4463_v17 = vpop.permute.xlu0 %534 }
 0x1f7   : > { %762 = vrot.lane.b32.xlu1 %v4329_v4, %s6967_s26 }
 0x1f8   : > { %660 = vrot.lane.b32.xlu0 %v4345_v13, %s6953_s30 }
 0x1f9   : > { %v4469_v20 = vpop.permute.xlu1 %538 }
 0x1fa   : > { %v4471_v21 = vpop.permute.xlu0 %548 }
 0x1fb   : > { %770 = vrot.lane.b32.xlu1 %v4329_v4, %s6957_s28  ;;  %s7052_s28 = smov 32  }
 0x1fc   : > { %664 = vrot.lane.b32.xlu0 %v4351_v14, %s6953_s30  ;;  %s7050_s30 = smov 80  }
 0x1fd   : > { %v4477_v22 = vpop.permute.xlu1 %546 }
 0x1fe   : > { %v4479_v23 = vpop.permute.xlu0 %552 }
 0x1ff   : > { %782 = vrot.lane.b32.xlu1 %v4331_v5, %s6973_s12 }
 0x200   : > { %668 = vrot.lane.b32.xlu0 %v4345_v13, %s6949_s8 }
 0x201   : > { %v4485_v24 = vpop.permute.xlu1 %554 }
 0x202   : > { %v4487_v25 = vpop.permute.xlu0 %556 }
 0x203   : > { %790 = vrot.lane.b32.xlu1 %v4331_v5, %s6976_s13 }
 0x204   : > { %672 = vrot.lane.b32.xlu0 %v4351_v14, %s6949_s8  ;;  %s7048_s8 = smov 88  }
 0x205   : > { %v4493_v26 = vpop.permute.xlu1 %562 }
 0x206   : > { %v4495_v27 = vpop.permute.xlu0 %560 }
 0x207   : > { %798 = vrot.lane.b32.xlu1 %v4331_v5, %s6980_s14 }
 0x208   : > { %676 = vrot.lane.b32.xlu0 %v4345_v13, %s6947_s9 }
 0x209   : > { %v4501_v28 = vpop.permute.xlu1 %570 }
 0x20a   : > { %v4503_v29 = vpop.permute.xlu0 %564 }
 0x20b   : > { %806 = vrot.lane.b32.xlu1 %v4331_v5, %s6984_s15 }
 0x20c   : > { %680 = vrot.lane.b32.xlu0 %v4351_v14, %s6947_s9  ;;  %s7047_s9 = smov 40  }
 0x20d   : > { %v4509_v30 = vpop.permute.xlu1 %578 }
 0x20e   : > { %v4511_v32 = vpop.permute.xlu0 %568 }
 0x20f   : > { %814 = vrot.lane.b32.xlu1 %v4331_v5, %s6981_s16 }
 0x210   : > { %684 = vrot.lane.b32.xlu0 %v4345_v13, %s6945_s10 }
 0x211   : > { %v4517_v33 = vpop.permute.xlu1 %586 }
 0x212   : > { %v4519_v34 = vpop.permute.xlu0 %572 }
 0x213   : > { %822 = vrot.lane.b32.xlu1 %v4331_v5, %s6986_s17 }
 0x214   : > { %688 = vrot.lane.b32.xlu0 %v4351_v14, %s6945_s10  ;;  %s7046_s10 = smov 92  }
 0x215   : > { %v4525_v35 = vpop.permute.xlu1 %594 }
 0x216   : > { %v4527_v36 = vpop.permute.xlu0 %576 }
 0x217   : > { %830 = vrot.lane.b32.xlu1 %v4331_v5, %s6978_s18 }
 0x218   : > { %692 = vrot.lane.b32.xlu0 %v4345_v13, %s6951_s11 }
 0x219   : > { %v4533_v38 = vpop.permute.xlu1 %602 }
 0x21a   : > { %v4535_v39 = vpop.permute.xlu0 %580 }
 0x21b   : > { %838 = vrot.lane.b32.xlu1 %v4331_v5, %s6971_s19 }
 0x21c   : > { %696 = vrot.lane.b32.xlu0 %v4351_v14, %s6951_s11  ;;  %s7049_s11 = smov 84  }
 0x21d   : > { %v4541_v40 = vpop.permute.xlu1 %610 }
 0x21e   : > { %v4543_v41 = vpop.permute.xlu0 %584 }
 0x21f   : > { %846 = vrot.lane.b32.xlu1 %v4331_v5, %s7046_s10 }
 0x220   : > { %700 = vrot.lane.b32.xlu0 %v4345_v13, %s7047_s9 }
 0x221   : > { %v4549_v42 = vpop.permute.xlu1 %618 }
 0x222   : > { %v4551_v43 = vpop.permute.xlu0 %588 }
 0x223   : > { %854 = vrot.lane.b32.xlu1 %v4331_v5, %s7048_s8 }
 0x224   : > { %704 = vrot.lane.b32.xlu0 %v4351_v14, %s7047_s9 }
 0x225   : > { %v4557_v0 = vpop.permute.xlu1 %626 }
 0x226   : > { %v4559_v44 = vpop.permute.xlu0 %592 }
 0x227   : > { %862 = vrot.lane.b32.xlu1 %v4331_v5, %s7049_s11 }
 0x228   : > { %708 = vrot.lane.b32.xlu0 %v4345_v13, %s6982_s22 }
 0x229   : > { %v4565_v45 = vpop.permute.xlu1 %634 }
 0x22a   : > { %v4567_v48 = vpop.permute.xlu0 %596 }
 0x22b   : > { %870 = vrot.lane.b32.xlu1 %v4331_v5, %s7050_s30 }
 0x22c   : > { %712 = vrot.lane.b32.xlu0 %v4351_v14, %s6982_s22 }
 0x22d   : > { %v4573_v1 = vpop.permute.xlu1 %642 }
 0x22e   : > { %v4575_v49 = vpop.permute.xlu0 %600 }
 0x22f   : > { %878 = vrot.lane.b32.xlu1 %v4331_v5, %s7051_s29 }
 0x230   : > { %716 = vrot.lane.b32.xlu0 %v4345_v13, %s7052_s28 }
 0x231   : > { %v4581_v8 = vpop.permute.xlu1 %650 }
 0x232   : > { %7053 = vst [vmem:[#allocation11_spill] sm:$0xff] %v4581_v8  ;;  %v4583_v50 = vpop.permute.xlu0 %604 }
 0x233   : > { %532 = vrot.lane.b32.xlu1 %v4345_v13, %s6973_s12 }
 0x234   : > { %720 = vrot.lane.b32.xlu0 %v4351_v14, %s7052_s28 }
 0x235   : > { %v4589_v18 = vpop.permute.xlu1 %658 }
 0x236   : > { %7054 = vst [vmem:[#allocation12_spill] sm:$0xff] %v4589_v18  ;;  %v4591_v51 = vpop.permute.xlu0 %608 }
 0x237   : > { %536 = vrot.lane.b32.xlu1 %v4351_v14, %s6973_s12 }
 0x238   : > { %724 = vrot.lane.b32.xlu0 %v4345_v13, %s6959_s23 }
 0x239   : > { %v4597_v52 = vpop.permute.xlu1 %666 }
 0x23a   : > { %7055 = vst [vmem:[#allocation13_spill] sm:$0xff] %v4597_v52  ;;  %v4599_v53 = vpop.permute.xlu0 %612  ;;  %v4167_v52 = vmov 1983009808  }
 0x23b   : > { %540 = vrot.lane.b32.xlu1 %v4345_v13, %s6976_s13 }
 0x23c   : > { %728 = vrot.lane.b32.xlu0 %v4351_v14, %s6959_s23  ;;  %s7059_s23 = smov 20  }
 0x23d   : > { %v4605_v54 = vpop.permute.xlu1 %674 }
 0x23e   : > { %7056 = vst [vmem:[#allocation14_spill] sm:$0xff] %v4605_v54  ;;  %v4607_v19 = vpop.permute.xlu0 %616 }
 0x23f   : > { %542 = vrot.lane.b32.xlu1 %v4335_v6, %s6976_s13 }
 0x240   : > { %732 = vrot.lane.b32.xlu0 %v4345_v13, %s6974_s21 }
 0x241   : > { %v4613_v55 = vpop.permute.xlu1 %682 }
 0x242   : > { %7057 = vst [vmem:[#allocation15_spill] sm:$0xff] %v4613_v55  ;;  %v4615_v56 = vpop.permute.xlu0 %620 }
 0x243   : > { %544 = vrot.lane.b32.xlu1 %v4351_v14, %s6976_s13 }
 0x244   : > { %736 = vrot.lane.b32.xlu0 %v4351_v14, %s6974_s21  ;;  %s7090_s21 = smov 56  }
 0x245   : > { %v4621_v57 = vpop.permute.xlu1 %690 }
 0x246   : > { %7058 = vst [vmem:[#allocation16_spill] sm:$0xff] %v4621_v57  ;;  %v4623_v31 = vpop.permute.xlu0 %624 }
 0x247   : > { %550 = vrot.lane.b32.xlu1 %v4335_v6, %s6980_s14 }
 0x248   : > { %740 = vrot.lane.b32.xlu0 %v4345_v13, %s7059_s23 }
 0x249   : > { %v4629_v58 = vpop.permute.xlu1 %698 }
 0x24a   : > { %7060 = vst [vmem:[#allocation17_spill] sm:$0xff] %v4629_v58  ;;  %v4631_v59 = vpop.permute.xlu0 %628 }
 0x24b   : > { %558 = vrot.lane.b32.xlu1 %v4335_v6, %s6984_s15 }
 0x24c   : > { %744 = vrot.lane.b32.xlu0 %v4351_v14, %s7059_s23 }
 0x24d   : > { %v4637_v60 = vpop.permute.xlu1 %706 }
 0x24e   : > { %7061 = vst [vmem:[#allocation18_spill] sm:$0xff] %v4637_v60  ;;  %v4639_v61 = vpop.permute.xlu0 %632 }
 0x24f   : > { %566 = vrot.lane.b32.xlu1 %v4335_v6, %s6981_s16 }
 0x250   : > { %748 = vrot.lane.b32.xlu0 %v4345_v13, %s6969_s20 }
 0x251   : > { %v4645_v62 = vpop.permute.xlu1 %714 }
 0x252   : > { %7062 = vst [vmem:[#allocation19_spill] sm:$0xff] %v4645_v62  ;;  %v4647_v63 = vpop.permute.xlu0 %636 }
 0x253   : > { %574 = vrot.lane.b32.xlu1 %v4335_v6, %s6986_s17 }
 0x254   : > { %752 = vrot.lane.b32.xlu0 %v4351_v14, %s6969_s20  ;;  %s7081_s20 = smov 68  }
 0x255   : > { %v4653_v2 = vpop.permute.xlu1 %722 }
 0x256   : > { %7063 = vst [vmem:[#allocation20_spill] sm:$0xff] %v4653_v2  ;;  %v4655_v37 = vpop.permute.xlu0 %640 }
 0x257   : > { %582 = vrot.lane.b32.xlu1 %v4335_v6, %s6978_s18  ;;  %s7096_s18 = smov 48  }
 0x258   : > { %756 = vrot.lane.b32.xlu0 %v4345_v13, %s6965_s27 }
 0x259   : > { %v4661_v3 = vpop.permute.xlu1 %730 }
 0x25a   : > { %7064 = vst [vmem:[#allocation21_spill] sm:$0xff] %v4661_v3  ;;  %v4663_v9 = vpop.permute.xlu0 %644 }
 0x25b   : > { %590 = vrot.lane.b32.xlu1 %v4335_v6, %s6971_s19  ;;  %s7084_s19 = smov 64  }
 0x25c   : > { %760 = vrot.lane.b32.xlu0 %v4351_v14, %s6965_s27  ;;  %s7071_s27 = smov 4  }
 0x25d   : > { %v4669_v12 = vpop.permute.xlu1 %738 }
 0x25e   : > { %7065 = vst [vmem:[#allocation22_spill] sm:$0xff] %v4669_v12  ;;  %v4671_v7 = vpop.permute.xlu0 %648 }
 0x25f   : > { %7066 = vst [vmem:[#allocation23_spill] sm:$0xff] %v4671_v7  ;;  %598 = vrot.lane.b32.xlu1 %v4335_v6, %s7046_s10 }
 0x260   : > { %764 = vrot.lane.b32.xlu0 %v4345_v13, %s6967_s26 }
 0x261   : > { %v4677_v47 = vpop.permute.xlu1 %746 }
 0x262   : > { %7067 = vst [vmem:[#allocation24_spill] sm:$0xff] %v4677_v47  ;;  %v4679_v2 = vpop.permute.xlu0 %652 }
 0x263   : > { %7068 = vst [vmem:[#allocation25_spill] sm:$0xff] %v4679_v2  ;;  %606 = vrot.lane.b32.xlu1 %v4335_v6, %s7048_s8 }
 0x264   : > { %768 = vrot.lane.b32.xlu0 %v4351_v14, %s6967_s26  ;;  %s7078_s26 = smov 72  }
 0x265   : > { %v4685_v3 = vpop.permute.xlu1 %754 }
 0x266   : > { %7069 = vst [vmem:[#allocation26_spill] sm:$0xff] %v4685_v3  ;;  %v4687_v12 = vpop.permute.xlu0 %656 }
 0x267   : > { %7070 = vst [vmem:[#allocation27_spill] sm:$0xff] %v4687_v12  ;;  %614 = vrot.lane.b32.xlu1 %v4335_v6, %s7049_s11 }
 0x268   : > { %772 = vrot.lane.b32.xlu0 %v4345_v13, %s7071_s27 }
 0x269   : > { %v4693_v62 = vpop.permute.xlu1 %762 }
 0x26a   : > { %7072 = vst [vmem:[#allocation28_spill] sm:$0xff] %v4693_v62  ;;  %v4695_v47 = vpop.permute.xlu0 %660 }
 0x26b   : > { %7073 = vst [vmem:[#allocation29_spill] sm:$0xff] %v4695_v47  ;;  %622 = vrot.lane.b32.xlu1 %v4335_v6, %s7050_s30  ;;  %v1480_v47 = vunpack.c.l.s4 %v4167_v52 }
 0x26c   : > { %776 = vrot.lane.b32.xlu0 %v4351_v14, %s7071_s27 }
 0x26d   : > { %v4701_v60 = vpop.permute.xlu1 %770  ;;  %v1481_v52 = vunpack.c.0.s8 %v1480_v47 }
 0x26e   : > { %7074 = vst [vmem:[#allocation30_spill] sm:$0xff] %v4701_v60  ;;  %v4703_v3 = vpop.permute.xlu0 %664 }
 0x26f   : > { %7075 = vst [vmem:[#allocation31_spill] sm:$0xff] %v4703_v3  ;;  %630 = vrot.lane.b32.xlu1 %v4335_v6, %s7051_s29 }
 0x270   : > { %784 = vrot.lane.b32.xlu0 %v4333_v16, %s6973_s12 }
 0x271   : > { %v4709_v57 = vpop.permute.xlu1 %782 }
 0x272   : > { %7076 = vst [vmem:[#allocation32_spill] sm:$0xff] %v4709_v57  ;;  %v4711_v62 = vpop.permute.xlu0 %668 }
 0x273   : > { %7077 = vst [vmem:[#allocation33_spill] sm:$0xff] %v4711_v62  ;;  %638 = vrot.lane.b32.xlu1 %v4335_v6, %s7078_s26 }
 0x274   : > { %788 = vrot.lane.b32.xlu0 %v4339_v11, %s6973_s12  ;;  %s7087_s12 = smov 60  }
 0x275   : > { %v4717_v58 = vpop.permute.xlu1 %790 }
 0x276   : > { %7079 = vst [vmem:[#allocation34_spill] sm:$0xff] %v4717_v58  ;;  %v4719_v60 = vpop.permute.xlu0 %672 }
 0x277   : > { %7080 = vst [vmem:[#allocation35_spill] sm:$0xff] %v4719_v60  ;;  %646 = vrot.lane.b32.xlu1 %v4335_v6, %s7081_s20 }
 0x278   : > { %792 = vrot.lane.b32.xlu0 %v4333_v16, %s6976_s13 }
 0x279   : > { %v4725_v55 = vpop.permute.xlu1 %798 }
 0x27a   : > { %7082 = vst [vmem:[#allocation36_spill] sm:$0xff] %v4725_v55  ;;  %v4727_v57 = vpop.permute.xlu0 %676 }
 0x27b   : > { %7083 = vst [vmem:[#allocation37_spill] sm:$0xff] %v4727_v57  ;;  %654 = vrot.lane.b32.xlu1 %v4335_v6, %s7084_s19  ;;  %v1030_v57 = vrot.slane %v4345_v13, 7 }
 0x27c   : > { %796 = vrot.lane.b32.xlu0 %v4339_v11, %s6976_s13  ;;  %s7093_s13 = smov 52  }
 0x27d   : > { %v4733_v54 = vpop.permute.xlu1 %806  ;;  %v1031_v5 = vsel %vm392_vm1, %v1030_v57, %v4329_v4 }
 0x27e   : > { %7085 = vst [vmem:[#allocation38_spill] sm:$0xff] %v4733_v54  ;;  %v4735_v58 = vpop.permute.xlu0 %680 }
 0x27f   : > { %7086 = vst [vmem:[#allocation39_spill] sm:$0xff] %v4735_v58  ;;  %662 = vrot.lane.b32.xlu1 %v4335_v6, %s7087_s12 }
 0x280   : > { %800 = vrot.lane.b32.xlu0 %v4333_v16, %s6980_s14 }
 0x281   : > { %v4741_v3 = vpop.permute.xlu1 %814 }
 0x282   : > { %7088 = vst [vmem:[#allocation40_spill] sm:$0xff] %v4741_v3  ;;  %v4743_v55 = vpop.permute.xlu0 %684 }
 0x283   : > { %7089 = vst [vmem:[#allocation41_spill] sm:$0xff] %v4743_v55  ;;  %670 = vrot.lane.b32.xlu1 %v4335_v6, %s7090_s21 }
 0x284   : > { %804 = vrot.lane.b32.xlu0 %v4339_v11, %s6980_s14  ;;  %s7099_s14 = smov 44  }
 0x285   : > { %v4749_v18 = vpop.permute.xlu1 %822 }
 0x286   : > { %7091 = vst [vmem:[#allocation42_spill] sm:$0xff] %v4749_v18  ;;  %v4751_v54 = vpop.permute.xlu0 %688 }
 0x287   : > { %7092 = vst [vmem:[#allocation43_spill] sm:$0xff] %v4751_v54  ;;  %678 = vrot.lane.b32.xlu1 %v4335_v6, %s7093_s13 }
 0x288   : > { %808 = vrot.lane.b32.xlu0 %v4333_v16, %s6984_s15 }
 0x289   : > { %v4757_v58 = vpop.permute.xlu1 %830 }
 0x28a   : > { %7094 = vst [vmem:[#allocation44_spill] sm:$0xff] %v4757_v58  ;;  %v4759_v3 = vpop.permute.xlu0 %692 }
 0x28b   : > { %7095 = vst [vmem:[#allocation45_spill] sm:$0xff] %v4759_v3  ;;  %686 = vrot.lane.b32.xlu1 %v4335_v6, %s7096_s18 }
 0x28c   : > { %812 = vrot.lane.b32.xlu0 %v4339_v11, %s6984_s15  ;;  %s7112_s15 = smov 24  }
 0x28d   : > { %v4765_v55 = vpop.permute.xlu1 %838 }
 0x28e   : > { %7097 = vst [vmem:[#allocation46_spill] sm:$0xff] %v4765_v55  ;;  %v4767_v18 = vpop.permute.xlu0 %696 }
 0x28f   : > { %7098 = vst [vmem:[#allocation47_spill] sm:$0xff] %v4767_v18  ;;  %694 = vrot.lane.b32.xlu1 %v4335_v6, %s7099_s14 }
 0x290   : > { %816 = vrot.lane.b32.xlu0 %v4333_v16, %s6981_s16 }
 0x291   : > { %v4773_v54 = vpop.permute.xlu1 %846 }
 0x292   : > { %7100 = vst [vmem:[#allocation48_spill] sm:$0xff] %v4773_v54  ;;  %v4775_v58 = vpop.permute.xlu0 %700 }
 0x293   : > { %7101 = vst [vmem:[#allocation49_spill] sm:$0xff] %v4775_v58  ;;  %702 = vrot.lane.b32.xlu1 %v4335_v6, %s7047_s9 }
 0x294   : > { %820 = vrot.lane.b32.xlu0 %v4339_v11, %s6981_s16  ;;  %s7108_s16 = smov 28  }
 0x295   : > { %v4781_v3 = vpop.permute.xlu1 %854 }
 0x296   : > { %7102 = vst [vmem:[#allocation50_spill] sm:$0xff] %v4781_v3  ;;  %v4783_v55 = vpop.permute.xlu0 %704 }
 0x297   : > { %7103 = vst [vmem:[#allocation51_spill] sm:$0xff] %v4783_v55  ;;  %710 = vrot.lane.b32.xlu1 %v4335_v6, %s6982_s22  ;;  %s7109_s22 = smov 100  }
 0x298   : > { %824 = vrot.lane.b32.xlu0 %v4333_v16, %s6986_s17 }
 0x299   : > { %v4789_v18 = vpop.permute.xlu1 %862 }
 0x29a   : > { %7104 = vst [vmem:[#allocation52_spill] sm:$0xff] %v4789_v18  ;;  %v4791_v54 = vpop.permute.xlu0 %708 }
 0x29b   : > { %7105 = vst [vmem:[#allocation53_spill] sm:$0xff] %v4791_v54  ;;  %718 = vrot.lane.b32.xlu1 %v4335_v6, %s7052_s28 }
 0x29c   : > { %828 = vrot.lane.b32.xlu0 %v4339_v11, %s6986_s17  ;;  %s7114_s17 = smov 96  }
 0x29d   : > { %v4797_v58 = vpop.permute.xlu1 %870 }
 0x29e   : > { %7106 = vst [vmem:[#allocation54_spill] sm:$0xff] %v4797_v58  ;;  %v4799_v3 = vpop.permute.xlu0 %712 }
 0x29f   : > { %7107 = vst [vmem:[#allocation55_spill] sm:$0xff] %v4799_v3  ;;  %726 = vrot.lane.b32.xlu1 %v4335_v6, %s7108_s16 }
 0x2a0   : > { %832 = vrot.lane.b32.xlu0 %v4333_v16, %s7109_s22 }
 0x2a1   : > { %v4805_v55 = vpop.permute.xlu1 %878 }
 0x2a2   : > { %7110 = vst [vmem:[#allocation56_spill] sm:$0xff] %v4805_v55  ;;  %v4807_v18 = vpop.permute.xlu0 %716 }
 0x2a3   : > { %7111 = vst [vmem:[#allocation57_spill] sm:$0xff] %v4807_v18  ;;  %734 = vrot.lane.b32.xlu1 %v4335_v6, %s7112_s15 }
 0x2a4   : > { %836 = vrot.lane.b32.xlu0 %v4339_v11, %s7109_s22 }
 0x2a5   : > { %v533_v54 = vpop.permute.xlu1 %532 }
 0x2a6   : > { %v4813_v58 = vpop.permute.xlu0 %720  ;;  %v1036_v62 = vrot.slane %v533_v54, 7 }
 0x2a7   : > { %7113 = vst [vmem:[#allocation58_spill] sm:$0xff] %v4813_v58  ;;  %742 = vrot.lane.b32.xlu1 %v4335_v6, %s7059_s23 }
 0x2a8   : > { %840 = vrot.lane.b32.xlu0 %v4333_v16, %s7114_s17  ;;  %v1037_v4 = vsel %vm392_vm1, %v1036_v62, %v4461_v15 }
 0x2a9   : > { %v537_v3 = vpop.permute.xlu1 %536 }
 0x2aa   : > { %v4819_v12 = vpop.permute.xlu0 %724  ;;  %v1040_v57 = vrot.slane %v537_v3, 5 }
 0x2ab   : > { %7115 = vst [vmem:[#allocation59_spill] sm:$0xff] %v4819_v12  ;;  %750 = vrot.lane.b32.xlu1 %v4335_v6, %s7116_s0 }
 0x2ac   : > { %844 = vrot.lane.b32.xlu0 %v4339_v11, %s7114_s17 }
 0x2ad   : > { %v541_v55 = vpop.permute.xlu1 %540 }
 0x2ae   : > { %v4825_v18 = vpop.permute.xlu0 %728  ;;  %v1042_v12 = vrot.slane %v541_v55, 7  ;;  %v1048_v55 = vrot.slane %v4471_v21, 7  ;;  %v1034_v21 = vrot.slane %v4351_v14, 5  ;;  %v4866_v14 = vsub.s32 %v1481_v52, %v4311_v46 }
 0x2af   : > { %7117 = vst [vmem:[#allocation60_spill] sm:$0xff] %v4825_v18  ;;  %758 = vrot.lane.b32.xlu1 %v4335_v6, %s7118_s1  ;;  %v1032_v18 = vrot.slane %v4335_v6, 6 }
 0x2b0   : > { %848 = vrot.lane.b32.xlu0 %v4333_v16, %s7046_s10 }
 0x2b1   : > { %v543_v58 = vpop.permute.xlu1 %542  ;;  %v1033_v54 = vsel %vm395_vm2, %v1032_v18, %v1031_v5  ;;  %v1049_v5 = vsel %vm392_vm1, %v1048_v55, %v4477_v22 }
 0x2b2   : > { %v4832_v60 = vpop.permute.xlu0 %732  ;;  %v1044_v8 = vrot.slane %v543_v58, 6  ;;  %v1035_v18 = vsel %vm398_vm3, %v1034_v21, %v1033_v54  ;;  %v1066_v21 = vrot.slane %v4519_v34, 7 }
 0x2b3   : > { %7119 = vst [vmem:[#allocation61_spill] sm:$0xff] %v4832_v60  ;;  %766 = vrot.lane.b32.xlu1 %v4335_v6, %s7120_s2  ;;  %v1043_v60 = vsel %vm392_vm1, %v1042_v12, %v4469_v20  ;;  %v1038_v12 = vrot.slane %v4463_v17, 6 }
 0x2b4   : > { %852 = vrot.lane.b32.xlu0 %v4339_v11, %s7046_s10  ;;  %v1045_v58 = vsel %vm395_vm2, %v1044_v8, %v1043_v60  ;;  %v1052_v8 = vrot.slane %v4479_v23, 5  ;;  %v1067_v34 = vsel %vm392_vm1, %v1066_v21, %v4501_v28 }
 0x2b5   : > { %v545_v2 = vpop.permute.xlu1 %544  ;;  %v1039_v15 = vsel %vm395_vm2, %v1038_v12, %v1037_v4 }
 0x2b6   : > { %v1046_v13 = vrot.slane %v545_v2, 5  ;;  %v4841_v7 = vpop.permute.xlu0 %736  ;;  %v1041_v22 = vsel %vm398_vm3, %v1040_v57, %v1039_v15  ;;  %v1054_v57 = vrot.slane %v4487_v25, 7 }
 0x2b7   : > { %774 = vrot.lane.b32.xlu1 %v4335_v6, %s7071_s27 }
 0x2b8   : > { %856 = vrot.lane.b32.xlu0 %v4333_v16, %s7048_s8  ;;  %v1047_v2 = vsel %vm398_vm3, %v1046_v13, %v1045_v58  ;;  %v1055_v25 = vsel %vm392_vm1, %v1054_v57, %v4485_v24  ;;  %v1064_v57 = vrot.slane %v4511_v32, 5 }
 0x2b9   : > { %v551_v20 = vpop.permute.xlu1 %550  ;;  %v1478_v60 = vcombine.low %v1035_v18, %v1047_v2 }
 0x2ba   : > { %v1050_v6 = vrot.slane %v551_v20, 6  ;;  %v4857_v47 = vpop.permute.xlu0 %740  ;;  %v1060_v20 = vrot.slane %v4503_v29, 7 }
 0x2bb   : > { %786 = vrot.lane.b32.xlu1 %v4337_v10, %s7121_s24  ;;  %s7122_s24 = smov 120   ;;  %v4879_v55 = vrot.slane %v1478_v60, %v4866_v14  ;;  %v1070_v60 = vrot.slane %v4527_v36, 5 }
 0x2bc   : > { %v1051_v17 = vsel %vm395_vm2, %v1050_v6, %v1049_v5  ;;  %860 = vrot.lane.b32.xlu0 %v4339_v11, %s7048_s8  ;;  %v4168_v6 = vmov 1934713408   ;;  %v1061_v24 = vsel %vm392_vm1, %v1060_v20, %v4493_v26 }
 0x2bd   : > { %v1053_v23 = vsel %vm398_vm3, %v1052_v8, %v1051_v17  ;;  %v559_v62 = vpop.permute.xlu1 %558  ;;  %v1513_v5 = vunpack.c.l.s4 %v4168_v6  ;;  %v1072_v17 = vrot.slane %v4535_v39, 7 }
 0x2be   : > { %v1486_v3 = vcombine.low %v1041_v22, %v1053_v23  ;;  %v4874_v13 = vpop.permute.xlu0 %744  ;;  %v1056_v2 = vrot.slane %v559_v62, 6  ;;  %v1058_v23 = vrot.slane %v4495_v27, 5 }
 0x2bf   : > { %794 = vrot.lane.b32.xlu1 %v4337_v10, %s7122_s24  ;;  %v1514_v62 = vunpack.c.0.s8 %v1513_v5  ;;  %v1073_v21 = vsel %vm392_vm1, %v1072_v17, %v4509_v30 }
 0x2c0   : > { %v4882_v52 = vrot.slane %v1486_v3, %v4866_v14  ;;  %864 = vrot.lane.b32.xlu0 %v4333_v16, %s7049_s11  ;;  %v1057_v29 = vsel %vm395_vm2, %v1056_v2, %v1055_v25  ;;  %v1076_v2 = vrot.slane %v4543_v41, 5 }
 0x2c1   : > { %v567_v58 = vpop.permute.xlu1 %566  ;;  %v1059_v27 = vsel %vm398_vm3, %v1058_v23, %v1057_v29  ;;  %v4933_v41 = vsub.s32 %v1514_v62, %v4311_v46  ;;  %v1090_v23 = vrot.slane %v4583_v50, 7 }
 0x2c2   : > { %v4886_v54 = vpop.permute.xlu0 %748  ;;  %v1511_v4 = vcombine.high %v4879_v55, %v4882_v52  ;;  %v1062_v8 = vrot.slane %v567_v58, 6 }
 0x2c3   : > { %802 = vrot.lane.b32.xlu1 %v4337_v10, %s7123_s7  ;;  %s7124_s7 = smov 112   ;;  %7126 = vst [vmem:[#allocation62_spill] sm:$0xff] %v4933_v41 }
 0x2c4   : > { %868 = vrot.lane.b32.xlu0 %v4339_v11, %s7049_s11  ;;  %v1063_v39 = vsel %vm395_vm2, %v1062_v8, %v1061_v24  ;;  %v1510_v8 = vcombine.low %v4879_v55, %v4882_v52 }
 0x2c5   : > { %v575_v12 = vpop.permute.xlu1 %574 }
 0x2c6   : > { %v1068_v18 = vrot.slane %v575_v12, 6  ;;  %v4897_v15 = vpop.permute.xlu0 %752  ;;  %v1065_v12 = vsel %vm398_vm3, %v1064_v57, %v1063_v39  ;;  %v4950_v55 = vrot.slane %v1510_v8, %v4933_v41  ;;  %v1088_v8 = vrot.slane %v4575_v49, 5 }
 0x2c7   : > { %810 = vrot.lane.b32.xlu1 %v4337_v10, %s7124_s7 }
 0x2c8   : > { %v1069_v22 = vsel %vm395_vm2, %v1068_v18, %v1067_v34  ;;  %872 = vrot.lane.b32.xlu0 %v4333_v16, %s7050_s30  ;;  %v1078_v34 = vrot.slane %v4551_v43, 7  ;;  %v1525_v43 = vrot.slane %v1511_v4, %v4933_v41  ;;  %v1091_v4 = vsel %vm392_vm1, %v1090_v23, %v4533_v38 }
 0x2c9   : > { %v1071_v28 = vsel %vm398_vm3, %v1070_v60, %v1069_v22  ;;  %v583_v36 = vpop.permute.xlu1 %582 }
 0x2ca   : > { %v1074_v3 = vrot.slane %v583_v36, 6  ;;  %v4916_v58 = vpop.permute.xlu0 %756  ;;  %v1494_v26 = vcombine.low %v1059_v27, %v1071_v28  ;;  %v1079_v50 = vsel %vm392_vm1, %v1078_v34, %v4517_v33  ;;  %v1084_v36 = vrot.slane %v4567_v48, 7 }
 0x2cb   : > { %818 = vrot.lane.b32.xlu1 %v4337_v10, %s7125_s6  ;;  %v1094_v27 = vrot.slane %v4591_v51, 5  ;;  %v1096_v33 = vrot.slane %v4599_v53, 7  ;;  %s7164_s6 = smov 36  }
 0x2cc   : > { %v1075_v20 = vsel %vm395_vm2, %v1074_v3, %v1073_v21  ;;  %876 = vrot.lane.b32.xlu0 %v4339_v11, %s7050_s30  ;;  %v1501_v18 = vrot.slane %v1494_v26, %v4866_v14  ;;  %v1085_v38 = vsel %vm392_vm1, %v1084_v36, %v4525_v35  ;;  %v1114_v36 = vrot.slane %v4647_v63, 7 }
 0x2cd   : > { %v1077_v32 = vsel %vm398_vm3, %v1076_v2, %v1075_v20  ;;  %v591_v6 = vpop.permute.xlu1 %590 }
 0x2ce   : > { %v1502_v5 = vcombine.low %v1065_v12, %v1077_v32  ;;  %v4930_v30 = vpop.permute.xlu0 %760  ;;  %v1080_v52 = vrot.slane %v591_v6, 6  ;;  %v1082_v12 = vrot.slane %v4559_v44, 5  ;;  %v1115_v63 = vsel %vm392_vm1, %v1114_v36, %v4565_v45 }
 0x2cf   : > { %826 = vrot.lane.b32.xlu1 %v4337_v10, %s7127_s5 }
 0x2d0   : > { %v1509_v25 = vrot.slane %v1502_v5, %v4866_v14  ;;  %880 = vrot.lane.b32.xlu0 %v4333_v16, %s7051_s29  ;;  %v1081_v26 = vsel %vm395_vm2, %v1080_v52, %v1079_v50 }
 0x2d1   : > { %v599_v60 = vpop.permute.xlu1 %598  ;;  %v1083_v44 = vsel %vm398_vm3, %v1082_v12, %v1081_v26  ;;  %v1118_v26 = vrot.slane %v4655_v37, 5 }
 0x2d2   : > { %v4944_v17 = vpop.permute.xlu0 %764  ;;  %v1526_v29 = vcombine.low %v1501_v18, %v1509_v25  ;;  %v1527_v22 = vcombine.high %v1501_v18, %v1509_v25  ;;  %v1086_v39 = vrot.slane %v599_v60, 6  ;;  %v1097_v18 = vsel %vm392_vm1, %v1096_v33, %v4541_v40 }
 0x2d3   : > { %834 = vrot.lane.b32.xlu1 %v4337_v10, %s7109_s22  ;;  %v1100_v25 = vrot.slane %v4607_v19, 5 }
 0x2d4   : > { %884 = vrot.lane.b32.xlu0 %v4339_v11, %s7051_s29  ;;  %v4955_v24 = vrot.slane %v1526_v29, %v4933_v41  ;;  %v1541_v28 = vrot.slane %v1527_v22, %v4933_v41  ;;  %v1087_v32 = vsel %vm395_vm2, %v1086_v39, %v1085_v38  ;;  %v1108_v39 = vrot.slane %v4631_v59, 7 }
 0x2d5   : > { %v607_v62 = vpop.permute.xlu1 %606  ;;  %v1089_v60 = vsel %vm398_vm3, %v1088_v8, %v1087_v32  ;;  %v1106_v38 = vrot.slane %v4623_v31, 5 }
 0x2d6   : > { %v1092_v3 = vrot.slane %v607_v62, 6  ;;  %v4962_v57 = vpop.permute.xlu0 %768  ;;  %v4966_v21 = vcombine.high %v4950_v55, %v4955_v24  ;;  %v4968_v2 = vcombine.low %v1525_v43, %v1541_v28  ;;  %v4976_v48 = vcombine.high %v1525_v43, %v1541_v28 }
 0x2d7   : > { %842 = vrot.lane.b32.xlu1 %v4337_v10, %s7114_s17  ;;  %v1102_v43 = vrot.slane %v4615_v56, 7  ;;  %v1109_v45 = vsel %vm392_vm1, %v1108_v39, %v4557_v0 }
 0x2d8   : > { %v1093_v20 = vsel %vm395_vm2, %v1092_v3, %v1091_v4  ;;  %888 = vrot.lane.b32.xlu0 %v4333_v16, %s7078_s26 }
 0x2d9   : > { %v1095_v51 = vsel %vm398_vm3, %v1094_v27, %v1093_v20  ;;  %v615_v53 = vpop.permute.xlu1 %614  ;;  %v1103_v56 = vsel %vm392_vm1, %v1102_v43, %v4549_v42  ;;  %v1120_v20 = vrot.slane %v4663_v9, 7  ;;  %v4169_v42 = vmov 0   ;;  %v7130_v43 = vld [vmem:[#allocation25_spill] sm:$0xff] }
 0x2da   : > { %v1098_v6 = vrot.slane %v615_v53, 6  ;;  %v4987_v5 = vpop.permute.xlu0 %772  ;;  %v1546_v35 = vcombine.low %v1083_v44, %v1095_v51  ;;  %4076 = vset.pattern.permute.xlu1 %v4169_v42  ;;  %4077 = vset.pattern.permute.xlu0 %v4169_v42  ;;  %v1126_v36 = vrot.slane %v7130_v43, 7  ;;  %v7133_v42 = vld [vmem:[#allocation29_spill] sm:$0xff] }
 0x2db   : > { %850 = vrot.lane.b32.xlu1 %v4337_v10, %s7046_s10  ;;  %v1121_v8 = vsel %vm392_vm1, %v1120_v20, %v4573_v1 }
 0x2dc   : > { %v1099_v34 = vsel %vm395_vm2, %v1098_v6, %v1097_v18  ;;  %892 = vrot.lane.b32.xlu0 %v4339_v11, %s7078_s26  ;;  %v5006_v19 = vrot.slane %v1546_v35, %v4866_v14  ;;  %v1112_v6 = vrot.slane %v4639_v61, 5  ;;  %v7128_v18 = vld [vmem:[#allocation23_spill] sm:$0xff] }
 0x2dd   : > { %v1101_v49 = vsel %vm398_vm3, %v1100_v25, %v1099_v34  ;;  %v623_v29 = vpop.permute.xlu1 %622  ;;  %v1124_v25 = vrot.slane %v7128_v18, 5  ;;  %v7135_v18 = vld [vmem:[#allocation35_spill] sm:$0xff] }
 0x2de   : > { %v1554_v22 = vcombine.low %v1089_v60, %v1101_v49  ;;  %v5001_v40 = vpop.permute.xlu0 %776  ;;  %v1104_v62 = vrot.slane %v623_v29, 6  ;;  %v7129_v49 = vld [vmem:[#allocation10_spill] sm:$0xff] }
 0x2df   : > { %858 = vrot.lane.b32.xlu1 %v4337_v10, %s7048_s8 }
 0x2e0   : > { %v5009_v23 = vrot.slane %v1554_v22, %v4866_v14  ;;  %896 = vrot.lane.b32.xlu0 %v4333_v16, %s7081_s20  ;;  %v1105_v59 = vsel %vm395_vm2, %v1104_v62, %v1103_v56 }
 0x2e1   : > { %v631_v52 = vpop.permute.xlu1 %630  ;;  %v1107_v31 = vsel %vm398_vm3, %v1106_v38, %v1105_v59  ;;  %v7132_v59 = vld [vmem:[#allocation11_spill] sm:$0xff]  ;;  %v1132_v38 = vrot.slane %v7133_v42, 7 }
 0x2e2   : > { %v5014_v28 = vpop.permute.xlu0 %784  ;;  %v1579_v50 = vcombine.high %v5006_v19, %v5009_v23  ;;  %v1110_v4 = vrot.slane %v631_v52, 6  ;;  %v1578_v29 = vcombine.low %v5006_v19, %v5009_v23 }
 0x2e3   : > { %866 = vrot.lane.b32.xlu1 %v4337_v10, %s7049_s11 }
 0x2e4   : > { %900 = vrot.lane.b32.xlu0 %v4339_v11, %s7081_s20  ;;  %v1111_v51 = vsel %vm395_vm2, %v1110_v4, %v1109_v45  ;;  %v7131_v4 = vld [vmem:[#allocation33_spill] sm:$0xff]  ;;  %v5074_v19 = vrot.slane %v1578_v29, %v4933_v41  ;;  %v7139_v29 = vld [vmem:[#allocation12_spill] sm:$0xff] }
 0x2e5   : > { %v639_v3 = vpop.permute.xlu1 %638  ;;  %v1113_v35 = vsel %vm398_vm3, %v1112_v6, %v1111_v51 }
 0x2e6   : > { %v1116_v27 = vrot.slane %v639_v3, 6  ;;  %v5026_v33 = vpop.permute.xlu0 %788 }
 0x2e7   : > { %874 = vrot.lane.b32.xlu1 %v4337_v10, %s7050_s30 }
 0x2e8   : > { %v1117_v12 = vsel %vm395_vm2, %v1116_v27, %v1115_v63  ;;  %904 = vrot.lane.b32.xlu0 %v4333_v16, %s7084_s19  ;;  %v1138_v27 = vrot.slane %v7131_v4, 7 }
 0x2e9   : > { %v1119_v37 = vsel %vm398_vm3, %v1118_v26, %v1117_v12  ;;  %v647_v9 = vpop.permute.xlu1 %646  ;;  %v1593_v26 = vrot.slane %v1579_v50, %v4933_v41  ;;  %v1127_v12 = vsel %vm392_vm1, %v1126_v36, %v7132_v59 }
 0x2ea   : > { %v1122_v53 = vrot.slane %v647_v9, 6  ;;  %v5043_v32 = vpop.permute.xlu0 %792  ;;  %v1562_v0 = vcombine.low %v1107_v31, %v1119_v37  ;;  %v7136_v31 = vld [vmem:[#allocation37_spill] sm:$0xff] }
 0x2eb   : > { %882 = vrot.lane.b32.xlu1 %v4337_v10, %s7051_s29 }
 0x2ec   : > { %v1123_v44 = vsel %vm395_vm2, %v1122_v53, %v1121_v8  ;;  %908 = vrot.lane.b32.xlu0 %v4339_v11, %s7084_s19  ;;  %v1569_v22 = vrot.slane %v1562_v0, %v4866_v14  ;;  %v7134_v8 = vld [vmem:[#allocation13_spill] sm:$0xff]  ;;  %v1144_v0 = vrot.slane %v7136_v31, 7 }
 0x2ed   : > { %v1125_v61 = vsel %vm398_vm3, %v1124_v25, %v1123_v44  ;;  %v655_v34 = vpop.permute.xlu1 %654  ;;  %v1139_v50 = vsel %vm392_vm1, %v1138_v27, %v7134_v8  ;;  %v1142_v25 = vrot.slane %v7135_v18, 5  ;;  %v7141_v27 = vld [vmem:[#allocation14_spill] sm:$0xff] }
 0x2ee   : > { %v1570_v60 = vcombine.low %v1113_v35, %v1125_v61  ;;  %v5057_v1 = vpop.permute.xlu0 %796  ;;  %v1128_v23 = vrot.slane %v655_v34, 6  ;;  %v7138_v34 = vld [vmem:[#allocation27_spill] sm:$0xff] }
 0x2ef   : > { %886 = vrot.lane.b32.xlu1 %v7129_v49, %s7078_s26 }
 0x2f0   : > { %v1577_v52 = vrot.slane %v1570_v60, %v4866_v14  ;;  %912 = vrot.lane.b32.xlu0 %v4333_v16, %s7087_s12  ;;  %v1129_v35 = vsel %vm395_vm2, %v1128_v23, %v1127_v12  ;;  %v1130_v60 = vrot.slane %v7138_v34, 5  ;;  %v1145_v23 = vsel %vm392_vm1, %v1144_v0, %v7141_v27  ;;  %v7144_v34 = vld [vmem:[#allocation49_spill] sm:$0xff] }
 0x2f1   : > { %v663_v62 = vpop.permute.xlu1 %662 }
 0x2f2   : > { %v5068_v39 = vpop.permute.xlu0 %800  ;;  %v1594_v3 = vcombine.low %v1569_v22, %v1577_v52  ;;  %v1595_v56 = vcombine.high %v1569_v22, %v1577_v52  ;;  %v1134_v37 = vrot.slane %v663_v62, 6  ;;  %v1133_v22 = vsel %vm392_vm1, %v1132_v38, %v7139_v29 }
 0x2f3   : > { %890 = vrot.lane.b32.xlu1 %v4337_v10, %s7078_s26  ;;  %v1131_v59 = vsel %vm398_vm3, %v1130_v60, %v1129_v35  ;;  %v7143_v35 = vld [vmem:[#allocation41_spill] sm:$0xff]  ;;  %v1162_v60 = vrot.slane %v7144_v34, 7 }
 0x2f4   : > { %916 = vrot.lane.b32.xlu0 %v4339_v11, %s7087_s12  ;;  %v5079_v63 = vrot.slane %v1594_v3, %v4933_v41  ;;  %v1609_v20 = vrot.slane %v1595_v56, %v4933_v41  ;;  %v1135_v36 = vsel %vm395_vm2, %v1134_v37, %v1133_v22  ;;  %v7140_v56 = vld [vmem:[#allocation31_spill] sm:$0xff]  ;;  %v7145_v22 = vld [vmem:[#allocation45_spill] sm:$0xff] }
 0x2f5   : > { %v671_v45 = vpop.permute.xlu1 %670  ;;  %v1136_v4 = vrot.slane %v7140_v56, 5 }
 0x2f6   : > { %v1140_v9 = vrot.slane %v671_v45, 6  ;;  %v5086_v51 = vpop.permute.xlu0 %804  ;;  %v5090_v53 = vcombine.high %v5074_v19, %v5079_v63  ;;  %v5092_v6 = vcombine.low %v1593_v26, %v1609_v20  ;;  %v5100_v44 = vcombine.high %v1593_v26, %v1609_v20  ;;  %v7142_v26 = vld [vmem:[#allocation39_spill] sm:$0xff] }
 0x2f7   : > { %894 = vrot.lane.b32.xlu1 %v7129_v49, %s7081_s20  ;;  %v1148_v20 = vrot.slane %v7142_v26, 5  ;;  %v1137_v38 = vsel %vm398_vm3, %v1136_v4, %v1135_v36  ;;  %v7146_v4 = vld [vmem:[#allocation15_spill] sm:$0xff] }
 0x2f8   : > { %7137 = vst [vmem:[#allocation23_spill] sm:$0xff] %v5100_v44  ;;  %v1141_v61 = vsel %vm395_vm2, %v1140_v9, %v1139_v50  ;;  %920 = vrot.lane.b32.xlu0 %v4333_v16, %s7090_s21 }
 0x2f9   : > { %v1143_v52 = vsel %vm398_vm3, %v1142_v25, %v1141_v61  ;;  %v679_v43 = vpop.permute.xlu1 %678  ;;  %v1150_v61 = vrot.slane %v7143_v35, 7 }
 0x2fa   : > { %v1146_v62 = vrot.slane %v679_v43, 6  ;;  %v5111_v3 = vpop.permute.xlu0 %808  ;;  %v1614_v12 = vcombine.low %v1131_v59, %v1143_v52  ;;  %v1156_v52 = vrot.slane %v7145_v22, 7 }
 0x2fb   : > { %898 = vrot.lane.b32.xlu1 %v4337_v10, %s7081_s20  ;;  %v1151_v27 = vsel %vm392_vm1, %v1150_v61, %v7146_v4  ;;  %v7152_v4 = vld [vmem:[#allocation47_spill] sm:$0xff] }
 0x2fc   : > { %v1147_v42 = vsel %vm395_vm2, %v1146_v62, %v1145_v23  ;;  %924 = vrot.lane.b32.xlu0 %v4339_v11, %s7090_s21  ;;  %v1621_v50 = vrot.slane %v1614_v12, %v4866_v14  ;;  %v7147_v23 = vld [vmem:[#allocation17_spill] sm:$0xff] }
 0x2fd   : > { %v1149_v45 = vsel %vm398_vm3, %v1148_v20, %v1147_v42  ;;  %v687_v37 = vpop.permute.xlu1 %686  ;;  %v1163_v26 = vsel %vm392_vm1, %v1162_v60, %v7147_v23  ;;  %v7148_v20 = vld [vmem:[#allocation51_spill] sm:$0xff]  ;;  %v7149_v12 = vld [vmem:[#allocation53_spill] sm:$0xff] }
 0x2fe   : > { %v1622_v9 = vcombine.low %v1137_v38, %v1149_v45  ;;  %v5125_v8 = vpop.permute.xlu0 %812  ;;  %v1152_v29 = vrot.slane %v687_v37, 6  ;;  %v1166_v59 = vrot.slane %v7148_v20, 5  ;;  %v1168_v42 = vrot.slane %v7149_v12, 7  ;;  %v7150_v37 = vld [vmem:[#allocation43_spill] sm:$0xff] }
 0x2ff   : > { %902 = vrot.lane.b32.xlu1 %v7129_v49, %s7084_s19  ;;  %v7154_v23 = vld [vmem:[#allocation55_spill] sm:$0xff] }
 0x300   : > { %v1629_v18 = vrot.slane %v1622_v9, %v4866_v14  ;;  %928 = vrot.lane.b32.xlu0 %v4333_v16, %s7093_s13  ;;  %v1153_v38 = vsel %vm395_vm2, %v1152_v29, %v1151_v27  ;;  %v1154_v9 = vrot.slane %v7150_v37, 5  ;;  %v1160_v29 = vrot.slane %v7152_v4, 5  ;;  %v7153_v27 = vld [vmem:[#allocation18_spill] sm:$0xff] }
 0x301   : > { %v695_v25 = vpop.permute.xlu1 %694 }
 0x302   : > { %v5133_v31 = vpop.permute.xlu0 %816  ;;  %v1647_v0 = vcombine.high %v1621_v50, %v1629_v18  ;;  %v1158_v36 = vrot.slane %v695_v25, 6  ;;  %v7151_v25 = vld [vmem:[#allocation16_spill] sm:$0xff]  ;;  %v1155_v20 = vsel %vm398_vm3, %v1154_v9, %v1153_v38  ;;  %v1646_v38 = vcombine.low %v1621_v50, %v1629_v18 }
 0x303   : > { %906 = vrot.lane.b32.xlu1 %v4337_v10, %s7084_s19  ;;  %v1157_v35 = vsel %vm392_vm1, %v1156_v52, %v7151_v25 }
 0x304   : > { %932 = vrot.lane.b32.xlu0 %v4339_v11, %s7093_s13  ;;  %v1159_v60 = vsel %vm395_vm2, %v1158_v36, %v1157_v35  ;;  %v7155_v35 = vld [vmem:[#allocation57_spill] sm:$0xff]  ;;  %v5190_v50 = vrot.slane %v1646_v38, %v4933_v41 }
 0x305   : > { %v703_v43 = vpop.permute.xlu1 %702  ;;  %v1161_v36 = vsel %vm398_vm3, %v1160_v29, %v1159_v60  ;;  %v7156_v29 = vld [vmem:[#allocation61_spill] sm:$0xff] }
 0x306   : > { %v1164_v62 = vrot.slane %v703_v43, 6  ;;  %v5142_v56 = vpop.permute.xlu0 %820 }
 0x307   : > { %910 = vrot.lane.b32.xlu1 %v7129_v49, %s7087_s12 }
 0x308   : > { %v1165_v45 = vsel %vm395_vm2, %v1164_v62, %v1163_v26  ;;  %936 = vrot.lane.b32.xlu0 %v4333_v16, %s7096_s18  ;;  %v1169_v62 = vsel %vm392_vm1, %v1168_v42, %v7153_v27  ;;  %v1172_v26 = vrot.slane %v7154_v23, 5  ;;  %v1186_v27 = vrot.slane %v7156_v29, 7 }
 0x309   : > { %v1167_v61 = vsel %vm398_vm3, %v1166_v59, %v1165_v45  ;;  %v711_v34 = vpop.permute.xlu1 %710  ;;  %v1661_v23 = vrot.slane %v1647_v0, %v4933_v41 }
 0x30a   : > { %v1170_v22 = vrot.slane %v711_v34, 6  ;;  %v5161_v43 = vpop.permute.xlu0 %824  ;;  %v1630_v52 = vcombine.low %v1155_v20, %v1167_v61  ;;  %v1174_v61 = vrot.slane %v7155_v35, 7  ;;  %v7157_v20 = vld [vmem:[#allocation19_spill] sm:$0xff]  ;;  %v7159_v35 = vld [vmem:[#allocation21_spill] sm:$0xff] }
 0x30b   : > { %914 = vrot.lane.b32.xlu1 %v4337_v10, %s7087_s12  ;;  %v1187_v0 = vsel %vm392_vm1, %v1186_v27, %v7159_v35 }
 0x30c   : > { %v1171_v59 = vsel %vm395_vm2, %v1170_v22, %v1169_v62  ;;  %940 = vrot.lane.b32.xlu0 %v4339_v11, %s7096_s18  ;;  %v1637_v9 = vrot.slane %v1630_v52, %v4866_v14  ;;  %v1175_v52 = vsel %vm392_vm1, %v1174_v61, %v7157_v20  ;;  %v1192_v61 = vrot.slane %v4857_v47, 7  ;;  %v7160_v20 = vld [vmem:[#allocation58_spill] sm:$0xff] }
 0x30d   : > { %v1173_v12 = vsel %vm398_vm3, %v1172_v26, %v1171_v59  ;;  %v719_v45 = vpop.permute.xlu1 %718  ;;  %v7158_v59 = vld [vmem:[#allocation59_spill] sm:$0xff] }
 0x30e   : > { %v1638_v37 = vcombine.low %v1161_v36, %v1173_v12  ;;  %v5175_v42 = vpop.permute.xlu0 %828  ;;  %v1176_v18 = vrot.slane %v719_v45, 6  ;;  %v1180_v36 = vrot.slane %v7158_v59, 7  ;;  %v1178_v59 = vrot.slane %v7160_v20, 5 }
 0x30f   : > { %918 = vrot.lane.b32.xlu1 %v7129_v49, %s7090_s21 }
 0x310   : > { %v1645_v25 = vrot.slane %v1638_v37, %v4866_v14  ;;  %944 = vrot.lane.b32.xlu0 %v4333_v16, %s7099_s14 }
 0x311   : > { %v727_v34 = vpop.permute.xlu1 %726 }
 0x312   : > { %v5184_v60 = vpop.permute.xlu0 %832  ;;  %v1662_v22 = vcombine.low %v1637_v9, %v1645_v25  ;;  %v1663_v4 = vcombine.high %v1637_v9, %v1645_v25  ;;  %v1182_v37 = vrot.slane %v727_v34, 6 }
 0x313   : > { %922 = vrot.lane.b32.xlu1 %v4337_v10, %s7090_s21 }
 0x314   : > { %948 = vrot.lane.b32.xlu0 %v4339_v11, %s7099_s14  ;;  %v5195_v62 = vrot.slane %v1662_v22, %v4933_v41  ;;  %v1677_v26 = vrot.slane %v1663_v4, %v4933_v41  ;;  %v1190_v22 = vrot.slane %v4841_v7, 5  ;;  %v1177_v4 = vsel %vm395_vm2, %v1176_v18, %v1175_v52  ;;  %v7163_v52 = vld [vmem:[#allocation22_spill] sm:$0xff] }
 0x315   : > { %v735_v12 = vpop.permute.xlu1 %734  ;;  %v1179_v20 = vsel %vm398_vm3, %v1178_v59, %v1177_v4 }
 0x316   : > { %v1188_v38 = vrot.slane %v735_v12, 6  ;;  %v5202_v9 = vpop.permute.xlu0 %836  ;;  %v5206_v45 = vcombine.high %v5190_v50, %v5195_v62  ;;  %v5208_v25 = vcombine.low %v1661_v23, %v1677_v26  ;;  %v5216_v34 = vcombine.high %v1661_v23, %v1677_v26  ;;  %v7161_v12 = vld [vmem:[#allocation20_spill] sm:$0xff] }
 0x317   : > { %926 = vrot.lane.b32.xlu1 %v7129_v49, %s7093_s13  ;;  %v1181_v27 = vsel %vm392_vm1, %v1180_v36, %v7161_v12  ;;  %v7162_v26 = vld [vmem:[#allocation60_spill] sm:$0xff] }
 0x318   : > { %v1189_v29 = vsel %vm395_vm2, %v1188_v38, %v1187_v0  ;;  %952 = vrot.lane.b32.xlu0 %v4333_v16, %s7047_s9  ;;  %v1183_v35 = vsel %vm395_vm2, %v1182_v37, %v1181_v27  ;;  %v1184_v18 = vrot.slane %v7162_v26, 5  ;;  %v1193_v38 = vsel %vm392_vm1, %v1192_v61, %v7163_v52 }
 0x319   : > { %v1191_v7 = vsel %vm398_vm3, %v1190_v22, %v1189_v29  ;;  %v743_v47 = vpop.permute.xlu1 %742  ;;  %v1196_v0 = vrot.slane %v4874_v13, 5 }
 0x31a   : > { %v1194_v46 = vrot.slane %v743_v47, 6  ;;  %v5227_v23 = vpop.permute.xlu0 %840  ;;  %v1682_v36 = vcombine.low %v1179_v20, %v1191_v7  ;;  %v1185_v37 = vsel %vm398_vm3, %v1184_v18, %v1183_v35  ;;  %v1198_v47 = vrot.slane %v4886_v54, 7  ;;  %v7166_v54 = vld [vmem:[#allocation28_spill] sm:$0xff] }
 0x31b   : > { %930 = vrot.lane.b32.xlu1 %v4337_v10, %s7093_s13  ;;  %v1210_v35 = vrot.slane %v4944_v17, 7  ;;  %v1204_v18 = vrot.slane %v4916_v58, 7 }
 0x31c   : > { %v1195_v22 = vsel %vm395_vm2, %v1194_v46, %v1193_v38  ;;  %956 = vrot.lane.b32.xlu0 %v4339_v11, %s7047_s9  ;;  %v5246_v13 = vrot.slane %v1682_v36, %v4866_v14  ;;  %v7165_v36 = vld [vmem:[#allocation24_spill] sm:$0xff] }
 0x31d   : > { %v1197_v29 = vsel %vm398_vm3, %v1196_v0, %v1195_v22  ;;  %v751_v12 = vpop.permute.xlu1 %750  ;;  %v1199_v22 = vsel %vm392_vm1, %v1198_v47, %v7165_v36  ;;  %v1211_v17 = vsel %vm392_vm1, %v1210_v35, %v7166_v54 }
 0x31e   : > { %v1690_v27 = vcombine.low %v1185_v37, %v1197_v29  ;;  %v5241_v61 = vpop.permute.xlu0 %844  ;;  %v1200_v26 = vrot.slane %v751_v12, 6  ;;  %v1214_v37 = vrot.slane %v4962_v57, 5  ;;  %v1216_v29 = vrot.slane %v4987_v5, 7 }
 0x31f   : > { %934 = vrot.lane.b32.xlu1 %v7129_v49, %s7096_s18 }
 0x320   : > { %v5249_v4 = vrot.slane %v1690_v27, %v4866_v14  ;;  %960 = vrot.lane.b32.xlu0 %v4333_v16, %s7164_s6  ;;  %v1201_v58 = vsel %vm395_vm2, %v1200_v26, %v1199_v22  ;;  %v1202_v27 = vrot.slane %v4897_v15, 5  ;;  %v1222_v26 = vrot.slane %v4333_v16, 7  ;;  %v7168_v22 = vld [vmem:[#allocation30_spill] sm:$0xff] }
 0x321   : > { %v759_v46 = vpop.permute.xlu1 %758  ;;  %v1217_v54 = vsel %vm392_vm1, %v1216_v29, %v7168_v22  ;;  %v1220_v15 = vrot.slane %v5001_v40, 5  ;;  %v1224_v29 = vrot.slane %v4337_v10, 6 }
 0x322   : > { %v5253_v59 = vpop.permute.xlu0 %848  ;;  %v1715_v7 = vcombine.high %v5246_v13, %v5249_v4  ;;  %v1206_v38 = vrot.slane %v759_v46, 6  ;;  %v7167_v46 = vld [vmem:[#allocation26_spill] sm:$0xff] }
 0x323   : > { %938 = vrot.lane.b32.xlu1 %v4337_v10, %s7096_s18  ;;  %v1205_v47 = vsel %vm392_vm1, %v1204_v18, %v7167_v46 }
 0x324   : > { %964 = vrot.lane.b32.xlu0 %v4339_v11, %s7164_s6  ;;  %v1207_v5 = vsel %vm395_vm2, %v1206_v38, %v1205_v47 }
 0x325   : > { %v767_v52 = vpop.permute.xlu1 %766 }
 0x326   : > { %v1212_v0 = vrot.slane %v767_v52, 6  ;;  %v5264_v20 = vpop.permute.xlu0 %852 }
 0x327   : > { %942 = vrot.lane.b32.xlu1 %v7129_v49, %s7099_s14 }
 0x328   : > { %v1213_v12 = vsel %vm395_vm2, %v1212_v0, %v1211_v17  ;;  %968 = vrot.lane.b32.xlu0 %v4333_v16, %s7052_s28  ;;  %v1208_v0 = vrot.slane %v4930_v30, 5  ;;  %v1203_v17 = vsel %vm398_vm3, %v1202_v27, %v1201_v58  ;;  %v1223_v58 = vsel %vm392_vm1, %v1222_v26, %v7129_v49 }
 0x329   : > { %v1215_v35 = vsel %vm398_vm3, %v1214_v37, %v1213_v12  ;;  %v775_v57 = vpop.permute.xlu1 %774  ;;  %v1234_v27 = vrot.slane %v5043_v32, 7 }
 0x32a   : > { %v1218_v52 = vrot.slane %v775_v57, 6  ;;  %v5283_v36 = vpop.permute.xlu0 %856  ;;  %v1698_v18 = vcombine.low %v1203_v17, %v1215_v35  ;;  %v1209_v37 = vsel %vm398_vm3, %v1208_v0, %v1207_v5  ;;  %v1714_v57 = vcombine.low %v5246_v13, %v5249_v4  ;;  %v7169_v17 = vld [vmem:[#allocation34_spill] sm:$0xff] }
 0x32b   : > { %946 = vrot.lane.b32.xlu1 %v4337_v10, %s7099_s14  ;;  %v1228_v5 = vrot.slane %v5014_v28, 7 }
 0x32c   : > { %v1219_v38 = vsel %vm395_vm2, %v1218_v52, %v1217_v54  ;;  %972 = vrot.lane.b32.xlu0 %v4339_v11, %s7052_s28  ;;  %v1705_v47 = vrot.slane %v1698_v18, %v4866_v14  ;;  %v1225_v52 = vsel %vm395_vm2, %v1224_v29, %v1223_v58  ;;  %v1235_v18 = vsel %vm392_vm1, %v1234_v27, %v7169_v17 }
 0x32d   : > { %v1221_v30 = vsel %vm398_vm3, %v1220_v15, %v1219_v38  ;;  %v787_v12 = vpop.permute.xlu1 %786  ;;  %v1238_v38 = vrot.slane %v5057_v1, 5  ;;  %v1244_v17 = vrot.slane %v5086_v51, 5 }
 0x32e   : > { %v1706_v46 = vcombine.low %v1209_v37, %v1221_v30  ;;  %v5299_v40 = vpop.permute.xlu0 %860  ;;  %v1230_v0 = vrot.slane %v787_v12, 6  ;;  %v1240_v37 = vrot.slane %v5068_v39, 7  ;;  %v1226_v30 = vrot.slane %v4339_v11, 5 }
 0x32f   : > { %950 = vrot.lane.b32.xlu1 %v7129_v49, %s7047_s9  ;;  %v5327_v12 = vrot.slane %v1714_v57, %v4933_v41  ;;  %v1232_v57 = vrot.slane %v5026_v33, 5 }
 0x330   : > { %v1713_v35 = vrot.slane %v1706_v46, %v4866_v14  ;;  %976 = vrot.lane.b32.xlu0 %v4333_v16, %s7108_s16  ;;  %v7170_v46 = vld [vmem:[#allocation32_spill] sm:$0xff]  ;;  %v1227_v58 = vsel %vm398_vm3, %v1226_v30, %v1225_v52  ;;  %v1252_v30 = vrot.slane %v5133_v31, 7 }
 0x331   : > { %v795_v26 = vpop.permute.xlu1 %794  ;;  %v1229_v39 = vsel %vm392_vm1, %v1228_v5, %v7170_v46  ;;  %v7171_v52 = vld [vmem:[#allocation36_spill] sm:$0xff] }
 0x332   : > { %v1236_v32 = vrot.slane %v795_v26, 6  ;;  %v5314_v22 = vpop.permute.xlu0 %864  ;;  %v1730_v54 = vcombine.low %v1705_v47, %v1713_v35  ;;  %v1731_v15 = vcombine.high %v1705_v47, %v1713_v35  ;;  %v1729_v35 = vrot.slane %v1715_v7, %v4933_v41 }
 0x333   : > { %954 = vrot.lane.b32.xlu1 %v4337_v10, %s7047_s9  ;;  %v1231_v26 = vsel %vm395_vm2, %v1230_v0, %v1229_v39 }
 0x334   : > { %v1237_v28 = vsel %vm395_vm2, %v1236_v32, %v1235_v18  ;;  %980 = vrot.lane.b32.xlu0 %v4339_v11, %s7108_s16  ;;  %v5330_v29 = vrot.slane %v1730_v54, %v4933_v41  ;;  %v1745_v1 = vrot.slane %v1731_v15, %v4933_v41  ;;  %v1241_v15 = vsel %vm392_vm1, %v1240_v37, %v7171_v52 }
 0x335   : > { %v1239_v27 = vsel %vm398_vm3, %v1238_v38, %v1237_v28  ;;  %v803_v47 = vpop.permute.xlu1 %802  ;;  %v1233_v0 = vsel %vm398_vm3, %v1232_v57, %v1231_v26  ;;  %v1256_v57 = vrot.slane %v5142_v56, 5  ;;  %v1258_v26 = vrot.slane %v5161_v43, 7 }
 0x336   : > { %v1242_v32 = vrot.slane %v803_v47, 6  ;;  %v5343_v54 = vpop.permute.xlu0 %868  ;;  %v5347_v5 = vcombine.high %v5327_v12, %v5330_v29  ;;  %v5354_v13 = vcombine.low %v1729_v35, %v1745_v1  ;;  %v5356_v33 = vcombine.high %v1729_v35, %v1745_v1  ;;  %v7173_v35 = vld [vmem:[#allocation40_spill] sm:$0xff] }
 0x337   : > { %958 = vrot.lane.b32.xlu1 %v7129_v49, %s7164_s6  ;;  %v1750_v4 = vcombine.low %v1227_v58, %v1239_v27  ;;  %v1246_v47 = vrot.slane %v5111_v3, 7  ;;  %v1253_v31 = vsel %vm392_vm1, %v1252_v30, %v7173_v35 }
 0x338   : > { %7172 = vst [vmem:[#allocation10_spill] sm:$0xff] %v5356_v33  ;;  %v1243_v7 = vsel %vm395_vm2, %v1242_v32, %v1241_v15  ;;  %984 = vrot.lane.b32.xlu0 %v4333_v16, %s7112_s15 }
 0x339   : > { %v1245_v18 = vsel %vm398_vm3, %v1244_v17, %v1243_v7  ;;  %v811_v38 = vpop.permute.xlu1 %810  ;;  %v1757_v28 = vrot.slane %v1750_v4, %v4866_v14  ;;  %v7174_v7 = vld [vmem:[#allocation38_spill] sm:$0xff] }
 0x33a   : > { %v1758_v37 = vcombine.low %v1233_v0, %v1245_v18  ;;  %v5363_v51 = vpop.permute.xlu0 %872  ;;  %v1248_v32 = vrot.slane %v811_v38, 6  ;;  %v1247_v56 = vsel %vm392_vm1, %v1246_v47, %v7174_v7  ;;  %v7175_v0 = vld [vmem:[#allocation42_spill] sm:$0xff]  ;;  %v1262_v18 = vrot.slane %v5175_v42, 5  ;;  %v7176_v42 = vld [vmem:[#allocation44_spill] sm:$0xff] }
 0x33b   : > { %962 = vrot.lane.b32.xlu1 %v4337_v10, %s7164_s6  ;;  %v1259_v43 = vsel %vm392_vm1, %v1258_v26, %v7175_v0  ;;  %v1264_v38 = vrot.slane %v5184_v60, 7 }
 0x33c   : > { %v1765_v1 = vrot.slane %v1758_v37, %v4866_v14  ;;  %988 = vrot.lane.b32.xlu0 %v4339_v11, %s7112_s15  ;;  %v1249_v37 = vsel %vm395_vm2, %v1248_v32, %v1247_v56 }
 0x33d   : > { %v819_v46 = vpop.permute.xlu1 %818  ;;  %v1265_v60 = vsel %vm392_vm1, %v1264_v38, %v7176_v42 }
 0x33e   : > { %v1254_v39 = vrot.slane %v819_v46, 6  ;;  %v5372_v58 = vpop.permute.xlu0 %876  ;;  %v1783_v27 = vcombine.high %v1757_v28, %v1765_v1  ;;  %v1250_v46 = vrot.slane %v5125_v8, 5 }
 0x33f   : > { %966 = vrot.lane.b32.xlu1 %v7129_v49, %s7052_s28 }
 0x340   : > { %v1255_v52 = vsel %vm395_vm2, %v1254_v39, %v1253_v31  ;;  %992 = vrot.lane.b32.xlu0 %v4333_v16, %s7059_s23  ;;  %v1251_v26 = vsel %vm398_vm3, %v1250_v46, %v1249_v37 }
 0x341   : > { %v1257_v15 = vsel %vm398_vm3, %v1256_v57, %v1255_v52  ;;  %v827_v17 = vpop.permute.xlu1 %826  ;;  %v1268_v57 = vrot.slane %v5202_v9, 5  ;;  %v1782_v9 = vcombine.low %v1757_v28, %v1765_v1 }
 0x342   : > { %v1260_v3 = vrot.slane %v827_v17, 6  ;;  %v5385_v4 = vpop.permute.xlu0 %880 }
 0x343   : > { %970 = vrot.lane.b32.xlu1 %v4337_v10, %s7052_s28  ;;  %v5428_v28 = vrot.slane %v1782_v9, %v4933_v41 }
 0x344   : > { %v1261_v30 = vsel %vm395_vm2, %v1260_v3, %v1259_v43  ;;  %996 = vrot.lane.b32.xlu0 %v4339_v11, %s7059_s23  ;;  %v1270_v43 = vrot.slane %v5227_v23, 7  ;;  %v1797_v23 = vrot.slane %v1783_v27, %v4933_v41 }
 0x345   : > { %v1263_v39 = vsel %vm398_vm3, %v1262_v18, %v1261_v30  ;;  %v835_v47 = vpop.permute.xlu1 %834  ;;  %v1282_v30 = vrot.slane %v5283_v36, 7 }
 0x346   : > { %v1266_v35 = vrot.slane %v835_v47, 6  ;;  %v5401_v31 = vpop.permute.xlu0 %884  ;;  %v1766_v32 = vcombine.low %v1251_v26, %v1263_v39  ;;  %v7177_v47 = vld [vmem:[#allocation46_spill] sm:$0xff] }
 0x347   : > { %974 = vrot.lane.b32.xlu1 %v7129_v49, %s7108_s16  ;;  %v1271_v36 = vsel %vm392_vm1, %v1270_v43, %v7177_v47  ;;  %v7179_v43 = vld [vmem:[#allocation48_spill] sm:$0xff]  ;;  %v1292_v47 = vrot.slane %v5343_v54, 5 }
 0x348   : > { %v1267_v52 = vsel %vm395_vm2, %v1266_v35, %v1265_v60  ;;  %1000 = vrot.lane.b32.xlu0 %v4333_v16, %s7116_s0  ;;  %v1773_v56 = vrot.slane %v1766_v32, %v4866_v14  ;;  %v1276_v35 = vrot.slane %v5253_v59, 7 }
 0x349   : > { %v1269_v8 = vsel %vm398_vm3, %v1268_v57, %v1267_v52  ;;  %v843_v17 = vpop.permute.xlu1 %842 }
 0x34a   : > { %v1774_v3 = vcombine.low %v1257_v15, %v1269_v8  ;;  %v5413_v7 = vpop.permute.xlu0 %888  ;;  %v1272_v1 = vrot.slane %v843_v17, 6  ;;  %v7178_v8 = vld [vmem:[#allocation50_spill] sm:$0xff]  ;;  %v1286_v17 = vrot.slane %v5299_v40, 5 }
 0x34b   : > { %978 = vrot.lane.b32.xlu1 %v4337_v10, %s7108_s16  ;;  %v1283_v27 = vsel %vm392_vm1, %v1282_v30, %v7178_v8 }
 0x34c   : > { %v1781_v0 = vrot.slane %v1774_v3, %v4866_v14  ;;  %1004 = vrot.lane.b32.xlu0 %v4339_v11, %s7116_s0  ;;  %v1288_v3 = vrot.slane %v5314_v22, 7  ;;  %v1273_v9 = vsel %vm395_vm2, %v1272_v1, %v1271_v36  ;;  %v1280_v1 = vrot.slane %v5264_v20, 5 }
 0x34d   : > { %v851_v18 = vpop.permute.xlu1 %850 }
 0x34e   : > { %v5422_v38 = vpop.permute.xlu0 %892  ;;  %v1798_v37 = vcombine.low %v1773_v56, %v1781_v0  ;;  %v1799_v15 = vcombine.high %v1773_v56, %v1781_v0  ;;  %v1278_v60 = vrot.slane %v851_v18, 6  ;;  %v1274_v0 = vrot.slane %v5241_v61, 5 }
 0x34f   : > { %982 = vrot.lane.b32.xlu1 %v7129_v49, %s7112_s15  ;;  %v1277_v18 = vsel %vm392_vm1, %v1276_v35, %v7179_v43 }
 0x350   : > { %1008 = vrot.lane.b32.xlu0 %v4333_v16, %s7118_s1  ;;  %v5433_v46 = vrot.slane %v1798_v37, %v4933_v41  ;;  %v1813_v39 = vrot.slane %v1799_v15, %v4933_v41  ;;  %v1279_v37 = vsel %vm395_vm2, %v1278_v60, %v1277_v18  ;;  %v1275_v61 = vsel %vm398_vm3, %v1274_v0, %v1273_v9 }
 0x351   : > { %v859_v42 = vpop.permute.xlu1 %858 }
 0x352   : > { %v1284_v57 = vrot.slane %v859_v42, 6  ;;  %v5440_v26 = vpop.permute.xlu0 %896  ;;  %v5444_v32 = vcombine.high %v5428_v28, %v5433_v46  ;;  %v5446_v52 = vcombine.low %v1797_v23, %v1813_v39  ;;  %v5454_v59 = vcombine.high %v1797_v23, %v1813_v39  ;;  %v7180_v23 = vld [vmem:[#allocation52_spill] sm:$0xff] }
 0x353   : > { %986 = vrot.lane.b32.xlu1 %v4337_v10, %s7112_s15  ;;  %v1289_v39 = vsel %vm392_vm1, %v1288_v3, %v7180_v23  ;;  %v1281_v42 = vsel %vm398_vm3, %v1280_v1, %v1279_v37  ;;  %v1294_v37 = vrot.slane %v5363_v51, 7  ;;  %v7183_v51 = vld [vmem:[#allocation54_spill] sm:$0xff] }
 0x354   : > { %v1285_v56 = vsel %vm395_vm2, %v1284_v57, %v1283_v27  ;;  %1012 = vrot.lane.b32.xlu0 %v4339_v11, %s7118_s1 }
 0x355   : > { %v1287_v40 = vsel %vm398_vm3, %v1286_v17, %v1285_v56  ;;  %v867_v22 = vpop.permute.xlu1 %866 }
 0x356   : > { %v1290_v15 = vrot.slane %v867_v22, 6  ;;  %v5465_v30 = vpop.permute.xlu0 %900  ;;  %v1818_v36 = vcombine.low %v1275_v61, %v1287_v40  ;;  %v5509_v22 = vcombine.low %v5074_v19, %v5079_v63  ;;  %v5523_v63 = vcombine.low %v5428_v28, %v5433_v46 }
 0x357   : > { %990 = vrot.lane.b32.xlu1 %v7129_v49, %s7059_s23  ;;  %v1310_v61 = vrot.slane %v5422_v38, 5  ;;  %v1312_v28 = vrot.slane %v5440_v26, 7 }
 0x358   : > { %v1291_v35 = vsel %vm395_vm2, %v1290_v15, %v1289_v39  ;;  %1016 = vrot.lane.b32.xlu0 %v4333_v16, %s7120_s2  ;;  %v5484_v54 = vrot.slane %v1818_v36, %v4866_v14  ;;  %7181 = vst [vmem:[#allocation25_spill] sm:$0xff] %v5509_v22  ;;  %7182 = vst [vmem:[#allocation33_spill] sm:$0xff] %v5523_v63  ;;  %v1298_v36 = vrot.slane %v5372_v58, 5 }
 0x359   : > { %v1293_v20 = vsel %vm398_vm3, %v1292_v47, %v1291_v35  ;;  %v875_v60 = vpop.permute.xlu1 %874  ;;  %v7184_v35 = vld [vmem:[#allocation56_spill] sm:$0xff] }
 0x35a   : > { %v1826_v57 = vcombine.low %v1281_v42, %v1293_v20  ;;  %v5479_v8 = vpop.permute.xlu0 %904  ;;  %v1296_v15 = vrot.slane %v875_v60, 6 }
 0x35b   : > { %994 = vrot.lane.b32.xlu1 %v4337_v10, %s7059_s23 }
 0x35c   : > { %v5487_v27 = vrot.slane %v1826_v57, %v4866_v14  ;;  %1020 = vrot.lane.b32.xlu0 %v4339_v11, %s7120_s2 }
 0x35d   : > { %v883_v17 = vpop.permute.xlu1 %882 }
 0x35e   : > { %v5491_v3 = vpop.permute.xlu0 %908  ;;  %v1851_v9 = vcombine.high %v5484_v54, %v5487_v27  ;;  %v1302_v39 = vrot.slane %v883_v17, 6  ;;  %v1304_v17 = vrot.slane %v5401_v31, 5 }
 0x35f   : > { %998 = vrot.lane.b32.xlu1 %v7129_v49, %s7116_s0 }
 0x360   : > { %1024 = vrot.lane.b32.xlu0 %v4333_v16, %s7071_s27  ;;  %v1306_v16 = vrot.slane %v5413_v7, 7  ;;  %v1295_v7 = vsel %vm392_vm1, %v1294_v37, %v7183_v51 }
 0x361   : > { %v887_v56 = vpop.permute.xlu1 %886 }
 0x362   : > { %v5499_v0 = vpop.permute.xlu0 %912  ;;  %v1307_v1 = vsel %vm392_vm1, %v1306_v16, %v887_v56  ;;  %v1316_v56 = vrot.slane %v5465_v30, 5 }
 0x363   : > { %1002 = vrot.lane.b32.xlu1 %v4337_v10, %s7116_s0 }
 0x364   : > { %1028 = vrot.lane.b32.xlu0 %v4339_v11, %s7071_s27  ;;  %v1300_v11 = vrot.slane %v5385_v4, 7  ;;  %v1297_v4 = vsel %vm395_vm2, %v1296_v15, %v1295_v7 }
 0x365   : > { %v891_v43 = vpop.permute.xlu1 %890 }
 0x366   : > { %v1308_v18 = vrot.slane %v891_v43, 6  ;;  %v5505_v40 = vpop.permute.xlu0 %916  ;;  %v1301_v42 = vsel %vm392_vm1, %v1300_v11, %v7184_v35  ;;  %v1299_v43 = vsel %vm398_vm3, %v1298_v36, %v1297_v4  ;;  %v1865_v36 = vrot.slane %v1851_v9, %v4933_v41 }
 0x367   : > { %1006 = vrot.lane.b32.xlu1 %v7129_v49, %s7118_s1  ;;  %v1303_v60 = vsel %vm395_vm2, %v1302_v39, %v1301_v42  ;;  %v1328_v33 = vrot.slane %v5505_v40, 5 }
 0x368   : > { %2037 = vperm.xlu0 %4077, %v5509_v22   ;;  %v1309_v47 = vsel %vm395_vm2, %v1308_v18, %v1307_v1  ;;  %v1305_v37 = vsel %vm398_vm3, %v1304_v17, %v1303_v60 }
 0x369   : > { %v895_v23 = vpop.permute.xlu1 %894  ;;  %v1311_v46 = vsel %vm398_vm3, %v1310_v61, %v1309_v47 }
 0x36a   : > { %v5519_v19 = vpop.permute.xlu0 %920  ;;  %v1313_v58 = vsel %vm392_vm1, %v1312_v28, %v895_v23  ;;  %v1834_v26 = vcombine.low %v1299_v43, %v1311_v46  ;;  %v1850_v23 = vcombine.low %v5484_v54, %v5487_v27 }
 0x36b   : > { %1010 = vrot.lane.b32.xlu1 %v4337_v10, %s7118_s1 }
 0x36c   : > { %2052 = vperm.xlu0 %4077, %v5523_v63   ;;  %v1841_v30 = vrot.slane %v1834_v26, %v4866_v14  ;;  %v1858_v61 = vrot.slane %v1850_v23, %v4933_v41  ;;  %v1330_v63 = vrot.slane %v5519_v19, 7 }
 0x36d   : > { %v899_v20 = vpop.permute.xlu1 %898 }
 0x36e   : > { %v1314_v38 = vrot.slane %v899_v20, 6  ;;  %v5538_v57 = vpop.permute.xlu0 %924  ;;  %v5579_v20 = vcombine.low %v4950_v55, %v4955_v24 }
 0x36f   : > { %1014 = vrot.lane.b32.xlu1 %v7129_v49, %s7120_s2 }
 0x370   : > { %v1315_v18 = vsel %vm395_vm2, %v1314_v38, %v1313_v58  ;;  %v5586_v38 = vcombine.low %v5190_v50, %v5195_v62 }
 0x371   : > { %v1317_v16 = vsel %vm398_vm3, %v1316_v56, %v1315_v18  ;;  %v5549_v15 = vpop.permute.xlu1 %902  ;;  %v5593_v56 = vcombine.low %v5327_v12, %v5330_v29 }
 0x372   : > { %v1842_v11 = vcombine.low %v1305_v37, %v1317_v16  ;;  %v929_v31 = vpop.permute.xlu0 %928  ;;  %7186 = vst [vmem:[#allocation29_spill] sm:$0xff] %v5586_v38 }
 0x373   : > { %1018 = vrot.lane.b32.xlu1 %v4337_v10, %s7120_s2 }
 0x374   : > { %v1849_v1 = vrot.slane %v1842_v11, %v4866_v14 }
 0x375   : > { %v5557_v39 = vpop.permute.xlu1 %906 }
 0x376   : > { %v5559_v47 = vpop.permute.xlu0 %932  ;;  %v1866_v51 = vcombine.low %v1841_v30, %v1849_v1  ;;  %v1867_v7 = vcombine.high %v1841_v30, %v1849_v1 }
 0x377   : > { %1022 = vrot.lane.b32.xlu1 %v7129_v49, %s7071_s27 }
 0x378   : > { %v1874_v4 = vrot.slane %v1866_v51, %v4933_v41  ;;  %v1881_v35 = vrot.slane %v1867_v7, %v4933_v41  ;;  %v1336_v7 = vrot.slane %v929_v31, 7 }
 0x379   : > { %v911_v42 = vpop.permute.xlu1 %910 }
 0x37a   : > { %v5567_v28 = vpop.permute.xlu0 %936  ;;  %v5569_v54 = vcombine.high %v1858_v61, %v1874_v4  ;;  %v5571_v27 = vcombine.low %v1865_v36, %v1881_v35  ;;  %v5575_v46 = vcombine.high %v1865_v36, %v1881_v35  ;;  %v5598_v43 = vcombine.low %v1858_v61, %v1874_v4 }
 0x37b   : > { %1026 = vrot.lane.b32.xlu1 %v4337_v10, %s7071_s27  ;;  %v1324_v4 = vrot.slane %v5499_v0, 7  ;;  %v1318_v35 = vrot.slane %v5479_v8, 7  ;;  %v1340_v0 = vrot.slane %v5559_v47, 5 }
 0x37c   : > { %7185 = vst [vmem:[#allocation11_spill] sm:$0xff] %v5575_v46 }
 0x37d   : > { %v915_v49 = vpop.permute.xlu1 %914 }
 0x37e   : > { %v5581_v9 = vpop.permute.xlu0 %940  ;;  %v1326_v61 = vrot.slane %v915_v49, 6 }
 0x37f   : > { %2032 = vperm.xlu1 %4076, %v5579_v20  }
 0x381   : > { %v919_v60 = vpop.permute.xlu1 %918 }
 0x382   : > { %v5588_v17 = vpop.permute.xlu0 %944  ;;  %v1331_v19 = vsel %vm392_vm1, %v1330_v63, %v919_v60  ;;  %v1322_v63 = vrot.slane %v5491_v3, 5  ;;  %v1346_v3 = vrot.slane %v5581_v9, 5 }
 0x383   : > { %2042 = vperm.xlu1 %4076, %v5586_v38   ;;  %v1320_v38 = vrot.slane %v5557_v39, 6  ;;  %v1334_v39 = vrot.slane %v5538_v57, 5 }
 0x385   : > { %v923_v10 = vpop.permute.xlu1 %922 }
 0x386   : > { %v5595_v55 = vpop.permute.xlu0 %948  ;;  %v1332_v36 = vrot.slane %v923_v10, 6 }
 0x387   : > { %2047 = vperm.xlu1 %4076, %v5593_v56  }
 0x388   : > { %v1333_v40 = vsel %vm395_vm2, %v1332_v36, %v1331_v19 }
 0x389   : > { %v927_v24 = vpop.permute.xlu1 %926 }
 0x38a   : > { %v953_v58 = vpop.permute.xlu0 %952  ;;  %v1337_v22 = vsel %vm392_vm1, %v1336_v7, %v927_v24  ;;  %v1319_v24 = vsel %vm392_vm1, %v1318_v35, %v5549_v15 }
 0x38b   : > { %2057 = vperm.xlu1 %4076, %v5598_v43   ;;  %v1354_v10 = vrot.slane %v953_v58, 7 }
 0x38d   : > { %v931_v50 = vpop.permute.xlu1 %930 }
 0x38e   : > { %v957_v62 = vpop.permute.xlu0 %956  ;;  %v1338_v23 = vrot.slane %v931_v50, 6  ;;  %v1325_v50 = vsel %vm392_vm1, %v1324_v4, %v911_v42 }
 0x38f   : > { %v1327_v8 = vsel %vm395_vm2, %v1326_v61, %v1325_v50  ;;  %v1358_v61 = vrot.slane %v957_v62, 5  ;;  %v1352_v62 = vrot.slane %v5595_v55, 5 }
 0x390   : > { %v1339_v44 = vsel %vm395_vm2, %v1338_v23, %v1337_v22  ;;  %v1321_v22 = vsel %vm395_vm2, %v1320_v38, %v1319_v24  ;;  %v1329_v60 = vsel %vm398_vm3, %v1328_v33, %v1327_v8  ;;  %v1335_v38 = vsel %vm398_vm3, %v1334_v39, %v1333_v40 }
 0x391   : > { %v935_v26 = vpop.permute.xlu1 %934  ;;  %v1341_v23 = vsel %vm398_vm3, %v1340_v0, %v1339_v44  ;;  %v1323_v44 = vsel %vm398_vm3, %v1322_v63, %v1321_v22 }
 0x392   : > { %v961_v18 = vpop.permute.xlu0 %960  ;;  %v1886_v50 = vcombine.low %v1323_v44, %v1335_v38 }
 0x393   : > { %v1360_v33 = vrot.slane %v961_v18, 7 }
 0x394   : > { %v1893_v55 = vrot.slane %v1886_v50, %v4866_v14 }
 0x395   : > { %v939_v37 = vpop.permute.xlu1 %938 }
 0x396   : > { %v5601_v16 = vpop.permute.xlu0 %964  ;;  %v1344_v42 = vrot.slane %v939_v37, 6  ;;  %v1348_v37 = vrot.slane %v5588_v17, 7 }
 0x397   : > { %v1364_v0 = vrot.slane %v5601_v16, 5 }
 0x399   : > { %v943_v11 = vpop.permute.xlu1 %942 }
 0x39a   : > { %v5603_v12 = vpop.permute.xlu0 %968 }
 0x39d   : > { %v947_v29 = vpop.permute.xlu1 %946 }
 0x39e   : > { %v5605_v30 = vpop.permute.xlu0 %972  ;;  %v1350_v57 = vrot.slane %v947_v29, 6  ;;  %v1349_v29 = vsel %vm392_vm1, %v1348_v37, %v943_v11 }
 0x3a0   : > { %v1351_v17 = vsel %vm395_vm2, %v1350_v57, %v1349_v29 }
 0x3a1   : > { %v951_v1 = vpop.permute.xlu1 %950 }
 0x3a2   : > { %v5607_v51 = vpop.permute.xlu0 %976  ;;  %v1355_v47 = vsel %vm392_vm1, %v1354_v10, %v951_v1  ;;  %v1894_v1 = vcombine.low %v1329_v60, %v1341_v23  ;;  %v1353_v10 = vsel %vm398_vm3, %v1352_v62, %v1351_v17 }
 0x3a4   : > { %v1901_v9 = vrot.slane %v1894_v1, %v4866_v14 }
 0x3a5   : > { %v955_v46 = vpop.permute.xlu1 %954 }
 0x3a6   : > { %v1356_v31 = vrot.slane %v955_v46, 6  ;;  %v5617_v49 = vpop.permute.xlu0 %980  ;;  %v1342_v46 = vrot.slane %v5567_v28, 7  ;;  %v1918_v22 = vcombine.low %v1893_v55, %v1901_v9  ;;  %v1919_v50 = vcombine.high %v1893_v55, %v1901_v9 }
 0x3a8   : > { %v1357_v58 = vsel %vm395_vm2, %v1356_v31, %v1355_v47  ;;  %v1343_v28 = vsel %vm392_vm1, %v1342_v46, %v935_v26  ;;  %v1933_v62 = vrot.slane %v1919_v50, %v4933_v41 }
 0x3a9   : > { %v959_v7 = vpop.permute.xlu1 %958  ;;  %v1345_v4 = vsel %vm395_vm2, %v1344_v42, %v1343_v28  ;;  %v1359_v36 = vsel %vm398_vm3, %v1358_v61, %v1357_v58 }
 0x3aa   : > { %v5633_v15 = vpop.permute.xlu0 %984  ;;  %v1347_v26 = vsel %vm398_vm3, %v1346_v3, %v1345_v4  ;;  %v1361_v8 = vsel %vm392_vm1, %v1360_v33, %v959_v7  ;;  %v1926_v7 = vrot.slane %v1918_v22, %v4933_v41  ;;  %v1370_v22 = vrot.slane %v5605_v30, 5 }
 0x3ab   : > { %v1902_v18 = vcombine.low %v1347_v26, %v1359_v36 }
 0x3ad   : > { %v963_v35 = vpop.permute.xlu1 %962  ;;  %v1909_v16 = vrot.slane %v1902_v18, %v4866_v14 }
 0x3ae   : > { %v1362_v31 = vrot.slane %v963_v35, 6  ;;  %v5650_v19 = vpop.permute.xlu0 %988 }
 0x3b0   : > { %v1363_v11 = vsel %vm395_vm2, %v1362_v31, %v1361_v8 }
 0x3b1   : > { %v1365_v39 = vsel %vm398_vm3, %v1364_v0, %v1363_v11  ;;  %v5654_v24 = vpop.permute.xlu1 %966 }
 0x3b2   : > { %v1910_v40 = vcombine.low %v1353_v10, %v1365_v39  ;;  %v993_v23 = vpop.permute.xlu0 %992 }
 0x3b3   : > { %v1384_v9 = vrot.slane %v993_v23, 7 }
 0x3b4   : > { %v1917_v42 = vrot.slane %v1910_v40, %v4866_v14  ;;  %v1366_v40 = vrot.slane %v5603_v12, 7 }
 0x3b5   : > { %v5659_v46 = vpop.permute.xlu1 %970 }
 0x3b6   : > { %v1934_v47 = vcombine.low %v1909_v16, %v1917_v42  ;;  %v5665_v58 = vpop.permute.xlu0 %996  ;;  %v1935_v36 = vcombine.high %v1909_v16, %v1917_v42  ;;  %v1372_v16 = vrot.slane %v5607_v51, 7 }
 0x3b8   : > { %v1942_v63 = vrot.slane %v1934_v47, %v4933_v41  ;;  %v1949_v31 = vrot.slane %v1935_v36, %v4933_v41  ;;  %v1378_v47 = vrot.slane %v5633_v15, 7 }
 0x3b9   : > { %v975_v60 = vpop.permute.xlu1 %974 }
 0x3ba   : > { %v5663_v57 = vcombine.low %v1926_v7, %v1942_v63  ;;  %v5669_v61 = vpop.permute.xlu0 %1000  ;;  %v5675_v4 = vcombine.high %v1926_v7, %v1942_v63  ;;  %v5687_v8 = vcombine.low %v1933_v62, %v1949_v31  ;;  %v1368_v7 = vrot.slane %v5659_v46, 6 }
 0x3bb   : > { %v1373_v23 = vsel %vm392_vm1, %v1372_v16, %v975_v60  ;;  %v1382_v46 = vrot.slane %v5650_v19, 5 }
 0x3bc   : > { %2062 = vperm.xlu0 %4077, %v5663_v57  }
 0x3bd   : > { %v979_v37 = vpop.permute.xlu1 %978 }
 0x3be   : > { %v5672_v44 = vpop.permute.xlu0 %1004  ;;  %v1374_v55 = vrot.slane %v979_v37, 6 }
 0x3c0   : > { %2072 = vperm.xlu0 %4077, %v4966_v21   ;;  %v1375_v50 = vsel %vm395_vm2, %v1374_v55, %v1373_v23 }
 0x3c1   : > { %v983_v38 = vpop.permute.xlu1 %982 }
 0x3c2   : > { %v5678_v33 = vpop.permute.xlu0 %1008  ;;  %v1379_v30 = vsel %vm392_vm1, %v1378_v47, %v983_v38 }
 0x3c4   : > { %2082 = vperm.xlu0 %4077, %v5206_v45  }
 0x3c5   : > { %v987_v28 = vpop.permute.xlu1 %986 }
 0x3c6   : > { %v5681_v35 = vpop.permute.xlu0 %1012  ;;  %v1380_v42 = vrot.slane %v987_v28, 6  ;;  %v1388_v28 = vrot.slane %v5665_v58, 5 }
 0x3c8   : > { %2092 = vperm.xlu0 %4077, %v5444_v32  }
 0x3c9   : > { %v991_v1 = vpop.permute.xlu1 %990 }
 0x3ca   : > { %v1017_v0 = vpop.permute.xlu0 %1016  ;;  %v1385_v63 = vsel %vm392_vm1, %v1384_v9, %v991_v1  ;;  %v1367_v1 = vsel %vm392_vm1, %v1366_v40, %v5654_v24  ;;  %v5715_v24 = vcombine.high %v1933_v62, %v1949_v31 }
 0x3cb   : > { %v1402_v15 = vrot.slane %v1017_v0, 7  ;;  %v1369_v60 = vsel %vm395_vm2, %v1368_v7, %v1367_v1 }
 0x3cc   : > { %2102 = vperm.xlu0 %4077, %v5675_v4  }
 0x3cd   : > { %v995_v3 = vpop.permute.xlu1 %994 }
 0x3ce   : > { %v1021_v11 = vpop.permute.xlu0 %1020  ;;  %v1386_v39 = vrot.slane %v995_v3, 6  ;;  %v1376_v3 = vrot.slane %v5617_v49, 5  ;;  %v1381_v49 = vsel %vm395_vm2, %v1380_v42, %v1379_v30 }
 0x3cf   : > { %v1383_v40 = vsel %vm398_vm3, %v1382_v46, %v1381_v49  ;;  %v1406_v42 = vrot.slane %v1021_v11, 5 }
 0x3d0   : > { %2112 = vperm.xlu0 %4077, %v4968_v2   ;;  %v1387_v12 = vsel %vm395_vm2, %v1386_v39, %v1385_v63  ;;  %v1390_v39 = vrot.slane %v5669_v61, 7  ;;  %v1377_v0 = vsel %vm398_vm3, %v1376_v3, %v1375_v50  ;;  %v1371_v61 = vsel %vm398_vm3, %v1370_v22, %v1369_v60 }
 0x3d1   : > { %v999_v29 = vpop.permute.xlu1 %998  ;;  %v1389_v58 = vsel %vm398_vm3, %v1388_v28, %v1387_v12  ;;  %v1954_v3 = vcombine.low %v1371_v61, %v1383_v40  ;;  %v1400_v22 = vrot.slane %v5681_v35, 5  ;;  %v7187_v40 = vld [vmem:[#allocation23_spill] sm:$0xff] }
 0x3d2   : > { %v1025_v37 = vpop.permute.xlu0 %1024  ;;  %v1391_v47 = vsel %vm392_vm1, %v1390_v39, %v999_v29  ;;  %v1962_v7 = vcombine.low %v1377_v0, %v1389_v58 }
 0x3d3   : > { %v1961_v35 = vrot.slane %v1954_v3, %v4866_v14 }
 0x3d4   : > { %2122 = vperm.xlu0 %4077, %v5208_v25   ;;  %v1969_v28 = vrot.slane %v1962_v7, %v4866_v14 }
 0x3d5   : > { %v1003_v17 = vpop.permute.xlu1 %1002 }
 0x3d6   : > { %v1392_v9 = vrot.slane %v1003_v17, 6  ;;  %v1396_v17 = vrot.slane %v5678_v33, 7  ;;  %v1029_v63 = vpop.permute.xlu0 %1028  ;;  %v1986_v49 = vcombine.low %v1961_v35, %v1969_v28  ;;  %v1987_v0 = vcombine.high %v1961_v35, %v1969_v28 }
 0x3d7   : > { %v1412_v12 = vrot.slane %v1029_v63, 5  ;;  %v7190_v63 = vld [vmem:[#allocation25_spill] sm:$0xff]  ;;  %v7003_v35 = vmov 3  }
 0x3d8   : > { %2132 = vperm.xlu0 %4077, %v5446_v52   ;;  %v1994_v60 = vrot.slane %v1986_v49, %v4933_v41 }
 0x3d9   : > { %v1007_v26 = vpop.permute.xlu1 %1006 }
 0x3da   : > { %v1397_v31 = vsel %vm392_vm1, %v1396_v17, %v1007_v26  ;;  %v4170_v26 = vmov 1  }
 0x3dc   : > { %2142 = vperm.xlu0 %4077, %v5687_v8  }
 0x3dd   : > { %v1011_v18 = vpop.permute.xlu1 %1010 }
 0x3de   : > { %v1398_v19 = vrot.slane %v1011_v18, 6  ;;  %v1394_v18 = vrot.slane %v5672_v44, 5 }
 0x3e0   : > { %2152 = vperm.xlu0 %4077, %v4976_v48   ;;  %v1399_v11 = vsel %vm395_vm2, %v1398_v19, %v1397_v31 }
 0x3e1   : > { %v1015_v10 = vpop.permute.xlu1 %1014  ;;  %v1401_v50 = vsel %vm398_vm3, %v1400_v22, %v1399_v11 }
 0x3e2   : > { %v1403_v55 = vsel %vm392_vm1, %v1402_v15, %v1015_v10  ;;  %v1393_v10 = vsel %vm395_vm2, %v1392_v9, %v1391_v47  ;;  %v7189_v47 = vld [vmem:[#allocation11_spill] sm:$0xff] }
 0x3e3   : > { %v1395_v23 = vsel %vm398_vm3, %v1394_v18, %v1393_v10  ;;  %v4171_v10 = vmov 2   ;;  %v7191_v18 = vld [vmem:[#allocation29_spill] sm:$0xff] }
 0x3e4   : > { %2162 = vperm.xlu0 %4077, %v5216_v34  }
 0x3e5   : > { %v1019_v36 = vpop.permute.xlu1 %1018 }
 0x3e6   : > { %v1404_v51 = vrot.slane %v1019_v36, 6  ;;  %v1408_v36 = vrot.slane %v1025_v37, 7 }
 0x3e7   : > { %v5778_v7 = vpop.permute.xlu0 %2037 }
 0x3e8   : > { %2172 = vperm.xlu0 %4077, %v5454_v59   ;;  %v1405_v16 = vsel %vm395_vm2, %v1404_v51, %v1403_v55 }
 0x3e9   : > { %v1023_v38 = vpop.permute.xlu1 %1022  ;;  %v1407_v33 = vsel %vm398_vm3, %v1406_v42, %v1405_v16  ;;  %v2001_v16 = vrot.slane %v1987_v0, %v4933_v41  ;;  %v7188_v42 = vld [vmem:[#allocation10_spill] sm:$0xff] }
 0x3ea   : > { %v1409_v51 = vsel %vm392_vm1, %v1408_v36, %v1023_v38  ;;  %v1970_v44 = vcombine.low %v1395_v23, %v1407_v33  ;;  %v7192_v36 = vld [vmem:[#allocation33_spill] sm:$0xff]  ;;  %vm3633_vm1 = vcmask 850944  }
 0x3eb   : > { %v5784_v31 = vpop.permute.xlu0 %2052 }
 0x3ec   : > { %2182 = vperm.xlu0 %4077, %v5715_v24   ;;  %v1977_v46 = vrot.slane %v1970_v44, %v4866_v14 }
 0x3ed   : > { %v1027_v62 = vpop.permute.xlu1 %1026 }
 0x3ee   : > { %v1410_v29 = vrot.slane %v1027_v62, 6 }
 0x3f0   : > { %v1411_v37 = vsel %vm395_vm2, %v1410_v29, %v1409_v51  ;;  %4078 = vset.pattern.permute.xlu0 %v4170_v26  ;;  %vm3635_vm2 = vcmask 916480  }
 0x3f1   : > { %v1413_v30 = vsel %vm398_vm3, %v1412_v12, %v1411_v37  ;;  %2232 = vperm.xlu0 %4078, %v5579_v20   ;;  %vm3637_vm3 = vcmask 982016  }
 0x3f2   : > { %v1978_v15 = vcombine.low %v1401_v50, %v1413_v30 }
 0x3f4   : > { %v1985_v1 = vrot.slane %v1978_v15, %v4866_v14 }
 0x3f5   : > { %2244 = vperm.xlu0 %4078, %v5593_v56  }
 0x3f6   : > { %v2002_v9 = vcombine.low %v1977_v46, %v1985_v1  ;;  %v2003_v38 = vcombine.high %v1977_v46, %v1985_v1 }
 0x3f8   : > { %v2010_v39 = vrot.slane %v2002_v9, %v4933_v41  ;;  %v2017_v19 = vrot.slane %v2003_v38, %v4933_v41 }
 0x3f9   : > { %2252 = vperm.xlu0 %4078, %v5598_v43  }
 0x3fa   : > { %v5742_v58 = vcombine.low %v1994_v60, %v2010_v39  ;;  %v5752_v55 = vcombine.high %v1994_v60, %v2010_v39  ;;  %v5764_v17 = vcombine.low %v2001_v16, %v2017_v19  ;;  %v5774_v61 = vcombine.high %v2001_v16, %v2017_v19 }
 0x3fc   : > { %2067 = vperm.xlu1 %4076, %v5742_v58  }
 0x3fd   : > { %2260 = vperm.xlu0 %4078, %v5742_v58  }
 0x3fe   : > { %v5830_v37 = vpop.permute.xlu1 %2032 }
 0x400   : > { %2077 = vperm.xlu1 %4076, %v5090_v53  }
 0x401   : > { %2268 = vperm.xlu0 %4078, %v5090_v53  }
 0x402   : > { %v5838_v50 = vpop.permute.xlu1 %2042 }
 0x404   : > { %2087 = vperm.xlu1 %4076, %v5347_v5  }
 0x405   : > { %2276 = vperm.xlu0 %4078, %v5347_v5  }
 0x406   : > { %v5847_v46 = vpop.permute.xlu1 %2047 }
 0x408   : > { %2097 = vperm.xlu1 %4076, %v5569_v54  }
 0x409   : > { %2284 = vperm.xlu0 %4078, %v5569_v54  }
 0x40a   : > { %v5854_v49 = vpop.permute.xlu1 %2057 }
 0x40c   : > { %2107 = vperm.xlu1 %4076, %v5752_v55  }
 0x40d   : > { %2292 = vperm.xlu0 %4078, %v5752_v55  }
 0x410   : > { %2117 = vperm.xlu1 %4076, %v5092_v6  }
 0x411   : > { %2300 = vperm.xlu0 %4078, %v5092_v6  }
 0x414   : > { %2127 = vperm.xlu1 %4076, %v5354_v13  }
 0x415   : > { %2308 = vperm.xlu0 %4078, %v5354_v13  }
 0x418   : > { %2137 = vperm.xlu1 %4076, %v5571_v27  }
 0x419   : > { %2316 = vperm.xlu0 %4078, %v5571_v27  }
 0x41c   : > { %2147 = vperm.xlu1 %4076, %v5764_v17  }
 0x41d   : > { %2324 = vperm.xlu0 %4078, %v5764_v17  }
 0x420   : > { %2157 = vperm.xlu1 %4076, %v7187_v40  }
 0x421   : > { %2332 = vperm.xlu0 %4078, %v7187_v40  }
 0x424   : > { %2167 = vperm.xlu1 %4076, %v7188_v42  }
 0x425   : > { %2340 = vperm.xlu0 %4078, %v7188_v42  }
 0x428   : > { %2177 = vperm.xlu1 %4076, %v7189_v47  }
 0x429   : > { %2348 = vperm.xlu0 %4078, %v7189_v47  }
 0x42c   : > { %2187 = vperm.xlu1 %4076, %v5774_v61  }
 0x42d   : > { %2356 = vperm.xlu0 %4078, %v5774_v61  }
 0x430   : > { %4079 = vset.pattern.permute.xlu1 %v4170_v26 }
 0x431   : > { %4081 = vset.pattern.permute.xlu0 %v4171_v10  ;;  %2236 = vperm.xlu1 %4079, %v7190_v63  }
 0x432   : > { %2437 = vperm.xlu0 %4081, %v7190_v63  }
 0x435   : > { %2240 = vperm.xlu1 %4079, %v7191_v18  }
 0x436   : > { %2449 = vperm.xlu0 %4081, %v7192_v36  }
 0x439   : > { %2248 = vperm.xlu1 %4079, %v7192_v36  }
 0x43a   : > { %2457 = vperm.xlu0 %4081, %v5663_v57  }
 0x43b   : > { %v5788_v33 = vpop.permute.xlu0 %2062 }
 0x43d   : > { %2256 = vperm.xlu1 %4079, %v5663_v57  }
 0x43e   : > { %2465 = vperm.xlu0 %4081, %v4966_v21  }
 0x43f   : > { %v5792_v62 = vpop.permute.xlu0 %2072 }
 0x441   : > { %2264 = vperm.xlu1 %4079, %v4966_v21  }
 0x442   : > { %2473 = vperm.xlu0 %4081, %v5206_v45  }
 0x443   : > { %v5796_v3 = vpop.permute.xlu0 %2082 }
 0x445   : > { %2272 = vperm.xlu1 %4079, %v5206_v45  }
 0x446   : > { %2481 = vperm.xlu0 %4081, %v5444_v32  }
 0x447   : > { %v5800_v11 = vpop.permute.xlu0 %2092 }
 0x449   : > { %2280 = vperm.xlu1 %4079, %v5444_v32  }
 0x44a   : > { %2489 = vperm.xlu0 %4081, %v5675_v4  }
 0x44b   : > { %v5804_v29 = vpop.permute.xlu0 %2102 }
 0x44d   : > { %2288 = vperm.xlu1 %4079, %v5675_v4  }
 0x44e   : > { %2497 = vperm.xlu0 %4081, %v4968_v2  }
 0x44f   : > { %v5808_v22 = vpop.permute.xlu0 %2112 }
 0x451   : > { %2296 = vperm.xlu1 %4079, %v4968_v2  }
 0x452   : > { %2505 = vperm.xlu0 %4081, %v5208_v25  }
 0x453   : > { %v5812_v23 = vpop.permute.xlu0 %2122 }
 0x455   : > { %2304 = vperm.xlu1 %4079, %v5208_v25  }
 0x456   : > { %2513 = vperm.xlu0 %4081, %v5446_v52  }
 0x457   : > { %v5816_v12 = vpop.permute.xlu0 %2132 }
 0x459   : > { %2312 = vperm.xlu1 %4079, %v5446_v52  }
 0x45a   : > { %2521 = vperm.xlu0 %4081, %v5687_v8  }
 0x45b   : > { %v5820_v51 = vpop.permute.xlu0 %2142 }
 0x45d   : > { %2320 = vperm.xlu1 %4079, %v5687_v8  }
 0x45e   : > { %2529 = vperm.xlu0 %4081, %v4976_v48  }
 0x45f   : > { %v5824_v28 = vpop.permute.xlu0 %2152 }
 0x460   : > { %7193 = vst [vmem:[#allocation13_spill] sm:$0xff] %v5824_v28 }
 0x461   : > { %2328 = vperm.xlu1 %4079, %v4976_v48  }
 0x462   : > { %2537 = vperm.xlu0 %4081, %v5216_v34  }
 0x463   : > { %v5828_v44 = vpop.permute.xlu0 %2162 }
 0x464   : > { %7194 = vst [vmem:[#allocation35_spill] sm:$0xff] %v5828_v44 }
 0x465   : > { %2336 = vperm.xlu1 %4079, %v5216_v34  }
 0x466   : > { %2545 = vperm.xlu0 %4081, %v5454_v59  }
 0x467   : > { %v5834_v26 = vpop.permute.xlu0 %2172 }
 0x468   : > { %7195 = vst [vmem:[#allocation37_spill] sm:$0xff] %v5834_v26 }
 0x469   : > { %2344 = vperm.xlu1 %4079, %v5454_v59  }
 0x46a   : > { %2553 = vperm.xlu0 %4081, %v5715_v24  }
 0x46b   : > { %v5840_v30 = vpop.permute.xlu0 %2182 }
 0x46c   : > { %7196 = vst [vmem:[#allocation27_spill] sm:$0xff] %v5840_v30 }
 0x46d   : > { %2352 = vperm.xlu1 %4079, %v5715_v24  }
 0x46e   : > { %4082 = vset.pattern.permute.xlu0 %v7003_v35 }
 0x46f   : > { %2634 = vperm.xlu0 %4082, %v5579_v20  }
 0x470   : > { %v5845_v15 = vpop.permute.xlu0 %2232 }
 0x471   : > { %7197 = vst [vmem:[#allocation12_spill] sm:$0xff] %v5845_v15  ;;  %4080 = vset.pattern.permute.xlu1 %v4171_v10 }
 0x472   : > { %2433 = vperm.xlu1 %4080, %v5579_v20  }
 0x473   : > { %2646 = vperm.xlu0 %4082, %v5593_v56  }
 0x474   : > { %v5851_v1 = vpop.permute.xlu0 %2244 }
 0x476   : > { %2441 = vperm.xlu1 %4080, %v7191_v18  }
 0x477   : > { %2654 = vperm.xlu0 %4082, %v5598_v43  }
 0x478   : > { %v5857_v9 = vpop.permute.xlu0 %2252 }
 0x47a   : > { %2445 = vperm.xlu1 %4080, %v5593_v56  }
 0x47b   : > { %2662 = vperm.xlu0 %4082, %v5742_v58   ;;  %v5861_v60 = vpop.permute.xlu1 %2067 }
 0x47c   : > { %v5863_v39 = vpop.permute.xlu0 %2260 }
 0x47e   : > { %2453 = vperm.xlu1 %4080, %v5598_v43  }
 0x47f   : > { %2670 = vperm.xlu0 %4082, %v5090_v53   ;;  %v5867_v20 = vpop.permute.xlu1 %2077 }
 0x480   : > { %7198 = vst [vmem:[#allocation31_spill] sm:$0xff] %v5867_v20  ;;  %v5869_v38 = vpop.permute.xlu0 %2268 }
 0x481   : > { %7199 = vst [vmem:[#allocation14_spill] sm:$0xff] %v5869_v38 }
 0x482   : > { %2461 = vperm.xlu1 %4080, %v5742_v58  }
 0x483   : > { %2678 = vperm.xlu0 %4082, %v5347_v5   ;;  %v5873_v0 = vpop.permute.xlu1 %2087 }
 0x484   : > { %v5875_v56 = vpop.permute.xlu0 %2276 }
 0x486   : > { %2469 = vperm.xlu1 %4080, %v5090_v53  }
 0x487   : > { %2686 = vperm.xlu0 %4082, %v5569_v54   ;;  %v5879_v19 = vpop.permute.xlu1 %2097 }
 0x488   : > { %7200 = vst [vmem:[#allocation39_spill] sm:$0xff] %v5879_v19  ;;  %v5881_v43 = vpop.permute.xlu0 %2284 }
 0x489   : > { %7201 = vst [vmem:[#allocation41_spill] sm:$0xff] %v5881_v43 }
 0x48a   : > { %2477 = vperm.xlu1 %4080, %v5347_v5  }
 0x48b   : > { %2694 = vperm.xlu0 %4082, %v5752_v55   ;;  %v5885_v16 = vpop.permute.xlu1 %2107 }
 0x48c   : > { %v5887_v58 = vpop.permute.xlu0 %2292 }
 0x48e   : > { %2485 = vperm.xlu1 %4080, %v5569_v54  }
 0x48f   : > { %2702 = vperm.xlu0 %4082, %v5092_v6   ;;  %v5891_v10 = vpop.permute.xlu1 %2117 }
 0x490   : > { %7202 = vst [vmem:[#allocation49_spill] sm:$0xff] %v5891_v10  ;;  %v5893_v53 = vpop.permute.xlu0 %2300 }
 0x491   : > { %7203 = vst [vmem:[#allocation45_spill] sm:$0xff] %v5893_v53 }
 0x492   : > { %2493 = vperm.xlu1 %4080, %v5752_v55  }
 0x493   : > { %2710 = vperm.xlu0 %4082, %v5354_v13   ;;  %v5897_v35 = vpop.permute.xlu1 %2127 }
 0x494   : > { %v5899_v5 = vpop.permute.xlu0 %2308 }
 0x496   : > { %2501 = vperm.xlu1 %4080, %v5092_v6  }
 0x497   : > { %2718 = vperm.xlu0 %4082, %v5571_v27   ;;  %v5903_v41 = vpop.permute.xlu1 %2137 }
 0x498   : > { %v5905_v54 = vpop.permute.xlu0 %2316 }
 0x49a   : > { %2509 = vperm.xlu1 %4080, %v5354_v13  }
 0x49b   : > { %2730 = vperm.xlu0 %4082, %v4976_v48   ;;  %v5909_v30 = vpop.permute.xlu1 %2147 }
 0x49c   : > { %v5911_v55 = vpop.permute.xlu0 %2324 }
 0x49e   : > { %2517 = vperm.xlu1 %4080, %v5571_v27  }
 0x49f   : > { %2746 = vperm.xlu0 %4082, %v5454_v59   ;;  %v5915_v26 = vpop.permute.xlu1 %2157 }
 0x4a0   : > { %7204 = vst [vmem:[#allocation15_spill] sm:$0xff] %v5915_v26  ;;  %v5917_v6 = vpop.permute.xlu0 %2332 }
 0x4a1   : > { %7205 = vst [vmem:[#allocation17_spill] sm:$0xff] %v5917_v6 }
 0x4a2   : > { %2525 = vperm.xlu1 %4080, %v5764_v17  }
 0x4a3   : > { %2726 = vperm.xlu0 %4082, %v5764_v17   ;;  %v5921_v53 = vpop.permute.xlu1 %2167 }
 0x4a4   : > { %v5923_v13 = vpop.permute.xlu0 %2340 }
 0x4a6   : > { %2533 = vperm.xlu1 %4080, %v7187_v40  }
 0x4a7   : > { %2742 = vperm.xlu0 %4082, %v7188_v42   ;;  %v5927_v48 = vpop.permute.xlu1 %2177 }
 0x4a8   : > { %7206 = vst [vmem:[#allocation51_spill] sm:$0xff] %v5927_v48  ;;  %v5929_v27 = vpop.permute.xlu0 %2348 }
 0x4a9   : > { %7207 = vst [vmem:[#allocation53_spill] sm:$0xff] %v5929_v27  ;;  %v7212_v27 = vmov 3  }
 0x4aa   : > { %2541 = vperm.xlu1 %4080, %v7188_v42  }
 0x4ab   : > { %2758 = vperm.xlu0 %4082, %v5774_v61   ;;  %v5933_v59 = vpop.permute.xlu1 %2187 }
 0x4ac   : > { %v5935_v6 = vpop.permute.xlu0 %2356 }
 0x4ae   : > { %2549 = vperm.xlu1 %4080, %v7189_v47  }
 0x4b0   : > { %v5938_v17 = vpop.permute.xlu1 %2236 }
 0x4b1   : > { %7208 = vst [vmem:[#allocation43_spill] sm:$0xff] %v5938_v17  ;;  %v5940_v26 = vpop.permute.xlu0 %2437 }
 0x4b2   : > { %7209 = vst [vmem:[#allocation16_spill] sm:$0xff] %v5940_v26  ;;  %2557 = vperm.xlu1 %4080, %v5774_v61  }
 0x4b4   : > { %v5943_v10 = vpop.permute.xlu1 %2240 }
 0x4b5   : > { %7210 = vst [vmem:[#allocation47_spill] sm:$0xff] %v5943_v10  ;;  %v5945_v48 = vpop.permute.xlu0 %2449 }
 0x4b6   : > { %7211 = vst [vmem:[#allocation18_spill] sm:$0xff] %v5945_v48  ;;  %4083 = vset.pattern.permute.xlu1 %v7212_v27  ;;  %v6067_v48 = vld [vmem:[%s6920_s3 + $0x28] sm:$0xff] }
 0x4b7   : > { %2638 = vperm.xlu1 %4083, %v7190_v63   ;;  %7250 = vst [vmem:[#allocation67_spill] sm:$0xff] %v6067_v48 }
 0x4b8   : > { %v5949_v42 = vpop.permute.xlu1 %2248 }
 0x4b9   : > { %7213 = vst [vmem:[#allocation55_spill] sm:$0xff] %v5949_v42  ;;  %v5951_v43 = vpop.permute.xlu0 %2457 }
 0x4ba   : > { %7214 = vst [vmem:[#allocation57_spill] sm:$0xff] %v5951_v43 }
 0x4bb   : > { %2642 = vperm.xlu1 %4083, %v7191_v18  }
 0x4bc   : > { %v5954_v19 = vpop.permute.xlu1 %2256 }
 0x4bd   : > { %7215 = vst [vmem:[#allocation61_spill] sm:$0xff] %v5954_v19  ;;  %v5956_v38 = vpop.permute.xlu0 %2465  ;;  %v2195_v19 = vmul.f32 %v5854_v49, %v6067_v48 }
 0x4be   : > { %7216 = vst [vmem:[#allocation19_spill] sm:$0xff] %v5956_v38 }
 0x4bf   : > { %2650 = vperm.xlu1 %4083, %v7192_v36  }
 0x4c0   : > { %v5959_v61 = vpop.permute.xlu1 %2264 }
 0x4c1   : > { %7217 = vst [vmem:[#allocation59_spill] sm:$0xff] %v5959_v61  ;;  %v5961_v10 = vpop.permute.xlu0 %2473  ;;  %v6075_v61 = vld [vmem:[%s6920_s3 + $0xa8] sm:$0xff] }
 0x4c2   : > { %7218 = vst [vmem:[#allocation21_spill] sm:$0xff] %v5961_v10 }
 0x4c3   : > { %2658 = vperm.xlu1 %4083, %v5663_v57  }
 0x4c4   : > { %v5964_v27 = vpop.permute.xlu1 %2272 }
 0x4c5   : > { %7219 = vst [vmem:[#allocation58_spill] sm:$0xff] %v5964_v27  ;;  %v5966_v63 = vpop.permute.xlu0 %2481 }
 0x4c6   : > { %7220 = vst [vmem:[#allocation20_spill] sm:$0xff] %v5966_v63 }
 0x4c7   : > { %2666 = vperm.xlu1 %4083, %v4966_v21  }
 0x4c8   : > { %v5969_v43 = vpop.permute.xlu1 %2280 }
 0x4c9   : > { %7221 = vst [vmem:[#allocation60_spill] sm:$0xff] %v5969_v43  ;;  %v5971_v18 = vpop.permute.xlu0 %2489 }
 0x4ca   : > { %7222 = vst [vmem:[#allocation22_spill] sm:$0xff] %v5971_v18 }
 0x4cb   : > { %2674 = vperm.xlu1 %4083, %v5206_v45  }
 0x4cc   : > { %v5974_v38 = vpop.permute.xlu1 %2288 }
 0x4cd   : > { %7223 = vst [vmem:[#allocation24_spill] sm:$0xff] %v5974_v38  ;;  %v5976_v36 = vpop.permute.xlu0 %2497 }
 0x4ce   : > { %7224 = vst [vmem:[#allocation28_spill] sm:$0xff] %v5976_v36 }
 0x4cf   : > { %2682 = vperm.xlu1 %4083, %v5444_v32  }
 0x4d0   : > { %v5979_v10 = vpop.permute.xlu1 %2296 }
 0x4d1   : > { %7225 = vst [vmem:[#allocation26_spill] sm:$0xff] %v5979_v10  ;;  %v5981_v57 = vpop.permute.xlu0 %2505 }
 0x4d2   : > { %7226 = vst [vmem:[#allocation30_spill] sm:$0xff] %v5981_v57 }
 0x4d3   : > { %2690 = vperm.xlu1 %4083, %v5675_v4  }
 0x4d4   : > { %v5984_v63 = vpop.permute.xlu1 %2304 }
 0x4d5   : > { %7227 = vst [vmem:[#allocation34_spill] sm:$0xff] %v5984_v63  ;;  %v5986_v21 = vpop.permute.xlu0 %2513  ;;  %v3993_v63 = vld [vmem:[%s6920_s3 + $0x58] sm:$0xff] }
 0x4d6   : > { %7228 = vst [vmem:[#allocation32_spill] sm:$0xff] %v5986_v21  ;;  %v2378_v27 = vmul.f32 %v3993_v63, %v5899_v5 }
 0x4d7   : > { %2698 = vperm.xlu1 %4083, %v4968_v2  }
 0x4d8   : > { %v5989_v18 = vpop.permute.xlu1 %2312 }
 0x4d9   : > { %7229 = vst [vmem:[#allocation36_spill] sm:$0xff] %v5989_v18  ;;  %v5991_v45 = vpop.permute.xlu0 %2521 }
 0x4da   : > { %7230 = vst [vmem:[#allocation40_spill] sm:$0xff] %v5991_v45 }
 0x4db   : > { %2706 = vperm.xlu1 %4083, %v5208_v25  }
 0x4dc   : > { %v5994_v36 = vpop.permute.xlu1 %2320 }
 0x4dd   : > { %7231 = vst [vmem:[#allocation38_spill] sm:$0xff] %v5994_v36  ;;  %v5996_v32 = vpop.permute.xlu0 %2529 }
 0x4de   : > { %7232 = vst [vmem:[#allocation42_spill] sm:$0xff] %v5996_v32 }
 0x4df   : > { %2714 = vperm.xlu1 %4083, %v5446_v52  }
 0x4e0   : > { %v5999_v57 = vpop.permute.xlu1 %2328 }
 0x4e1   : > { %7233 = vst [vmem:[#allocation44_spill] sm:$0xff] %v5999_v57  ;;  %v6001_v4 = vpop.permute.xlu0 %2537 }
 0x4e2   : > { %7234 = vst [vmem:[#allocation46_spill] sm:$0xff] %v6001_v4 }
 0x4e3   : > { %2722 = vperm.xlu1 %4083, %v5687_v8  }
 0x4e4   : > { %v6004_v21 = vpop.permute.xlu1 %2336 }
 0x4e5   : > { %7235 = vst [vmem:[#allocation50_spill] sm:$0xff] %v6004_v21  ;;  %v6006_v2 = vpop.permute.xlu0 %2545 }
 0x4e6   : > { %7236 = vst [vmem:[#allocation48_spill] sm:$0xff] %v6006_v2 }
 0x4e7   : > { %2738 = vperm.xlu1 %4083, %v5216_v34  }
 0x4e8   : > { %v6009_v45 = vpop.permute.xlu1 %2344 }
 0x4e9   : > { %7237 = vst [vmem:[#allocation52_spill] sm:$0xff] %v6009_v45  ;;  %v6011_v25 = vpop.permute.xlu0 %2553 }
 0x4ea   : > { %7238 = vst [vmem:[#allocation54_spill] sm:$0xff] %v6011_v25 }
 0x4eb   : > { %2754 = vperm.xlu1 %4083, %v5715_v24  }
 0x4ec   : > { %v6014_v32 = vpop.permute.xlu1 %2352 }
 0x4ed   : > { %7239 = vst [vmem:[#allocation56_spill] sm:$0xff] %v6014_v32 }
 0x4ee   : > { %v6016_v52 = vpop.permute.xlu0 %2634 }
 0x4ef   : > { %7240 = vst [vmem:[#allocation23_spill] sm:$0xff] %v6016_v52  ;;  %2734 = vperm.xlu1 %4083, %v7187_v40  }
 0x4f1   : > { %v6019_v4 = vpop.permute.xlu1 %2433 }
 0x4f2   : > { %7241 = vst [vmem:[#allocation10_spill] sm:$0xff] %v6019_v4  ;;  %v2647_v8 = vpop.permute.xlu0 %2646 }
 0x4f3   : > { %2750 = vperm.xlu1 %4083, %v7189_v47  }
 0x4f5   : > { %v6022_v2 = vpop.permute.xlu1 %2441 }
 0x4f6   : > { %7242 = vst [vmem:[#allocation11_spill] sm:$0xff] %v6022_v2  ;;  %v2655_v34 = vpop.permute.xlu0 %2654 }
 0x4f9   : > { %v2446_v21 = vpop.permute.xlu1 %2445 }
 0x4fa   : > { %v6024_v45 = vpop.permute.xlu0 %2662 }
 0x4fd   : > { %v2454_v25 = vpop.permute.xlu1 %2453 }
 0x4fe   : > { %v6026_v36 = vpop.permute.xlu0 %2670 }
 0x4ff   : > { %7243 = vst [vmem:[#allocation25_spill] sm:$0xff] %v6026_v36 }
 0x501   : > { %v6028_v24 = vpop.permute.xlu1 %2461 }
 0x502   : > { %v6030_v32 = vpop.permute.xlu0 %2678 }
 0x505   : > { %v6032_v52 = vpop.permute.xlu1 %2469 }
 0x506   : > { %7244 = vst [vmem:[#allocation29_spill] sm:$0xff] %v6032_v52  ;;  %v6034_v40 = vpop.permute.xlu0 %2686  ;;  %v2025_v52 = vld [vmem:[%s6920_s3 + $0x18] sm:$0xff] }
 0x507   : > { %7245 = vst [vmem:[#allocation33_spill] sm:$0xff] %v6034_v40  ;;  %v6053_v40 = vld [vmem:[%s6920_s3 + $0x98] sm:$0xff]  ;;  %v2193_v57 = vmul.f32 %v5847_v46, %v2025_v52  ;;  %v2209_v43 = vmul.f32 %v5897_v35, %v2025_v52  ;;  %v2211_v35 = vmul.f32 %v5903_v41, %v6067_v48  ;;  %v6095_v41 = vld [vmem:[%s6920_s3 + $0xe8] sm:$0xff] }
 0x508   : > { %7251 = vst [vmem:[#allocation68_spill] sm:$0xff] %v6095_v41 }
 0x509   : > { %v2478_v4 = vpop.permute.xlu1 %2477  ;;  %v2410_v17 = vadd.f32 %v2378_v27, %v2209_v43 }
 0x50a   : > { %v6036_v18 = vpop.permute.xlu0 %2694 }
 0x50d   : > { %v6038_v47 = vpop.permute.xlu1 %2485 }
 0x50e   : > { %7246 = vst [vmem:[#allocation63_spill] sm:$0xff] %v6038_v47  ;;  %v6040_v2 = vpop.permute.xlu0 %2702  ;;  %v2362_v47 = vmul.f32 %v3993_v63, %v5851_v1  ;;  %v2563_v1 = vmul.f32 %v6053_v40, %v2446_v21  ;;  %v4009_v21 = vld [vmem:[%s6920_s3 + $0xd8] sm:$0xff] }
 0x50f   : > { %7247 = vst [vmem:[#allocation64_spill] sm:$0xff] %v6040_v2  ;;  %v6059_v2 = vld [vmem:[%s6920_s3 + $0x68] sm:$0xff]  ;;  %v2764_v15 = vmul.f32 %v4009_v21, %v2647_v8 }
 0x510   : > { %7248 = vst [vmem:[#allocation65_spill] sm:$0xff] %v6059_v2  ;;  %v2364_v46 = vmul.f32 %v6059_v2, %v5857_v9  ;;  %v2380_v5 = vmul.f32 %v6059_v2, %v5905_v54 }
 0x511   : > { %v6045_v36 = vpop.permute.xlu1 %2493 }
 0x512   : > { %v2711_v10 = vpop.permute.xlu0 %2710  ;;  %v2396_v49 = vadd.f32 %v2364_v46, %v2195_v19  ;;  %v2412_v48 = vadd.f32 %v2380_v5, %v2211_v35  ;;  %v2766_v19 = vmul.f32 %v6095_v41, %v2655_v34  ;;  %v2571_v5 = vmul.f32 %v6053_v40, %v2478_v4  ;;  %v7277_v34 = vld [vmem:[#allocation53_spill] sm:$0xff] }
 0x513   : > { %v2780_v54 = vmul.f32 %v4009_v21, %v2711_v10 }
 0x515   : > { %v6061_v38 = vpop.permute.xlu1 %2501 }
 0x516   : > { %7249 = vst [vmem:[#allocation66_spill] sm:$0xff] %v6061_v38  ;;  %v2719_v26 = vpop.permute.xlu0 %2718  ;;  %v2394_v38 = vadd.f32 %v2362_v47, %v2193_v57  ;;  %v2565_v57 = vmul.f32 %v6075_v61, %v2454_v25 }
 0x517   : > { %v2782_v25 = vmul.f32 %v6095_v41, %v2719_v26  ;;  %v7304_v41 = vld [vmem:[#allocation30_spill] sm:$0xff] }
 0x518   : > { %v2595_v20 = vadd.f32 %v2563_v1, %v2394_v38  ;;  %v2597_v38 = vadd.f32 %v2565_v57, %v2396_v49 }
 0x519   : > { %v2510_v42 = vpop.permute.xlu1 %2509 }
 0x51a   : > { %v2579_v9 = vmul.f32 %v6053_v40, %v2510_v42  ;;  %v6090_v47 = vpop.permute.xlu0 %2730  ;;  %v6097_v28 = vadd.f32 %v2764_v15, %v2595_v20  ;;  %v6106_v46 = vadd.f32 %v2766_v19, %v2597_v38 }
 0x51c   : > { %v2611_v2 = vadd.f32 %v2579_v9, %v2410_v17  ;;  %7252 = vst [vmem:[#allocation69_spill] sm:$0xff] %v6106_v46 }
 0x51d   : > { %v2518_v44 = vpop.permute.xlu1 %2517 }
 0x51e   : > { %v2812_v43 = vadd.f32 %v2780_v54, %v2611_v2  ;;  %v2581_v27 = vmul.f32 %v6075_v61, %v2518_v44  ;;  %v6100_v42 = vpop.permute.xlu0 %2746  ;;  %v2201_v2 = vmul.f32 %v5873_v0, %v2025_v52  ;;  %v2370_v44 = vmul.f32 %v3993_v63, %v5875_v56  ;;  %v4005_v54 = vld [vmem:[%s6920_s3 + $0xb8] sm:$0xff] }
 0x51f   : > { %v2217_v0 = vmul.f32 %v5921_v53, %v2025_v52  ;;  %v2386_v56 = vmul.f32 %v3993_v63, %v5923_v13 }
 0x520   : > { %v3029_v8 = vcombine.low %v6097_v28, %v2812_v43  ;;  %v3030_v1 = vcombine.high %v6097_v28, %v2812_v43  ;;  %v2613_v10 = vadd.f32 %v2581_v27, %v2412_v48  ;;  %v2029_v28 = vld [vmem:[%s6920_s3 + $0x38] sm:$0xff]  ;;  %v2402_v49 = vadd.f32 %v2370_v44, %v2201_v2 }
 0x521   : > { %v2526_v17 = vpop.permute.xlu1 %2525  ;;  %v3997_v48 = vld [vmem:[%s6920_s3 + $0x78] sm:$0xff]  ;;  %v2213_v57 = vmul.f32 %v5909_v30, %v2029_v28  ;;  %v2197_v38 = vmul.f32 %v5861_v60, %v2029_v28  ;;  %v2205_v27 = vmul.f32 %v5885_v16, %v2029_v28  ;;  %v2418_v13 = vadd.f32 %v2386_v56, %v2217_v0 }
 0x522   : > { %v6108_v15 = vadd.f32 %v2782_v25, %v2613_v10  ;;  %v2727_v20 = vpop.permute.xlu0 %2726  ;;  %v2382_v9 = vmul.f32 %v3997_v48, %v5911_v55  ;;  %v2366_v43 = vmul.f32 %v3997_v48, %v5863_v39  ;;  %v2603_v63 = vadd.f32 %v2571_v5, %v2402_v49 }
 0x523   : > { %v2583_v4 = vmul.f32 %v4005_v54, %v2526_v17  ;;  %v2374_v55 = vmul.f32 %v3997_v48, %v5887_v58  ;;  %v2221_v25 = vmul.f32 %v5933_v59, %v2029_v28  ;;  %v2567_v10 = vmul.f32 %v4005_v54, %v6028_v24  ;;  %v4013_v17 = vld [vmem:[%s6920_s3 + $0xf8] sm:$0xff] }
 0x524   : > { %7253 = vst [vmem:[#allocation70_spill] sm:$0xff] %v6108_v15  ;;  %v2414_v19 = vadd.f32 %v2382_v9, %v2213_v57  ;;  %v2390_v60 = vmul.f32 %v3997_v48, %v5935_v6  ;;  %v2772_v39 = vmul.f32 %v4009_v21, %v6030_v32  ;;  %v2398_v44 = vadd.f32 %v2366_v43, %v2197_v38 }
 0x525   : > { %v6116_v35 = vpop.permute.xlu1 %2533  ;;  %v2784_v59 = vmul.f32 %v4013_v17, %v2727_v20  ;;  %v2406_v24 = vadd.f32 %v2374_v55, %v2205_v27  ;;  %v2768_v57 = vmul.f32 %v4013_v17, %v6024_v45  ;;  %v6149_v49 = vrot.slane %v3029_v8, %v4866_v14 }
 0x526   : > { %v2743_v53 = vpop.permute.xlu0 %2742  ;;  %v2804_v58 = vadd.f32 %v2772_v39, %v2603_v63  ;;  %v2615_v56 = vadd.f32 %v2583_v4, %v2414_v19  ;;  %v2599_v5 = vadd.f32 %v2567_v10, %v2398_v44  ;;  %v2422_v6 = vadd.f32 %v2390_v60, %v2221_v25  ;;  %v6277_v4 = vld [vmem:[%s6920_s3 + $0x50] sm:$0xff] }
 0x527   : > { %v2788_v2 = vmul.f32 %v4009_v21, %v2743_v53  ;;  %7254 = vst [vmem:[#allocation71_spill] sm:$0xff] %v6149_v49 }
 0x528   : > { %v2816_v43 = vadd.f32 %v2784_v59, %v2615_v56  ;;  %v7271_v59 = vld [vmem:[#allocation65_spill] sm:$0xff]  ;;  %v6272_v56 = vld [vmem:[%s6920_s3 + $0x88] sm:$0xff] }
 0x529   : > { %v2542_v52 = vpop.permute.xlu1 %2541 }
 0x52a   : > { %v2587_v30 = vmul.f32 %v6053_v40, %v2542_v52  ;;  %v2575_v40 = vmul.f32 %v4005_v54, %v6045_v36  ;;  %v2759_v21 = vpop.permute.xlu0 %2758  ;;  %v6152_v36 = vrot.slane %v3030_v1, %v4866_v14  ;;  %v2800_v52 = vadd.f32 %v2768_v57, %v2599_v5  ;;  %v2022_v5 = vld [vmem:[%s6920_s3] sm:$0xff] }
 0x52b   : > { %v2792_v45 = vmul.f32 %v4013_v17, %v2759_v21  ;;  %v7274_v1 = vld [vmem:[#allocation15_spill] sm:$0xff] }
 0x52c   : > { %v2619_v16 = vadd.f32 %v2587_v30, %v2418_v13  ;;  %v2607_v9 = vadd.f32 %v2575_v40, %v2406_v24  ;;  %7255 = vst [vmem:[#allocation72_spill] sm:$0xff] %v6152_v36  ;;  %v2776_v13 = vmul.f32 %v4013_v17, %v6036_v18  ;;  %v3301_v19 = vcombine.low %v2800_v52, %v2816_v43  ;;  %v2026_v24 = vld [vmem:[%s6920_s3 + $0x20] sm:$0xff]  ;;  %v7272_v30 = vld [vmem:[#allocation49_spill] sm:$0xff] }
 0x52d   : > { %v6145_v0 = vpop.permute.xlu1 %2549  ;;  %v2194_v57 = vmul.f32 %v5784_v31, %v2026_v24  ;;  %v6227_v31 = vmul.f32 %v5808_v22, %v2022_v5  ;;  %v7263_v22 = vld [vmem:[#allocation35_spill] sm:$0xff]  ;;  %v7279_v36 = vld [vmem:[#allocation61_spill] sm:$0xff] }
 0x52e   : > { %v2820_v28 = vadd.f32 %v2788_v2, %v2619_v16  ;;  %v2808_v55 = vadd.f32 %v2776_v13, %v2607_v9  ;;  %v6172_v39 = vrot.slane %v3301_v19, %v4866_v14  ;;  %v2190_v9 = vmul.f32 %v5830_v37, %v2022_v5 }
 0x530   : > { %v3045_v48 = vcombine.low %v2804_v58, %v2820_v28  ;;  %v3046_v32 = vcombine.high %v2804_v58, %v2820_v28  ;;  %7258 = vst [vmem:[#allocation75_spill] sm:$0xff] %v6172_v39  ;;  %v2023_v28 = vld [vmem:[%s6920_s3 + $0x8] sm:$0xff]  ;;  %v7273_v58 = vld [vmem:[#allocation45_spill] sm:$0xff]  ;;  %v7280_v39 = vld [vmem:[#allocation59_spill] sm:$0xff] }
 0x531   : > { %v2558_v38 = vpop.permute.xlu1 %2557  ;;  %v2191_v21 = vmul.f32 %v5778_v7, %v2023_v28  ;;  %v2215_v40 = vmul.f32 %v7274_v1, %v2023_v28  ;;  %v7281_v1 = vld [vmem:[#allocation16_spill] sm:$0xff] }
 0x532   : > { %v6155_v20 = vrot.slane %v3045_v48, %v4866_v14  ;;  %v6158_v27 = vrot.slane %v3046_v32, %v4866_v14  ;;  %v2591_v53 = vmul.f32 %v4005_v54, %v2558_v38  ;;  %v3302_v54 = vcombine.high %v2800_v52, %v2816_v43  ;;  %v2028_v48 = vld [vmem:[%s6920_s3 + $0x30] sm:$0xff]  ;;  %v6219_v52 = vld [vmem:[%s6920_s3 + $0x40] sm:$0xff] }
 0x533   : > { %v2196_v43 = vmul.f32 %v5788_v33, %v2028_v48  ;;  %v6224_v7 = vmul.f32 %v5804_v29, %v2028_v48  ;;  %v3991_v33 = vld [vmem:[%s6920_s3 + $0x48] sm:$0xff] }
 0x534   : > { %7256 = vst [vmem:[#allocation73_spill] sm:$0xff] %v6155_v20  ;;  %7257 = vst [vmem:[#allocation74_spill] sm:$0xff] %v6158_v27  ;;  %v2623_v63 = vadd.f32 %v2591_v53, %v2422_v6  ;;  %v6175_v2 = vrot.slane %v3302_v54, %v4866_v14  ;;  %v2024_v6 = vld [vmem:[%s6920_s3 + $0x10] sm:$0xff]  ;;  %v2198_v53 = vmul.f32 %v5792_v62, %v2022_v5  ;;  %v7265_v54 = vld [vmem:[#allocation31_spill] sm:$0xff] }
 0x535   : > { %v2192_v38 = vmul.f32 %v5838_v50, %v2024_v6  ;;  %v2200_v13 = vmul.f32 %v5796_v3, %v2024_v6  ;;  %v6235_v37 = vmul.f32 %v5812_v23, %v2024_v6  ;;  %v6238_v50 = vmul.f32 %v5816_v12, %v2026_v24  ;;  %v6256_v12 = vld [vmem:[%s6920_s3 + $0x60] sm:$0xff] }
 0x536   : > { %v2824_v25 = vadd.f32 %v2792_v45, %v2623_v63  ;;  %v6169_v10 = vpop.permute.xlu1 %2638  ;;  %7259 = vst [vmem:[#allocation76_spill] sm:$0xff] %v6175_v2  ;;  %v2202_v45 = vmul.f32 %v5800_v11, %v2026_v24  ;;  %v6241_v3 = vmul.f32 %v5820_v51, %v2028_v48  ;;  %v7262_v11 = vld [vmem:[#allocation13_spill] sm:$0xff]  ;;  %v6247_v63 = vmul.f32 %v7263_v22, %v2024_v6  ;;  %v7268_v6 = vld [vmem:[#allocation67_spill] sm:$0xff] }
 0x537   : > { %v6244_v29 = vmul.f32 %v7262_v11, %v2022_v5  ;;  %v6261_v51 = vld [vmem:[%s6920_s3 + $0x70] sm:$0xff]  ;;  %v7269_v11 = vld [vmem:[#allocation39_spill] sm:$0xff] }
 0x538   : > { %v3317_v18 = vcombine.low %v2808_v55, %v2824_v25  ;;  %v3318_v60 = vcombine.high %v2808_v55, %v2824_v25  ;;  %v7264_v55 = vld [vmem:[#allocation12_spill] sm:$0xff]  ;;  %v2199_v25 = vmul.f32 %v7265_v54, %v2023_v28  ;;  %v2203_v22 = vmul.f32 %v7269_v11, %v7268_v6  ;;  %v7275_v11 = vld [vmem:[#allocation17_spill] sm:$0xff]  ;;  %v7278_v2 = vld [vmem:[#allocation55_spill] sm:$0xff] }
 0x539   : > { %v2359_v19 = vmul.f32 %v6219_v52, %v7264_v55  ;;  %v7270_v55 = vld [vmem:[#allocation41_spill] sm:$0xff]  ;;  %v2384_v8 = vmul.f32 %v3991_v33, %v7275_v11  ;;  %v2363_v27 = vmul.f32 %v6256_v12, %v7278_v2  ;;  %v7283_v11 = vld [vmem:[#allocation58_spill] sm:$0xff]  ;;  %v7285_v2 = vld [vmem:[#allocation27_spill] sm:$0xff] }
 0x53a   : > { %v6178_v16 = vrot.slane %v3317_v18, %v4866_v14  ;;  %v6181_v44 = vrot.slane %v3318_v60, %v4866_v14  ;;  %v6183_v17 = vpop.permute.xlu1 %2642  ;;  %v7266_v18 = vld [vmem:[#allocation43_spill] sm:$0xff]  ;;  %v7267_v60 = vld [vmem:[#allocation14_spill] sm:$0xff]  ;;  %v2372_v54 = vmul.f32 %v7271_v59, %v7270_v55  ;;  %v6302_v49 = vmul.f32 %v7285_v2, %v2028_v48  ;;  %v7291_v2 = vld [vmem:[#allocation57_spill] sm:$0xff] }
 0x53b   : > { %v2360_v23 = vmul.f32 %v3991_v33, %v7266_v18  ;;  %v2368_v5 = vmul.f32 %v3991_v33, %v7267_v60  ;;  %v2207_v18 = vmul.f32 %v7272_v30, %v2023_v28  ;;  %v2376_v60 = vmul.f32 %v3991_v33, %v7273_v58  ;;  %v7276_v55 = vld [vmem:[#allocation51_spill] sm:$0xff] }
 0x53c   : > { %7260 = vst [vmem:[#allocation77_spill] sm:$0xff] %v6178_v16  ;;  %7261 = vst [vmem:[#allocation78_spill] sm:$0xff] %v6181_v44  ;;  %v2219_v26 = vmul.f32 %v7276_v55, %v7268_v6  ;;  %v2388_v44 = vmul.f32 %v7271_v59, %v7277_v34  ;;  %v2365_v16 = vmul.f32 %v6261_v51, %v7279_v36  ;;  %v7282_v33 = vld [vmem:[#allocation47_spill] sm:$0xff]  ;;  %v7284_v34 = vld [vmem:[#allocation37_spill] sm:$0xff] }
 0x53d   : > { %v2367_v58 = vmul.f32 %v6219_v52, %v7280_v39  ;;  %v2392_v20 = vadd.f32 %v2360_v23, %v2191_v21  ;;  %v2561_v28 = vmul.f32 %v6272_v56, %v7281_v1  ;;  %v2361_v6 = vmul.f32 %v6277_v4, %v7282_v33  ;;  %v6309_v39 = vld [vmem:[%s6920_s3 + $0xa0] sm:$0xff]  ;;  %v7290_v33 = vld [vmem:[#allocation18_spill] sm:$0xff] }
 0x53e   : > { %v6208_v32 = vpop.permute.xlu1 %2650  ;;  %v2369_v55 = vmul.f32 %v6277_v4, %v7283_v11  ;;  %v6299_v59 = vmul.f32 %v7284_v34, %v2026_v24  ;;  %v2391_v36 = vadd.f32 %v2359_v19, %v2190_v9  ;;  %v6304_v15 = vadd.f32 %v2368_v5, %v2199_v25  ;;  %v6320_v24 = vld [vmem:[%s6920_s3 + $0xb0] sm:$0xff]  ;;  %v3998_v48 = vld [vmem:[%s6920_s3 + $0x80] sm:$0xff]  ;;  %v7288_v9 = vld [vmem:[#allocation60_spill] sm:$0xff] }
 0x53f   : > { %v6311_v21 = vadd.f32 %v2372_v54, %v2203_v22  ;;  %v6313_v23 = vadd.f32 %v2376_v60, %v2207_v18  ;;  %v6315_v1 = vadd.f32 %v2384_v8, %v2215_v40  ;;  %v2371_v19 = vmul.f32 %v6256_v12, %v7288_v9  ;;  %v6334_v40 = vld [vmem:[%s6920_s3 + $0x90] sm:$0xff] }
 0x540   : > { %v6329_v5 = vadd.f32 %v2388_v44, %v2219_v26  ;;  %v2395_v22 = vadd.f32 %v2363_v27, %v2194_v57  ;;  %v2397_v54 = vadd.f32 %v2365_v16, %v2196_v43  ;;  %v2399_v8 = vadd.f32 %v2367_v58, %v2198_v53  ;;  %v7292_v44 = vld [vmem:[#allocation19_spill] sm:$0xff]  ;;  %v7293_v16 = vld [vmem:[#allocation44_spill] sm:$0xff]  ;;  %v7294_v43 = vld [vmem:[#allocation21_spill] sm:$0xff] }
 0x541   : > { %7286 = vst [vmem:[#allocation13_spill] sm:$0xff] %v6311_v21  ;;  %7287 = vst [vmem:[#allocation35_spill] sm:$0xff] %v6315_v1  ;;  %v6336_v18 = vadd.f32 %v2561_v28, %v2392_v20  ;;  %v6338_v60 = vadd.f32 %v2361_v6, %v2192_v38  ;;  %v2564_v11 = vmul.f32 %v6309_v39, %v7290_v33  ;;  %v7295_v20 = vld [vmem:[#allocation24_spill] sm:$0xff]  ;;  %v7296_v28 = vld [vmem:[#allocation26_spill] sm:$0xff] }
 0x542   : > { %v6232_v62 = vpop.permute.xlu1 %2658  ;;  %7289 = vst [vmem:[#allocation12_spill] sm:$0xff] %v6329_v5  ;;  %v2401_v34 = vadd.f32 %v2369_v55, %v2200_v13  ;;  %v2566_v26 = vmul.f32 %v6320_v24, %v7291_v2  ;;  %v2568_v27 = vmul.f32 %v3998_v48, %v7292_v44  ;;  %v2383_v57 = vmul.f32 %v6219_v52, %v7293_v16  ;;  %v7297_v13 = vld [vmem:[#allocation34_spill] sm:$0xff]  ;;  %v7298_v16 = vld [vmem:[#allocation20_spill] sm:$0xff] }
 0x543   : > { %v2570_v53 = vmul.f32 %v6334_v40, %v7294_v43  ;;  %v2403_v58 = vadd.f32 %v2371_v19, %v2202_v45  ;;  %v2373_v38 = vmul.f32 %v6261_v51, %v7295_v20  ;;  %v2375_v6 = vmul.f32 %v6219_v52, %v7296_v28  ;;  %v7299_v43 = vld [vmem:[#allocation36_spill] sm:$0xff]  ;;  %v7300_v19 = vld [vmem:[#allocation38_spill] sm:$0xff]  ;;  %v4006_v52 = vld [vmem:[%s6920_s3 + $0xc0] sm:$0xff] }
 0x544   : > { %v2377_v55 = vmul.f32 %v6277_v4, %v7297_v13  ;;  %v6355_v33 = vadd.f32 %v2564_v11, %v2395_v22  ;;  %v6357_v2 = vadd.f32 %v2566_v26, %v2397_v54  ;;  %v2600_v44 = vadd.f32 %v2568_v27, %v2399_v8  ;;  %v7301_v22 = vld [vmem:[#allocation22_spill] sm:$0xff] }
 0x545   : > { %v2572_v46 = vmul.f32 %v6309_v39, %v7298_v16  ;;  %v2379_v45 = vmul.f32 %v6256_v12, %v7299_v43  ;;  %v2381_v20 = vmul.f32 %v6261_v51, %v7300_v19  ;;  %v6368_v28 = vadd.f32 %v2570_v53, %v2401_v34  ;;  %v7302_v11 = vld [vmem:[#allocation10_spill] sm:$0xff]  ;;  %v7303_v16 = vld [vmem:[#allocation28_spill] sm:$0xff] }
 0x546   : > { %v2667_v30 = vpop.permute.xlu1 %2666  ;;  %v2574_v54 = vmul.f32 %v6320_v24, %v7301_v22  ;;  %v2415_v8 = vadd.f32 %v2383_v57, %v6244_v29  ;;  %v2560_v26 = vmul.f32 %v3998_v48, %v7302_v11  ;;  %v2405_v13 = vadd.f32 %v2373_v38, %v6224_v7  ;;  %v7305_v22 = vld [vmem:[#allocation42_spill] sm:$0xff] }
 0x547   : > { %v2769_v27 = vmul.f32 %v4006_v52, %v2667_v30  ;;  %v2576_v43 = vmul.f32 %v3998_v48, %v7303_v16  ;;  %v2407_v19 = vadd.f32 %v2375_v6, %v6227_v31  ;;  %v2604_v5 = vadd.f32 %v2572_v46, %v2403_v58  ;;  %v7306_v57 = vld [vmem:[#allocation50_spill] sm:$0xff]  ;;  %v7307_v31 = vld [vmem:[#allocation52_spill] sm:$0xff] }
 0x548   : > { %v2578_v34 = vmul.f32 %v6334_v40, %v7304_v41  ;;  %v2409_v53 = vadd.f32 %v2377_v55, %v6235_v37  ;;  %v2584_v1 = vmul.f32 %v3998_v48, %v7305_v22  ;;  %v2785_v29 = vmul.f32 %v4006_v52, %v6090_v47  ;;  %v7308_v58 = vld [vmem:[#allocation56_spill] sm:$0xff] }
 0x549   : > { %v2411_v30 = vadd.f32 %v2379_v45, %v6238_v50  ;;  %v2413_v7 = vadd.f32 %v2381_v20, %v6241_v3  ;;  %v2385_v38 = vmul.f32 %v6277_v4, %v7306_v57  ;;  %v2387_v46 = vmul.f32 %v6256_v12, %v7307_v31  ;;  %v7309_v55 = vld [vmem:[#allocation32_spill] sm:$0xff]  ;;  %v7311_v4 = vld [vmem:[#allocation23_spill] sm:$0xff] }
 0x54a   : > { %v6327_v25 = vpop.permute.xlu1 %2674  ;;  %v2389_v6 = vmul.f32 %v6261_v51, %v7308_v58  ;;  %v2592_v41 = vadd.f32 %v2560_v26, %v2391_v36  ;;  %v2616_v11 = vadd.f32 %v2584_v1, %v2415_v8  ;;  %v2801_v37 = vadd.f32 %v2769_v27, %v2600_v44  ;;  %v7310_v47 = vld [vmem:[#allocation40_spill] sm:$0xff]  ;;  %v7316_v58 = vld [vmem:[#allocation29_spill] sm:$0xff] }
 0x54b   : > { %v2580_v48 = vmul.f32 %v6309_v39, %v7309_v55  ;;  %v2582_v50 = vmul.f32 %v6320_v24, %v7310_v47  ;;  %v6396_v45 = vadd.f32 %v2574_v54, %v2405_v13  ;;  %v2608_v3 = vadd.f32 %v2576_v43, %v2407_v19  ;;  %v4010_v54 = vld [vmem:[%s6920_s3 + $0xe0] sm:$0xff]  ;;  %v7312_v43 = vld [vmem:[#allocation46_spill] sm:$0xff]  ;;  %v7313_v19 = vld [vmem:[#allocation48_spill] sm:$0xff] }
 0x54c   : > { %v2761_v16 = vmul.f32 %v4006_v52, %v7311_v4  ;;  %v2817_v22 = vadd.f32 %v2785_v29, %v2616_v11  ;;  %v2610_v57 = vadd.f32 %v2578_v34, %v2409_v53  ;;  %v2417_v51 = vadd.f32 %v2385_v38, %v6247_v63  ;;  %v7314_v34 = vld [vmem:[#allocation11_spill] sm:$0xff]  ;;  %v7317_v47 = vld [vmem:[#allocation25_spill] sm:$0xff] }
 0x54d   : > { %v2419_v36 = vadd.f32 %v2387_v46, %v6299_v59  ;;  %v2612_v1 = vadd.f32 %v2580_v48, %v2411_v30  ;;  %v6401_v44 = vadd.f32 %v2582_v50, %v2413_v7  ;;  %v2421_v8 = vadd.f32 %v2389_v6, %v6302_v49  ;;  %v7315_v30 = vld [vmem:[#allocation54_spill] sm:$0xff]  ;;  %v6418_v7 = vld [vmem:[%s6920_s3 + $0xc8] sm:$0xff] }
 0x54e   : > { %v2683_v9 = vpop.permute.xlu1 %2682  ;;  %v2793_v26 = vadd.f32 %v2761_v16, %v2592_v41  ;;  %v2841_v27 = vcombine.low %v2801_v37, %v2817_v22  ;;  %v2588_v63 = vmul.f32 %v6309_v39, %v7313_v19  ;;  %v2562_v59 = vmul.f32 %v6334_v40, %v7314_v34  ;;  %v7320_v34 = vld [vmem:[#allocation64_spill] sm:$0xff] }
 0x54f   : > { %v2773_v53 = vmul.f32 %v4010_v54, %v2683_v9  ;;  %v2590_v49 = vmul.f32 %v6320_v24, %v7315_v30  ;;  %v2842_v38 = vcombine.high %v2801_v37, %v2817_v22  ;;  %v2569_v6 = vmul.f32 %v6272_v56, %v7316_v58  ;;  %v4008_v9 = vld [vmem:[%s6920_s3 + $0xd0] sm:$0xff] }
 0x550   : > { %v2620_v39 = vadd.f32 %v2588_v63, %v2419_v36  ;;  %v2789_v41 = vmul.f32 %v4010_v54, %v6100_v42  ;;  %v2849_v24 = vrot.slane %v2841_v27, %v4866_v14  ;;  %v2594_v48 = vadd.f32 %v2562_v59, %v6338_v60 }
 0x551   : > { %v6429_v37 = vadd.f32 %v2590_v49, %v2421_v8  ;;  %v6434_v50 = vmul.f32 %v6418_v7, %v7317_v47  ;;  %v2765_v42 = vmul.f32 %v4010_v54, %v6208_v32  ;;  %v2856_v4 = vrot.slane %v2842_v38, %v4866_v14  ;;  %v4012_v32 = vld [vmem:[%s6920_s3 + $0xf0] sm:$0xff] }
 0x552   : > { %v6377_v21 = vpop.permute.xlu1 %2690  ;;  %v2821_v36 = vadd.f32 %v2789_v41, %v2620_v39  ;;  %v2763_v8 = vmul.f32 %v4008_v9, %v6183_v17  ;;  %v6456_v59 = vmul.f32 %v6418_v7, %v7320_v34  ;;  %v4173_v49 = vmov 0.0  }
 0x553   : > { %v2771_v58 = vmul.f32 %v4008_v9, %v6327_v25 }
 0x556   : > { %v2699_v20 = vpop.permute.xlu1 %2698 }
 0x557   : > { %v2777_v12 = vmul.f32 %v4006_v52, %v2699_v20  ;;  %v2586_v52 = vmul.f32 %v6334_v40, %v7312_v43 }
 0x559   : > { %v2809_v13 = vadd.f32 %v2777_v12, %v2608_v3  ;;  %v2618_v40 = vadd.f32 %v2586_v52, %v2417_v51  ;;  %v2805_v3 = vadd.f32 %v2773_v53, %v2604_v5  ;;  %v6439_v51 = vadd.f32 %v2569_v6, %v6304_v15  ;;  %v7321_v53 = vld [vmem:[#allocation66_spill] sm:$0xff] }
 0x55a   : > { %v2707_v29 = vpop.permute.xlu1 %2706  ;;  %v2797_v15 = vadd.f32 %v2765_v42, %v6355_v33  ;;  %v2767_v33 = vmul.f32 %v4012_v32, %v6232_v62 }
 0x55b   : > { %v2825_v31 = vcombine.low %v2793_v26, %v2809_v13  ;;  %v2826_v46 = vcombine.high %v2793_v26, %v2809_v13  ;;  %v2779_v12 = vmul.f32 %v4008_v9, %v2707_v29  ;;  %v7318_v26 = vld [vmem:[#allocation63_spill] sm:$0xff]  ;;  %v7319_v13 = vld [vmem:[#allocation62_spill] sm:$0xff]  ;;  %v3113_v19 = vcombine.low %v2805_v3, %v2821_v36 }
 0x55c   : > { %v6444_v27 = vmul.f32 %v6075_v61, %v7318_v26  ;;  %v3114_v63 = vcombine.high %v2805_v3, %v2821_v36  ;;  %v2577_v29 = vmul.f32 %v6272_v56, %v7321_v53  ;;  %v2799_v26 = vadd.f32 %v2767_v33, %v6357_v2  ;;  %v7323_v33 = vld [vmem:[#allocation33_spill] sm:$0xff] }
 0x55d   : > { %v2833_v11 = vrot.slane %v2825_v31, %v4866_v14  ;;  %v2840_v55 = vrot.slane %v2826_v46, %v4866_v14  ;;  %v2811_v30 = vadd.f32 %v2779_v12, %v2610_v57  ;;  %v2795_v31 = vadd.f32 %v2763_v8, %v2594_v48 }
 0x55e   : > { %v2715_v20 = vpop.permute.xlu1 %2714  ;;  %v6468_v57 = vrot.slane %v3113_v19, %v4866_v14  ;;  %v2609_v8 = vadd.f32 %v2577_v29, %v6313_v23  ;;  %v2589_v23 = vmul.f32 %v6075_v61, %v6145_v0 }
 0x55f   : > { %v2857_v16 = vcombine.low %v2833_v11, %v2849_v24  ;;  %v2858_v22 = vcombine.high %v2833_v11, %v2849_v24  ;;  %v2781_v60 = vmul.f32 %v4010_v54, %v2715_v20  ;;  %v2873_v5 = vcombine.low %v2840_v55, %v2856_v4 }
 0x560   : > { %v2874_v6 = vcombine.high %v2840_v55, %v2856_v4  ;;  %v6471_v24 = vrot.slane %v3114_v63, %v4866_v14  ;;  %v2961_v25 = vcombine.low %v2795_v31, %v2811_v30  ;;  %v2962_v55 = vcombine.high %v2795_v31, %v2811_v30  ;;  %v7322_v30 = vld [vmem:[#allocation35_spill] sm:$0xff] }
 0x561   : > { %v2872_v43 = vrot.slane %v2858_v22, %v7319_v13  ;;  %v6451_v52 = vrot.slane %v2857_v16, %v7319_v13  ;;  %v2813_v17 = vadd.f32 %v2781_v60, %v2612_v1  ;;  %v2881_v41 = vrot.slane %v2873_v5, %v7319_v13 }
 0x562   : > { %v2723_v54 = vpop.permute.xlu1 %2722  ;;  %v2803_v22 = vadd.f32 %v2771_v58, %v6368_v28  ;;  %v2888_v36 = vrot.slane %v2874_v6, %v7319_v13  ;;  %v2762_v60 = vmul.f32 %v6418_v7, %v6169_v10  ;;  %v2775_v5 = vmul.f32 %v4012_v32, %v6377_v21  ;;  %v7325_v58 = vld [vmem:[#allocation13_spill] sm:$0xff] }
 0x563   : > { %3374 = vrot.lane.b32.xlu0 %v2872_v43, %s7116_s0  ;;  %v2889_v38 = vcombine.high %v6451_v52, %v4173_v49  ;;  %v3097_v46 = vcombine.low %v2797_v15, %v2813_v17  ;;  %v3098_v1 = vcombine.high %v2797_v15, %v2813_v17  ;;  %v2783_v39 = vmul.f32 %v4012_v32, %v2723_v54 }
 0x564   : > { %v2890_v42 = vcombine.high %v2872_v43, %v4173_v49  ;;  %v6505_v10 = vrot.slane %v2961_v25, %v4866_v14  ;;  %v6508_v2 = vrot.slane %v2962_v55, %v4866_v14  ;;  %v2807_v61 = vadd.f32 %v2775_v5, %v6396_v45 }
 0x565   : > { %3370 = vrot.lane.b32.xlu1 %v2889_v38, %s7120_s2  ;;  %v6474_v11 = vrot.slane %v3097_v46, %v4866_v14  ;;  %v6477_v62 = vrot.slane %v3098_v1, %v4866_v14  ;;  %v2892_v54 = vcombine.high %v2888_v36, %v4173_v49  ;;  %v7324_v46 = vld [vmem:[#allocation68_spill] sm:$0xff]  ;;  %v2605_v6 = vadd.f32 %v6444_v27, %v7325_v58 }
 0x566   : > { %v2739_v48 = vpop.permute.xlu1 %2738  ;;  %v2774_v1 = vmul.f32 %v7324_v46, %v7323_v33  ;;  %v2802_v27 = vadd.f32 %v6434_v50, %v6439_v51 }
 0x567   : > { %v2787_v47 = vmul.f32 %v4008_v9, %v2739_v48  ;;  %3382 = vrot.lane.b32.xlu0 %v2881_v41, %s7052_s28  ;;  %v3129_v3 = vcombine.low %v6474_v11, %v6468_v57  ;;  %v3130_v20 = vcombine.high %v6474_v11, %v6468_v57  ;;  %v3145_v4 = vcombine.low %v6477_v62, %v6471_v24 }
 0x568   : > { %v3146_v16 = vcombine.high %v6477_v62, %v6471_v24  ;;  %v2815_v9 = vadd.f32 %v2783_v39, %v6401_v44  ;;  %v2891_v44 = vcombine.high %v2881_v41, %v4173_v49  ;;  %v2810_v39 = vadd.f32 %v6456_v59, %v2609_v8  ;;  %v7326_v59 = vld [vmem:[#allocation12_spill] sm:$0xff]  ;;  %v7331_v62 = vld [vmem:[#allocation71_spill] sm:$0xff] }
 0x569   : > { %v2819_v12 = vadd.f32 %v2787_v47, %v2618_v40  ;;  %3378 = vrot.lane.b32.xlu1 %v2890_v42, %s7112_s15  ;;  %v2585_v40 = vmul.f32 %v6272_v56, %v6116_v35  ;;  %v2794_v35 = vadd.f32 %v2762_v60, %v6336_v18  ;;  %v2621_v42 = vadd.f32 %v2589_v23, %v7326_v59 }
 0x56a   : > { %v2755_v43 = vpop.permute.xlu1 %2754  ;;  %v3233_v21 = vcombine.low %v2799_v26, %v2815_v9  ;;  %v3234_v0 = vcombine.high %v2799_v26, %v2815_v9  ;;  %v2806_v26 = vadd.f32 %v2774_v1, %v2605_v6  ;;  %v3153_v57 = vrot.slane %v3145_v4, %v7319_v13 }
 0x56b   : > { %v2977_v15 = vcombine.low %v2803_v22, %v2819_v12  ;;  %v2978_v19 = vcombine.high %v2803_v22, %v2819_v12  ;;  %v2791_v28 = vmul.f32 %v4012_v32, %v2755_v43  ;;  %3390 = vrot.lane.b32.xlu0 %v2888_v36, %s7096_s18  ;;  %v2617_v18 = vadd.f32 %v2585_v40, %v7322_v30 }
 0x56c   : > { %v6537_v41 = vrot.slane %v3233_v21, %v4866_v14  ;;  %v6541_v48 = vrot.slane %v3234_v0, %v4866_v14  ;;  %v2893_v22 = vcombine.low %v2794_v35, %v2810_v39  ;;  %v2894_v43 = vcombine.high %v2794_v35, %v2810_v39 }
 0x56d   : > { %v6511_v63 = vrot.slane %v2977_v15, %v4866_v14  ;;  %v6514_v32 = vrot.slane %v2978_v19, %v4866_v14  ;;  %v2823_v17 = vadd.f32 %v2791_v28, %v6429_v37  ;;  %3386 = vrot.lane.b32.xlu1 %v2891_v44, %s7047_s9  ;;  %v3160_v4 = vrot.slane %v3146_v16, %v7319_v13  ;;  %v7332_v16 = vld [vmem:[#allocation73_spill] sm:$0xff] }
 0x56e   : > { %v2735_v56 = vpop.permute.xlu1 %2734  ;;  %v2901_v15 = vrot.slane %v2893_v22, %v4866_v14 }
 0x56f   : > { %v2993_v34 = vcombine.low %v6505_v10, %v6511_v63  ;;  %v2994_v53 = vcombine.high %v6505_v10, %v6511_v63  ;;  %v3009_v29 = vcombine.low %v6508_v2, %v6514_v32  ;;  %v3010_v37 = vcombine.high %v6508_v2, %v6514_v32 }
 0x570   : > { %v3249_v38 = vcombine.low %v2807_v61, %v2823_v17  ;;  %v3250_v45 = vcombine.high %v2807_v61, %v2823_v17  ;;  %v2786_v31 = vmul.f32 %v6418_v7, %v2735_v56  ;;  %v7327_v17 = vld [vmem:[#allocation69_spill] sm:$0xff]  ;;  %v7328_v61 = vld [vmem:[#allocation70_spill] sm:$0xff]  ;;  %v6630_v10 = vrot.slane %v3129_v3, %v7319_v13 }
 0x571   : > { %3394 = vrot.lane.b32.xlu1 %v2892_v54, %s7090_s21  ;;  %v7329_v0 = vcombine.low %v7327_v17, %v7328_v61  ;;  %v7330_v35 = vcombine.high %v7327_v17, %v7328_v61  ;;  %v3024_v63 = vrot.slane %v3010_v37, %v7319_v13  ;;  %v3144_v2 = vrot.slane %v3130_v20, %v7319_v13 }
 0x572   : > { %v6544_v25 = vrot.slane %v3249_v38, %v4866_v14  ;;  %v6547_v7 = vrot.slane %v3250_v45, %v4866_v14  ;;  %v2818_v55 = vadd.f32 %v2786_v31, %v2617_v18  ;;  %v2751_v47 = vpop.permute.xlu1 %2750  ;;  %v2908_v38 = vrot.slane %v2894_v43, %v4866_v14  ;;  %v7335_v43 = vld [vmem:[#allocation77_spill] sm:$0xff] }
 0x573   : > { %v2790_v9 = vmul.f32 %v7324_v46, %v2751_v47  ;;  %v6568_v56 = vrot.slane %v7329_v0, %v4866_v14  ;;  %v6574_v54 = vrot.slane %v7330_v35, %v4866_v14  ;;  %v3162_v37 = vcombine.high %v3144_v2, %v4173_v49 }
 0x574   : > { %v3265_v12 = vcombine.low %v6537_v41, %v6544_v25  ;;  %v3266_v36 = vcombine.high %v6537_v41, %v6544_v25  ;;  %v3281_v8 = vcombine.low %v6541_v48, %v6547_v7  ;;  %v3282_v60 = vcombine.high %v6541_v48, %v6547_v7 }
 0x575   : > { %v2909_v5 = vcombine.low %v2802_v27, %v2818_v55  ;;  %v2910_v50 = vcombine.high %v2802_v27, %v2818_v55  ;;  %v2822_v51 = vadd.f32 %v2790_v9, %v2621_v42  ;;  %v6605_v42 = vrot.slane %v2993_v34, %v7319_v13 }
 0x576   : > { %v3280_v32 = vrot.slane %v3266_v36, %v7319_v13  ;;  %v3289_v11 = vrot.slane %v3281_v8, %v7319_v13  ;;  %v3163_v20 = vcombine.high %v3153_v57, %v4173_v49  ;;  %v3296_v25 = vrot.slane %v3282_v60, %v7319_v13  ;;  %v7334_v60 = vld [vmem:[#allocation75_spill] sm:$0xff] }
 0x577   : > { %v2917_v19 = vrot.slane %v2909_v5, %v4866_v14  ;;  %v3181_v28 = vcombine.low %v2806_v26, %v2822_v51  ;;  %v3182_v44 = vcombine.high %v2806_v26, %v2822_v51  ;;  %v2924_v40 = vrot.slane %v2910_v50, %v4866_v14 }
 0x578   : > { %v3025_v9 = vcombine.high %v6605_v42, %v4173_v49  ;;  %v3008_v26 = vrot.slane %v2994_v53, %v7319_v13  ;;  %v3017_v5 = vrot.slane %v3009_v29, %v7319_v13  ;;  %v6638_v53 = vrot.slane %v3265_v12, %v7319_v13 }
 0x579   : > { %v2925_v23 = vcombine.low %v2901_v15, %v2917_v19  ;;  %v2926_v21 = vcombine.high %v2901_v15, %v2917_v19  ;;  %v6577_v30 = vrot.slane %v3181_v28, %v4866_v14  ;;  %v6580_v18 = vrot.slane %v3182_v44, %v4866_v14 }
 0x57a   : > { %v2941_v58 = vcombine.low %v2908_v38, %v2924_v40  ;;  %v2942_v39 = vcombine.high %v2908_v38, %v2924_v40  ;;  %v3026_v34 = vcombine.high %v3008_v26, %v4173_v49  ;;  %v3027_v50 = vcombine.high %v3017_v5, %v4173_v49 }
 0x57b   : > { %v2933_v45 = vrot.slane %v2925_v23, %v7319_v13  ;;  %v3197_v31 = vcombine.low %v6568_v56, %v6577_v30  ;;  %v3198_v33 = vcombine.high %v6568_v56, %v6577_v30  ;;  %v3213_v46 = vcombine.low %v6574_v54, %v6580_v18  ;;  %v7339_v30 = vld [vmem:[#allocation72_spill] sm:$0xff] }
 0x57c   : > { %v3214_v1 = vcombine.high %v6574_v54, %v6580_v18  ;;  %v2940_v14 = vrot.slane %v2926_v21, %v7319_v13  ;;  %v2949_v47 = vrot.slane %v2941_v58, %v7319_v13  ;;  %v2956_v59 = vrot.slane %v2942_v39, %v7319_v13 }
 0x57d   : > { %3398 = vrot.lane.b32.xlu0 %v2933_v45, %s7084_s19  ;;  %v2957_v6 = vcombine.high %v2933_v45, %v4173_v49  ;;  %v3161_v29 = vcombine.high %v6630_v10, %v4173_v49  ;;  %v3297_v3 = vcombine.high %v6638_v53, %v4173_v49  ;;  %v3298_v12 = vcombine.high %v3280_v32, %v4173_v49  ;;  %v7340_v45 = vld [vmem:[#allocation74_spill] sm:$0xff] }
 0x57e   : > { %v2958_v55 = vcombine.high %v2940_v14, %v4173_v49  ;;  %v2959_v27 = vcombine.high %v2949_v47, %v4173_v49  ;;  %v2960_v22 = vcombine.high %v2956_v59, %v4173_v49  ;;  %v3299_v41 = vcombine.high %v3289_v11, %v4173_v49 }
 0x57f   : > { %3402 = vrot.lane.b32.xlu1 %v2957_v6, %s7078_s26  ;;  %v3028_v36 = vcombine.high %v3024_v63, %v4173_v49  ;;  %v3164_v8 = vcombine.high %v3160_v4, %v4173_v49  ;;  %v3300_v24 = vcombine.high %v3296_v25, %v4173_v49  ;;  %v7333_v51 = vcombine.low %v7331_v62, %v7332_v16  ;;  %v7342_v6 = vld [vmem:[#allocation76_spill] sm:$0xff] }
 0x580   : > { %v3205_v7 = vrot.slane %v3197_v31, %v7319_v13  ;;  %v7336_v15 = vcombine.low %v7334_v60, %v7335_v43  ;;  %v7337_v23 = vcombine.high %v7331_v62, %v7332_v16  ;;  %v3212_v17 = vrot.slane %v3198_v33, %v7319_v13 }
 0x581   : > { %3406 = vrot.lane.b32.xlu0 %v2940_v14, %s7050_s30  ;;  %v3069_v48 = vrot.slane %v7333_v51, %v7319_v13  ;;  %v7338_v61 = vcombine.high %v7334_v60, %v7335_v43  ;;  %v7341_v31 = vcombine.low %v7339_v30, %v7340_v45  ;;  %v3221_v58 = vrot.slane %v3213_v46, %v7319_v13  ;;  %v7343_v14 = vld [vmem:[#allocation78_spill] sm:$0xff] }
 0x582   : > { %v3341_v19 = vrot.slane %v7336_v15, %v7319_v13  ;;  %v3229_v44 = vcombine.high %v3205_v7, %v4173_v49  ;;  %v3076_v21 = vrot.slane %v7337_v23, %v7319_v13  ;;  %v3230_v38 = vcombine.high %v3212_v17, %v4173_v49 }
 0x583   : > { %3410 = vrot.lane.b32.xlu1 %v2958_v55, %s7048_s8  ;;  %v3093_v28 = vcombine.high %v3069_v48, %v4173_v49  ;;  %v3348_v0 = vrot.slane %v7338_v61, %v7319_v13  ;;  %v3085_v33 = vrot.slane %v7341_v31, %v7319_v13  ;;  %v7344_v39 = vcombine.low %v7342_v6, %v7343_v14 }
 0x584   : > { %v3365_v40 = vcombine.high %v3341_v19, %v4173_v49  ;;  %v3094_v35 = vcombine.high %v3076_v21, %v4173_v49 }
 0x585   : > { %3414 = vrot.lane.b32.xlu0 %v2949_v47, %s7114_s17  ;;  %v3366_v56 = vcombine.high %v3348_v0, %v4173_v49  ;;  %v3357_v55 = vrot.slane %v7344_v39, %v7319_v13  ;;  %v3095_v47 = vcombine.high %v3085_v33, %v4173_v49 }
 0x587   : > { %3418 = vrot.lane.b32.xlu1 %v2959_v27, %s7127_s5  ;;  %v3367_v46 = vcombine.high %v3357_v55, %v4173_v49 }
 0x589   : > { %3422 = vrot.lane.b32.xlu0 %v2956_v59, %s7124_s7  ;;  %v3231_v59 = vcombine.high %v3221_v58, %v4173_v49 }
 0x58b   : > { %3426 = vrot.lane.b32.xlu1 %v2960_v22, %s7122_s24 }
 0x58d   : > { %3430 = vrot.lane.b32.xlu0 %v3025_v9, %s7120_s2 }
 0x58f   : > { %3434 = vrot.lane.b32.xlu1 %v3008_v26, %s7116_s0  ;;  %v7345_v26 = vcombine.high %v7339_v30, %v7340_v45 }
 0x591   : > { %3438 = vrot.lane.b32.xlu0 %v3026_v34, %s7112_s15  ;;  %v3092_v34 = vrot.slane %v7345_v26, %v7319_v13 }
 0x593   : > { %3442 = vrot.lane.b32.xlu1 %v3017_v5, %s7052_s28 }
 0x595   : > { %3446 = vrot.lane.b32.xlu0 %v3027_v50, %s7047_s9 }
 0x597   : > { %3450 = vrot.lane.b32.xlu1 %v3024_v63, %s7096_s18  ;;  %v3228_v63 = vrot.slane %v3214_v1, %v7319_v13 }
 0x599   : > { %3490 = vrot.lane.b32.xlu0 %v3161_v29, %s7120_s2 }
 0x59b   : > { %3550 = vrot.lane.b32.xlu1 %v3297_v3, %s7120_s2  ;;  %v7346_v3 = vcombine.high %v7342_v6, %v7343_v14 }
 0x59d   : > { %3494 = vrot.lane.b32.xlu0 %v3144_v2, %s7116_s0  ;;  %v3364_v2 = vrot.slane %v7346_v3, %v7319_v13 }
 0x59f   : > { %3554 = vrot.lane.b32.xlu1 %v3280_v32, %s7116_s0  ;;  %v3368_v13 = vcombine.high %v3364_v2, %v4173_v49 }
 0x5a1   : > { %3498 = vrot.lane.b32.xlu0 %v3162_v37, %s7112_s15  ;;  %v3096_v37 = vcombine.high %v3092_v34, %v4173_v49 }
 0x5a3   : > { %3558 = vrot.lane.b32.xlu1 %v3298_v12, %s7112_s15  ;;  %v3232_v12 = vcombine.high %v3228_v63, %v4173_v49 }
 0x5a5   : > { %3502 = vrot.lane.b32.xlu0 %v3153_v57, %s7052_s28 }
 0x5a7   : > { %3562 = vrot.lane.b32.xlu1 %v3289_v11, %s7052_s28  ;;  %s7351_s28 = sld [smem:[#allocation83_spill]] (!%p4016_p4) }
 0x5a9   : > { %3506 = vrot.lane.b32.xlu0 %v3163_v20, %s7047_s9 }
 0x5ab   : > { %3566 = vrot.lane.b32.xlu1 %v3299_v41, %s7047_s9 }
 0x5ad   : > { %3510 = vrot.lane.b32.xlu0 %v3160_v4, %s7096_s18 }
 0x5af   : > { %3570 = vrot.lane.b32.xlu1 %v3296_v25, %s7096_s18 }
 0x5b1   : > { %3454 = vrot.lane.b32.xlu0 %v3028_v36, %s7090_s21 }
 0x5b3   : > { %3514 = vrot.lane.b32.xlu1 %v3164_v8, %s7090_s21 }
 0x5b5   : > { %3574 = vrot.lane.b32.xlu0 %v3300_v24, %s7090_s21 }
 0x5b7   : > { %3458 = vrot.lane.b32.xlu1 %v3069_v48, %s7084_s19 }
 0x5b9   : > { %3518 = vrot.lane.b32.xlu0 %v3205_v7, %s7084_s19 }
 0x5bb   : > { %3578 = vrot.lane.b32.xlu1 %v3341_v19, %s7084_s19  ;;  %s7350_s19 = sld [smem:[#allocation82_spill]] (!%p4016_p4) }
 0x5bd   : > { %3462 = vrot.lane.b32.xlu0 %v3093_v28, %s7078_s26 }
 0x5bf   : > { %3522 = vrot.lane.b32.xlu1 %v3229_v44, %s7078_s26 }
 0x5c1   : > { %3582 = vrot.lane.b32.xlu0 %v3365_v40, %s7078_s26 }
 0x5c3   : > { %3466 = vrot.lane.b32.xlu1 %v3076_v21, %s7050_s30 }
 0x5c5   : > { %3526 = vrot.lane.b32.xlu0 %v3212_v17, %s7050_s30 }
 0x5c7   : > { %3586 = vrot.lane.b32.xlu1 %v3348_v0, %s7050_s30 }
 0x5c9   : > { %3470 = vrot.lane.b32.xlu0 %v3094_v35, %s7048_s8 }
 0x5cb   : > { %3530 = vrot.lane.b32.xlu1 %v3230_v38, %s7048_s8 }
 0x5cd   : > { %3590 = vrot.lane.b32.xlu0 %v3366_v56, %s7048_s8 }
 0x5cf   : > { %3474 = vrot.lane.b32.xlu1 %v3085_v33, %s7114_s17 }
 0x5d1   : > { %3534 = vrot.lane.b32.xlu0 %v3221_v58, %s7114_s17 }
 0x5d3   : > { %3594 = vrot.lane.b32.xlu1 %v3357_v55, %s7114_s17 }
 0x5d5   : > { %3478 = vrot.lane.b32.xlu0 %v3095_v47, %s7127_s5  ;;  %v3375_v27 = vpop.permute.xlu0 %3374 }
 0x5d7   : > { %3538 = vrot.lane.b32.xlu1 %v3231_v59, %s7127_s5  ;;  %v3371_v22 = vpop.permute.xlu1 %3370 }
 0x5d8   : > { %v3610_v9 = vsel %vm3609_vm5, %v6451_v52, %v3371_v22 }
 0x5d9   : > { %3598 = vrot.lane.b32.xlu0 %v3367_v46, %s7127_s5  ;;  %v3612_v5 = vsel %vm3611_vm6, %v3610_v9, %v3375_v27  ;;  %v3383_v50 = vpop.permute.xlu0 %3382  ;;  %s4021_s5 = sshll.u32 %s4221_s25, 4 }
 0x5da   : > { %s3724_s15 = scalar_lea.vmem [#allocation2], %s4021_s5 }
 0x5db   : > { %3482 = vrot.lane.b32.xlu1 %v3092_v34, %s7124_s7  ;;  %v3379_v52 = vpop.permute.xlu1 %3378 }
 0x5dc   : > { %v3614_v29 = vsel %vm3613_vm7, %v3612_v5, %v3379_v52 }
 0x5dd   : > { %3542 = vrot.lane.b32.xlu0 %v3228_v63, %s7124_s7  ;;  %v3616_v32 = vsel %vm3615_vm8, %v3614_v29, %v3383_v50  ;;  %v3391_v18 = vpop.permute.xlu0 %3390 }
 0x5df   : > { %3602 = vrot.lane.b32.xlu1 %v3364_v2, %s7124_s7  ;;  %v3387_v54 = vpop.permute.xlu1 %3386 }
 0x5e0   : > { %v3618_v1 = vsel %vm3617_vm9, %v3616_v32, %v3387_v54 }
 0x5e1   : > { %3486 = vrot.lane.b32.xlu0 %v3096_v37, %s7122_s24  ;;  %v3620_v57 = vsel %vm3619_vm10, %v3618_v1, %v3391_v18 }
 0x5e3   : > { %3546 = vrot.lane.b32.xlu1 %v3232_v12, %s7122_s24  ;;  %v3395_v11 = vpop.permute.xlu1 %3394 }
 0x5e4   : > { %v3622_v20 = vsel %vm3621_vm11, %v3620_v57, %v3395_v11 }
 0x5e5   : > { %3606 = vrot.lane.b32.xlu0 %v3368_v13, %s7122_s24 }
 0x5ef   : > { %v3399_v41 = vpop.permute.xlu0 %3398 }
 0x5f0   : > { %v3624_v4 = vsel %vm3623_vm12, %v3622_v20, %v3399_v41 }
 0x5f1   : > { %v3403_v25 = vpop.permute.xlu1 %3402 }
 0x5f2   : > { %v3626_v36 = vsel %vm3625_vm13, %v3624_v4, %v3403_v25 }
 0x5f3   : > { %v3407_v8 = vpop.permute.xlu0 %3406 }
 0x5f4   : > { %v3628_v24 = vsel %vm3627_vm14, %v3626_v36, %v3407_v8 }
 0x5f5   : > { %v3411_v62 = vpop.permute.xlu1 %3410 }
 0x5f6   : > { %v3630_v49 = vsel %vm3629_vm15, %v3628_v24, %v3411_v62  ;;  %v3684_v24 = vld [vmem:[%s6921_s4] sm:$0xf] }
 0x5f7   : > { %v3415_v16 = vpop.permute.xlu0 %3414 }
 0x5f8   : > { %v3632_v51 = vsel %vm3631_vm0, %v3630_v49, %v3415_v16 }
 0x5f9   : > { %v3419_v48 = vpop.permute.xlu1 %3418 }
 0x5fa   : > { %v3634_v7 = vsel %vm3633_vm1, %v3632_v51, %v3419_v48 }
 0x5fb   : > { %v3423_v60 = vpop.permute.xlu0 %3422 }
 0x5fc   : > { %v3636_v43 = vsel %vm3635_vm2, %v3634_v7, %v3423_v60 }
 0x5fd   : > { %v3427_v15 = vpop.permute.xlu1 %3426 }
 0x5fe   : > { %v6791_v19 = vsel %vm3637_vm3, %v3636_v43, %v3427_v15  ;;  %v7347_v15 = vld [vmem:[#allocation7_spill] sm:$0xff] }
 0x5ff   : > { %v3431_v28 = vpop.permute.xlu0 %3430 }
 0x600   : > { %v3639_v44 = vsel %vm3609_vm5, %v6605_v42, %v3431_v28  ;;  %v6821_v28 = vsub.s32 2, %v7347_v15 }
 0x601   : > { %v3435_v40 = vpop.permute.xlu1 %3434 }
 0x602   : > { %v3640_v23 = vsel %vm3611_vm6, %v3639_v44, %v3435_v40  ;;  %v7348_v44 = vld [vmem:[#allocation8_spill] sm:$0xff] }
 0x603   : > { %v3439_v21 = vpop.permute.xlu0 %3438  ;;  %v3689_v40 = vrot.slane %v3684_v24, %v7348_v44 }
 0x604   : > { %v3641_v17 = vsel %vm3613_vm7, %v3640_v23, %v3439_v21 }
 0x605   : > { %v3443_v61 = vpop.permute.xlu1 %3442 }
 0x606   : > { %v3642_v0 = vsel %vm3615_vm8, %v3641_v17, %v3443_v61 }
 0x607   : > { %v3447_v35 = vpop.permute.xlu0 %3446 }
 0x608   : > { %v3643_v38 = vsel %vm3617_vm9, %v3642_v0, %v3447_v35 }
 0x609   : > { %v3451_v56 = vpop.permute.xlu1 %3450 }
 0x60a   : > { %v3644_v4 = vsel %vm3619_vm10, %v3643_v38, %v3451_v56  ;;  %v7349_v56 = vld [vmem:[#allocation9_spill] sm:$0xff] }
 0x60b   : > { %v3491_v30 = vpop.permute.xlu0 %3490 }
 0x60c   : > { %v3654_v57 = vsel %vm3609_vm5, %v6630_v10, %v3491_v30  ;;  %v3693_v30 = vrot.slane %v3684_v24, %v7349_v56 }
 0x60d   : > { %v3551_v45 = vpop.permute.xlu1 %3550 }
 0x60e   : > { %v3669_v20 = vsel %vm3609_vm5, %v6638_v53, %v3551_v45 }
 0x60f   : > { %v3495_v31 = vpop.permute.xlu0 %3494 }
 0x610   : > { %v3655_v13 = vsel %vm3611_vm6, %v3654_v57, %v3495_v31 }
 0x611   : > { %v3555_v33 = vpop.permute.xlu1 %3554 }
 0x612   : > { %v3670_v25 = vsel %vm3611_vm6, %v3669_v20, %v3555_v33 }
 0x613   : > { %v3499_v58 = vpop.permute.xlu0 %3498 }
 0x614   : > { %v3656_v41 = vsel %vm3613_vm7, %v3655_v13, %v3499_v58 }
 0x615   : > { %v3559_v6 = vpop.permute.xlu1 %3558 }
 0x616   : > { %v3671_v10 = vsel %vm3613_vm7, %v3670_v25, %v3559_v6  ;;  %v6835_v6 = vsub.s32 3, %v7347_v15 }
 0x617   : > { %v3503_v42 = vpop.permute.xlu0 %3502 }
 0x618   : > { %v3657_v36 = vsel %vm3615_vm8, %v3656_v41, %v3503_v42 }
 0x619   : > { %v3563_v14 = vpop.permute.xlu1 %3562 }
 0x61a   : > { %v3672_v53 = vsel %vm3615_vm8, %v3671_v10, %v3563_v14 }
 0x61b   : > { %v3507_v39 = vpop.permute.xlu0 %3506 }
 0x61c   : > { %v3658_v62 = vsel %vm3617_vm9, %v3657_v36, %v3507_v39 }
 0x61d   : > { %v3567_v55 = vpop.permute.xlu1 %3566 }
 0x61e   : > { %v3673_v7 = vsel %vm3617_vm9, %v3672_v53, %v3567_v55  ;;  %v3697_v55 = vrot.slane %v3684_v24, %v6821_v28 }
 0x61f   : > { %v3511_v47 = vpop.permute.xlu0 %3510 }
 0x620   : > { %v3659_v16 = vsel %vm3619_vm10, %v3658_v62, %v3511_v47  ;;  %v3706_v47 = vadd.f32 %v3689_v40, %v6791_v19 }
 0x621   : > { %v3571_v27 = vpop.permute.xlu1 %3570 }
 0x622   : > { %v3674_v23 = vsel %vm3619_vm10, %v3673_v7, %v3571_v27 }
 0x623   : > { %v3455_v59 = vpop.permute.xlu0 %3454 }
 0x624   : > { %v3645_v49 = vsel %vm3621_vm11, %v3644_v4, %v3455_v59 }
 0x625   : > { %v3515_v46 = vpop.permute.xlu1 %3514 }
 0x626   : > { %v3660_v60 = vsel %vm3621_vm11, %v3659_v16, %v3515_v46 }
 0x627   : > { %v3575_v22 = vpop.permute.xlu0 %3574 }
 0x628   : > { %v3675_v0 = vsel %vm3621_vm11, %v3674_v23, %v3575_v22 }
 0x629   : > { %v3459_v9 = vpop.permute.xlu1 %3458 }
 0x62a   : > { %v3646_v51 = vsel %vm3623_vm12, %v3645_v49, %v3459_v9 }
 0x62b   : > { %v3519_v26 = vpop.permute.xlu0 %3518 }
 0x62c   : > { %v3661_v21 = vsel %vm3623_vm12, %v3660_v60, %v3519_v26 }
 0x62d   : > { %v3579_v34 = vpop.permute.xlu1 %3578 }
 0x62e   : > { %v3676_v45 = vsel %vm3623_vm12, %v3675_v0, %v3579_v34 }
 0x62f   : > { %v3463_v5 = vpop.permute.xlu0 %3462 }
 0x630   : > { %v3647_v43 = vsel %vm3625_vm13, %v3646_v51, %v3463_v5 }
 0x631   : > { %v3523_v50 = vpop.permute.xlu1 %3522 }
 0x632   : > { %v3662_v35 = vsel %vm3625_vm13, %v3661_v21, %v3523_v50 }
 0x633   : > { %v3583_v63 = vpop.permute.xlu0 %3582 }
 0x634   : > { %v3677_v42 = vsel %vm3625_vm13, %v3676_v45, %v3583_v63 }
 0x635   : > { %v3467_v52 = vpop.permute.xlu1 %3466 }
 0x636   : > { %v3648_v17 = vsel %vm3627_vm14, %v3647_v43, %v3467_v52  ;;  %v3701_v52 = vrot.slane %v3684_v24, %v6835_v6 }
 0x637   : > { %v3527_v29 = vpop.permute.xlu0 %3526 }
 0x638   : > { %v3663_v31 = vsel %vm3627_vm14, %v3662_v35, %v3527_v29 }
 0x639   : > { %v3587_v3 = vpop.permute.xlu1 %3586 }
 0x63a   : > { %v3678_v27 = vsel %vm3627_vm14, %v3677_v42, %v3587_v3 }
 0x63b   : > { %v3471_v2 = vpop.permute.xlu0 %3470 }
 0x63c   : > { %v3649_v38 = vsel %vm3629_vm15, %v3648_v17, %v3471_v2  ;;  %v3710_v2 = vmax.f32 %v3706_v47, 0.0 }
 0x63d   : > { %v3531_v32 = vpop.permute.xlu1 %3530 }
 0x63e   : > { %v3664_v14 = vsel %vm3629_vm15, %v3663_v31, %v3531_v32 }
 0x63f   : > { %v3591_v37 = vpop.permute.xlu0 %3590 }
 0x640   : > { %v3679_v9 = vsel %vm3629_vm15, %v3678_v27, %v3591_v37 }
 0x641   : > { %v3475_v54 = vpop.permute.xlu1 %3474 }
 0x642   : > { %v3650_v33 = vsel %vm3631_vm0, %v3649_v38, %v3475_v54 }
 0x643   : > { %v3535_v18 = vpop.permute.xlu0 %3534 }
 0x644   : > { %v3665_v59 = vsel %vm3631_vm0, %v3664_v14, %v3535_v18 }
 0x645   : > { %v3595_v1 = vpop.permute.xlu1 %3594 }
 0x646   : > { %v3680_v5 = vsel %vm3631_vm0, %v3679_v9, %v3595_v1 }
 0x647   : > { %v3479_v12 = vpop.permute.xlu0 %3478 }
 0x648   : > { %v3651_v39 = vsel %vm3633_vm1, %v3650_v33, %v3479_v12 }
 0x649   : > { %v3539_v11 = vpop.permute.xlu1 %3538 }
 0x64a   : > { %v3666_v26 = vsel %vm3633_vm1, %v3665_v59, %v3539_v11 }
 0x64b   : > { %v3599_v8 = vpop.permute.xlu0 %3598 }
 0x64c   : > { %v3681_v29 = vsel %vm3633_vm1, %v3680_v5, %v3599_v8 }
 0x64d   : > { %v3483_v48 = vpop.permute.xlu1 %3482 }
 0x64e   : > { %v3652_v46 = vsel %vm3635_vm2, %v3651_v39, %v3483_v48 }
 0x64f   : > { %v3543_v61 = vpop.permute.xlu0 %3542 }
 0x650   : > { %v3667_v50 = vsel %vm3635_vm2, %v3666_v26, %v3543_v61 }
 0x651   : > { %v3603_v58 = vpop.permute.xlu1 %3602 }
 0x652   : > { %v3682_v32 = vsel %vm3635_vm2, %v3681_v29, %v3603_v58 }
 0x653   : > { %v3487_v22 = vpop.permute.xlu0 %3486 }
 0x654   : > { %v3653_v34 = vsel %vm3637_vm3, %v3652_v46, %v3487_v22 }
 0x655   : > { %v3707_v63 = vadd.f32 %v3693_v30, %v3653_v34  ;;  %v3547_v19 = vpop.permute.xlu1 %3546 }
 0x656   : > { %v3668_v3 = vsel %vm3637_vm3, %v3667_v50, %v3547_v19 }
 0x657   : > { %v3711_v37 = vmax.f32 %v3707_v63, 0.0  ;;  %v3708_v54 = vadd.f32 %v3697_v55, %v3668_v3  ;;  %v3607_v18 = vpop.permute.xlu0 %3606 }
 0x658   : > { %v3683_v12 = vsel %vm3637_vm3, %v3682_v32, %v3607_v18 }
 0x659   : > { %v3718_v1 = vcombine.low %v3710_v2, %v3711_v37  ;;  %v3709_v57 = vadd.f32 %v3701_v52, %v3683_v12  ;;  %v3712_v13 = vmax.f32 %v3708_v54, 0.0  ;;  %3730 = sbr.rel (%p4016_p4) target bundleno = 1704 (0x6a8), region = 52 }
 0x65b   : > { %3725 = vst [vmem:[%s3724_s15] sm:$0xff] %v3718_v1  ;;  %v3713_v11 = vmax.f32 %v3709_v57, 0.0 }
 0x65d   : > { %v3719_v20 = vcombine.low %v3712_v13, %v3713_v11 }
 0x65f   : > { %3726 = vst [vmem:[%s3724_s15 + $0x8] sm:$0xff] %v3719_v20 }
 0x666   : > { %v3731_v41 = vld [vmem:[#allocation2] sm:$0xff]  ;;  %v3733_v4 = vld [vmem:[#allocation2 + $0x10] sm:$0xff]  ;;  %v3732_v8 = vld [vmem:[#allocation2 + $0x8] sm:$0xff] }
 0x667   : > { %v3739_v25 = vcombine.low %v3731_v41, %v3733_v4  ;;  %v3740_v36 = vcombine.high %v3731_v41, %v3733_v4  ;;  %v3734_v24 = vld [vmem:[#allocation2 + $0x18] sm:$0xff] }
 0x668   : > { %v3741_v10 = vcombine.low %v3732_v8, %v3734_v24  ;;  %v3742_v62 = vcombine.high %v3732_v8, %v3734_v24 }
 0x669   : > { %v3747_v49 = vrot.slane %v3739_v25, 4  ;;  %v3753_v53 = vrot.slane %v3740_v36, 4 }
 0x66a   : > { %v3759_v16 = vrot.slane %v3741_v10, 4  ;;  %v3765_v51 = vrot.slane %v3742_v62, 4 }
 0x66b   : > { %v3748_v48 = vadd.f32 %v3747_v49, %v3739_v25  ;;  %v3754_v7 = vadd.f32 %v3753_v53, %v3740_v36 }
 0x66c   : > { %v3760_v60 = vadd.f32 %v3759_v16, %v3741_v10  ;;  %v3766_v43 = vadd.f32 %v3765_v51, %v3742_v62 }
 0x66d   : > { %v3749_v15 = vrot.slane %v3748_v48, 2  ;;  %v3755_v44 = vrot.slane %v3754_v7, 2 }
 0x66e   : > { %v3761_v40 = vrot.slane %v3760_v60, 2  ;;  %v3767_v23 = vrot.slane %v3766_v43, 2 }
 0x66f   : > { %v3750_v21 = vadd.f32 %v3749_v15, %v3748_v48  ;;  %v3756_v17 = vadd.f32 %v3755_v44, %v3754_v7 }
 0x670   : > { %v3762_v61 = vadd.f32 %v3761_v40, %v3760_v60  ;;  %v3768_v0 = vadd.f32 %v3767_v23, %v3766_v43 }
 0x671   : > { %v3751_v35 = vrot.slane %v3750_v21, 1  ;;  %v3757_v38 = vrot.slane %v3756_v17, 1 }
 0x672   : > { %v3763_v56 = vrot.slane %v3762_v61, 1  ;;  %v3769_v30 = vrot.slane %v3768_v0, 1 }
 0x673   : > { %v3752_v45 = vadd.f32 %v3751_v35, %v3750_v21  ;;  %v3758_v31 = vadd.f32 %v3757_v38, %v3756_v17  ;;  %v7352_v35 = vld [vmem:[#allocation8_spill] sm:$0xff] }
 0x674   : > { %v3764_v33 = vadd.f32 %v3763_v56, %v3762_v61  ;;  %v3770_v58 = vadd.f32 %v3769_v30, %v3768_v0  ;;  %v3860_v61 = vld [vmem:[%s7350_s19] sm:$0xf]  ;;  %v7353_v56 = vld [vmem:[#allocation9_spill] sm:$0xff] }
 0x675   : > { %v3772_v42 = vmul.f32 0.125, %v3752_v45  ;;  %v3773_v14 = vmul.f32 0.125, %v3758_v31  ;;  %v3890_v0 = vld [vmem:[%s7351_s28] sm:$0xf]  ;;  %v3865_v38 = vrot.slane %v3860_v61, %v7352_v35  ;;  %v3869_v30 = vrot.slane %v3860_v61, %v7353_v56 }
 0x676   : > { %v3774_v39 = vmul.f32 0.125, %v3764_v33  ;;  %v3775_v55 = vmul.f32 0.125, %v3770_v58  ;;  %v3895_v45 = vrot.slane %v3890_v0, %v7352_v35  ;;  %v3899_v31 = vrot.slane %v3890_v0, %v7353_v56 }
 0x677   : > { %v3780_v47 = vcombine.low %v3772_v42, %v3773_v14  ;;  %v3781_v27 = vcombine.high %v3772_v42, %v3773_v14  ;;  %v3873_v33 = vrot.slane %v3860_v61, %v6821_v28  ;;  %v3877_v58 = vrot.slane %v3860_v61, %v6835_v6 }
 0x678   : > { %v3782_v59 = vcombine.low %v3774_v39, %v3775_v55  ;;  %v3783_v46 = vcombine.high %v3774_v39, %v3775_v55  ;;  %v3903_v39 = vrot.slane %v3890_v0, %v6821_v28  ;;  %v3907_v55 = vrot.slane %v3890_v0, %v6835_v6 }
 0x679   : > { %v6857_v22 = vsub.f32 %v3731_v41, %v3780_v47  ;;  %v6859_v9 = vsub.f32 %v3733_v4, %v3781_v27 }
 0x67a   : > { %v6861_v26 = vsub.f32 %v3732_v8, %v3782_v59  ;;  %v6863_v34 = vsub.f32 %v3734_v24, %v3783_v46  ;;  %v3878_v46 = vcombine.low %v3865_v38, %v3869_v30  ;;  %v3911_v28 = vcombine.high %v3903_v39, %v3907_v55 }
 0x67b   : > { %v3792_v5 = vmul.f32 %v6857_v22, %v6857_v22  ;;  %v3794_v50 = vmul.f32 %v6859_v9, %v6859_v9 }
 0x67c   : > { %v3793_v63 = vmul.f32 %v6861_v26, %v6861_v26  ;;  %v3795_v19 = vmul.f32 %v6863_v34, %v6863_v34 }
 0x67d   : > { %v3800_v52 = vcombine.low %v3792_v5, %v3794_v50  ;;  %v3801_v29 = vcombine.high %v3792_v5, %v3794_v50  ;;  %v3879_v5 = vcombine.high %v3865_v38, %v3869_v30 }
 0x67e   : > { %v3802_v3 = vcombine.low %v3793_v63, %v3795_v19  ;;  %v3803_v2 = vcombine.high %v3793_v63, %v3795_v19  ;;  %v3908_v63 = vcombine.low %v3895_v45, %v3899_v31  ;;  %v3909_v19 = vcombine.high %v3895_v45, %v3899_v31 }
 0x67f   : > { %v3808_v32 = vrot.slane %v3800_v52, 4  ;;  %v3814_v37 = vrot.slane %v3801_v29, 4 }
 0x680   : > { %v3820_v54 = vrot.slane %v3802_v3, 4  ;;  %v3826_v18 = vrot.slane %v3803_v2, 4 }
 0x681   : > { %v3809_v12 = vadd.f32 %v3808_v32, %v3800_v52  ;;  %v3815_v1 = vadd.f32 %v3814_v37, %v3801_v29  ;;  %v3880_v52 = vcombine.low %v3873_v33, %v3877_v58  ;;  %v3881_v29 = vcombine.high %v3873_v33, %v3877_v58 }
 0x682   : > { %v3821_v57 = vadd.f32 %v3820_v54, %v3802_v3  ;;  %v3827_v13 = vadd.f32 %v3826_v18, %v3803_v2  ;;  %v3910_v54 = vcombine.low %v3903_v39, %v3907_v55 }
 0x683   : > { %v3810_v11 = vrot.slane %v3809_v12, 2  ;;  %v3816_v20 = vrot.slane %v3815_v1, 2 }
 0x684   : > { %v3822_v41 = vrot.slane %v3821_v57, 2  ;;  %v3828_v4 = vrot.slane %v3827_v13, 2 }
 0x685   : > { %v3811_v25 = vadd.f32 %v3810_v11, %v3809_v12  ;;  %v3817_v36 = vadd.f32 %v3816_v20, %v3815_v1 }
 0x686   : > { %v3823_v8 = vadd.f32 %v3822_v41, %v3821_v57  ;;  %v3829_v24 = vadd.f32 %v3828_v4, %v3827_v13 }
 0x687   : > { %v3812_v10 = vrot.slane %v3811_v25, 1  ;;  %v3818_v62 = vrot.slane %v3817_v36, 1 }
 0x688   : > { %v3824_v49 = vrot.slane %v3823_v8, 1  ;;  %v3830_v53 = vrot.slane %v3829_v24, 1 }
 0x689   : > { %v3813_v16 = vadd.f32 %v3812_v10, %v3811_v25  ;;  %v3819_v51 = vadd.f32 %v3818_v62, %v3817_v36 }
 0x68a   : > { %v3825_v48 = vadd.f32 %v3824_v49, %v3823_v8  ;;  %v3831_v7 = vadd.f32 %v3830_v53, %v3829_v24 }
 0x68b   : > { %v3832_v60 = vmul.f32 0.125, %v3813_v16  ;;  %v3833_v43 = vmul.f32 0.125, %v3819_v51 }
 0x68c   : > { %v3834_v15 = vmul.f32 0.125, %v3825_v48  ;;  %v3835_v44 = vmul.f32 0.125, %v3831_v7 }
 0x68d   : > { %v3836_v40 = vadd.f32 1e-05, %v3832_v60  ;;  %v3837_v23 = vadd.f32 1e-05, %v3833_v43 }
 0x68e   : > { %v3838_v21 = vadd.f32 1e-05, %v3834_v15  ;;  %v3839_v17 = vadd.f32 1e-05, %v3835_v44 }
 0x68f   : > { %4090 = vrsqrt.f32 %v3836_v40 }
 0x690   : > { %4092 = vrsqrt.f32 %v3837_v23 }
 0x691   : > { %4094 = vrsqrt.f32 %v3838_v21 }
 0x692   : > { %4096 = vrsqrt.f32 %v3839_v17 }
 0x699   : > { %v4091_v42 = vpop.eup %4090 }
 0x69a   : > { %v4093_v14 = vpop.eup %4092 }
 0x69b   : > { %v4095_v47 = vpop.eup %4094  ;;  %v3848_v27 = vcombine.low %v4091_v42, %v4093_v14  ;;  %v3849_v59 = vcombine.high %v4091_v42, %v4093_v14 }
 0x69c   : > { %v4097_v50 = vpop.eup %4096 }
 0x69d   : > { %v3856_v3 = vmul.f32 %v3848_v27, %v6857_v22  ;;  %v3858_v2 = vmul.f32 %v3849_v59, %v6859_v9  ;;  %v3850_v32 = vcombine.low %v4095_v47, %v4097_v50  ;;  %v3851_v37 = vcombine.high %v4095_v47, %v4097_v50 }
 0x69f   : > { %v3886_v18 = vmul.f32 %v3878_v46, %v3856_v3  ;;  %v3888_v6 = vmul.f32 %v3879_v5, %v3858_v2  ;;  %v3857_v12 = vmul.f32 %v3850_v32, %v6861_v26  ;;  %v3859_v1 = vmul.f32 %v3851_v37, %v6863_v34 }
 0x6a1   : > { %v3916_v57 = vadd.f32 %v3908_v63, %v3886_v18  ;;  %v3918_v13 = vadd.f32 %v3909_v19, %v3888_v6  ;;  %v3887_v11 = vmul.f32 %v3880_v52, %v3857_v12  ;;  %v3889_v20 = vmul.f32 %v3881_v29, %v3859_v1 }
 0x6a3   : > { %v3924_v41 = vcombine.low %v3916_v57, %v3918_v13  ;;  %v3925_v4 = vcombine.high %v3916_v57, %v3918_v13  ;;  %v3917_v25 = vadd.f32 %v3910_v54, %v3887_v11  ;;  %v3919_v22 = vadd.f32 %v3911_v28, %v3889_v20 }
 0x6a5   : > { %3932 = vst [vmem:[#allocation3] sm:$0xff] %v3924_v41  ;;  %3933 = vst [vmem:[#allocation3 + $0x8] sm:$0xff] %v3925_v4  ;;  %v3926_v9 = vcombine.low %v3917_v25, %v3919_v22  ;;  %v3927_v36 = vcombine.high %v3917_v25, %v3919_v22 }
 0x6a7   : > { %3934 = vst [vmem:[#allocation3 + $0x10] sm:$0xff] %v3926_v9  ;;  %3935 = vst [vmem:[#allocation3 + $0x18] sm:$0xff] %v3927_v36 }
 0x6a8 PF: > { %p4027_p5 = scmp.eq.s32.totalorder %s4221_s25, 1  ;;  %s4174_s30 = smov [#allocation3]  }
 0x6a9   : > { %s3943_s8 = sshll.u32 %s4174_s30, 4  ;;  %s3944_s8 = int_to_ptr.vmem [resolvable:$true] %s3943_s8 }
 0x6aa   : > { %s4098_s9 = scalar_lea.vmem %s3944_s8, 512  ;;  %p4105_p9 = scmp.lt.s32.totalorder %s3944_s8, %s3944_s8 }
 0x6ab   : > { %p4099_p6 = scmp.ne.s32.totalorder %s3944_s8, %s4098_s9  ;;  %p4106_p10 = scmp.lt.s32.totalorder %s4098_s9, %s4098_s9 }
 0x6ad   : > { %p4100_p7 = pnand %p4099_p6, %p4027_p5  ;;  %p4107_p11 = por %p4106_p10, %p4105_p9 }
 0x6af   : > { %p4101_p8 = pneg %p4100_p7 }
 0x6b1   : > { %p4108_p12 = pnand %p4107_p11, %p4101_p8 }
 0x6b3   : > { %4111 = shalt.err (!%p4108_p12)
}
 0x6b4   : > { %s7354_s6 = sld [smem:[#allocation84_spill]] }
 0x6ba   : > { %s4112_s1 = scalar_lea.hbm %s7354_s6, 512 }
 0x6bb   : > { %p4113_p13 = scmp.ne.s32.totalorder %s7354_s6, %s4112_s1  ;;  %p4118_p2 = scmp.lt.u32.totalorder %s4112_s1, %s7354_s6 }
 0x6bd   : > { %p4114_p0 = pnand %p4113_p13, %p4027_p5 }
 0x6bf   : > { %p4115_p1 = pneg %p4114_p0 }
 0x6c1   : > { %p4120_p3 = pnand %p4118_p2, %p4115_p1 }
 0x6c3   : > { %4123 = shalt.err (!%p4120_p3)
}
 0x6c4   : > { %4024 = dma.vmem_to_hbm [thread:$0]  (%p4027_p5), %s3944_s8, 512, %s7354_s6, [#allocation4]  }
 0x6c5   : > { %4129 = dma.done.wait (%p4027_p5), [#allocation4], 512  }
 0x6c6   : > { %4131 = vsyncadd (%p4027_p5), [#allocation4], 4294966784 }
 0x6c7 PF: > { %s7355_s23 = sld [smem:[#allocation6_spill]] }
 0x6cd   : > { %s18_s24 = sadd.s32 1, %s7355_s23  }
 0x6ce   : > { %p15_p4 = scmp.ge.s32.totalorder %s18_s24, 4  }
 0x6d0   :  { %17 = sbr.rel (!%p15_p4) target bundleno = 8 (0x8), region = 83 }
 0x6d7   :  { %3956 = vsyncpa [#allocation4], 1 }
 0x6d8   :  { %3958 = vsyncpa [#allocation4 + $0x1], 1 }

</bundles_post_ra>
